<compile_context>
chip_gen: v6e
topology: v6e:2x2x1
jax: 0.10.0
libtpu: 0.0.40
codegen_flags: <defaults>
</compile_context>

<pallas_src>
import jax
import jax.numpy as jnp
from jax import lax
from jax.experimental import pallas as pl
from jax.experimental.pallas import tpu as pltpu

NEG_SLOPE = 0.01          # nn.LeakyReLU default negative_slope
LANES = 128               # slab lane width (one vreg row)


# ----------------------------------------------------------------------------
# Wrapper-side weight packing: one (R, 128) f32 slab == one HBM->VMEM DMA.
# ----------------------------------------------------------------------------
def _pad8(n):
    return -(-n // 8) * 8


def _pack_slab(named_arrays):
    """named_arrays: list of (name, 2-D f32 array).

    Returns (slab, {name: (row_offset, rows, cols)}) with every piece padded to
    a multiple of 8 rows so all in-kernel slices start sublane-aligned.
    """
    specs, off = {}, 0
    for name, a in named_arrays:
        r, c = a.shape
        assert c <= LANES
        specs[name] = (off, r, c)
        off += _pad8(r)
    slab = jnp.zeros((off, LANES), jnp.float32)
    for name, a in named_arrays:
        o, r, c = specs[name]
        slab = slab.at[o:o + r, :c].set(a.astype(jnp.float32))
    return slab, specs


# ----------------------------------------------------------------------------
# In-kernel helpers (operate on values inside the fused kernel)
# ----------------------------------------------------------------------------
def _leaky_relu(v):
    # leaky_relu(x) = max(x, slope*x) for 0 < slope < 1
    return jnp.maximum(v, NEG_SLOPE * v)


def _gate_consts(B, H):
    """Hoisted lane-mask constants so each step needs a single tanh:
       sigmoid(x) = 0.5*(1 + tanh(x/2)) on i/f/o lanes, tanh(x) on g lanes."""
    four_h = 4 * H
    lane = lax.broadcasted_iota(jnp.int32, (B, four_h), 1)
    is_g = jnp.logical_and(lane >= 2 * H, lane < 3 * H)
    half = jnp.where(is_g, 1.0, 0.5)          # pre-scale == post-scale
    add = jnp.where(is_g, 0.0, 0.5)           # post-add
    return half, add


def _lstm_stack_wavefront(x_tm, weights, H, B, T, emit):
    """Stacked LSTM, wavefront schedule, everything held in vregs.

    x_tm    : (T*B, Din) time-major value (row = t*B + b).
    weights : list of (W_ih^T (Din_l,4H), W_hh^T (H,4H), bias (1,4H)) values.
    emit    : emit(t, h) called with the LAST layer's hidden state at time t.
    PyTorch gate order i, f, g, o; bias = b_ih + b_hh (zero-init in this model).
    """
    L = len(weights)
    four_h = 4 * H
    half, add = _gate_consts(B, H)            # hoisted out of the unrolled loops

    # Layer 0 input projection hoisted: one matmul for all T steps (+ bias once).
    wih0, whh0, b0 = weights[0]
    gx0 = jnp.dot(x_tm, wih0, preferred_element_type=jnp.float32) + b0   # (T*B,4H)

    # Hoist per-layer weights / broadcasted biases out of the unrolled loops.
    layers = [(None, whh0, None)]
    for (wih, whh, b) in weights[1:]:
        layers.append((wih, whh, jnp.broadcast_to(b, (B, four_h))))

    h = [jnp.zeros((B, H), jnp.float32) for _ in range(L)]
    c = [jnp.zeros((B, H), jnp.float32) for _ in range(L)]

    for s in range(T + L - 1):                 # static -> fully unrolled
        new_h, new_c = list(h), list(c)        # snapshot: cells of one wavefront
        for l in range(L):                     # step are data-independent
            t = s - l
            if not (0 <= t < T):
                continue
            wih, whh, bias_b = layers[l]
            rec = jnp.dot(h[l], whh, preferred_element_type=jnp.float32)
            if l == 0:
                gates = gx0[t * B:(t + 1) * B, :] + rec
            else:
                # Input (layer below, time t) and recurrent projections are
                # independent; they pipeline back-to-back on the MXU.
                gates = rec + bias_b + jnp.dot(
                    h[l - 1], wih, preferred_element_type=jnp.float32)
            # One EUP pass over all 4H lanes (sigmoid realised via tanh).
            act = jnp.tanh(gates * half) * half + add
            i = act[:, 0 * H:1 * H]
            f = act[:, 1 * H:2 * H]
            g = act[:, 2 * H:3 * H]
            o = act[:, 3 * H:4 * H]
            c_new = f * c[l] + i * g
            h_new = o * jnp.tanh(c_new)
            new_h[l], new_c[l] = h_new, c_new
            if l == L - 1:
                emit(t, h_new)
        h, c = new_h, new_c


# ----------------------------------------------------------------------------
# Full forward: ONE fused pallas_call
# ----------------------------------------------------------------------------
def forward(x, params):
    """Returns (decoder_output, encoder_output), same as the PyTorch module."""
    enc_layers, dec_layers, fc = params["enc_lstm"], params["dec_lstm"], params["fc"]
    B, T, in_dim = x.shape
    enc_h = enc_layers[0][1].shape[0]            # hidden_dim (W_hh^T is (H, 4H))
    dec_h = dec_layers[0][1].shape[0]            # input_dim
    n_enc, n_dec, n_fc = len(enc_layers), len(dec_layers), len(fc)
    enc_out_dim = fc[n_fc // 2 - 1][0].shape[1]  # 8

    # --- pack every weight tensor into one slab: a single prologue DMA ------
    named = []
    for l, (wih, whh, b) in enumerate(enc_layers):
        named += [(f"enc{l}_wih", wih), (f"enc{l}_whh", whh), (f"enc{l}_b", b)]
    for l, (wih, whh, b) in enumerate(dec_layers):
        named += [(f"dec{l}_wih", wih), (f"dec{l}_whh", whh), (f"dec{l}_b", b)]
    for k, (w, b) in enumerate(fc):
        named += [(f"fc{k}_w", w), (f"fc{k}_b", b)]
    slab, specs = _pack_slab(named)

    # --- time-major 2-D input: no (B,T,D)<->(B*T,D) reshapes inside the kernel
    x_tm = jnp.transpose(x, (1, 0, 2)).reshape(T * B, in_dim)

    def kernel(x_ref, slab_ref, o_dec_ref, o_enc_ref, enc_seq_scr):
        def rd(name):                          # static-offset slab slice (view)
            o, r, cdim = specs[name]
            return slab_ref[o:o + r, 0:cdim]

        enc_w = [(rd(f"enc{l}_wih"), rd(f"enc{l}_whh"), rd(f"enc{l}_b"))
                 for l in range(n_enc)]
        dec_w = [(rd(f"dec{l}_wih"), rd(f"dec{l}_whh"), rd(f"dec{l}_b"))
                 for l in range(n_dec)]
        fc_w = [(rd(f"fc{k}_w"), rd(f"fc{k}_b")) for k in range(n_fc)]

        # --- encoder LSTM stack (wavefront); last layer -> boundary scratch ---
        def emit_enc(t, hv):
            enc_seq_scr[t * B:(t + 1) * B, :] = hv
        _lstm_stack_wavefront(x_ref[...], enc_w, enc_h, B, T, emit_enc)

        # --- FC encoder: 4x (Linear + LeakyReLU), all T*B rows at once -------
        a = enc_seq_scr[...]
        for k in range(n_fc // 2):
            w, b = fc_w[k]
            a = _leaky_relu(jnp.dot(a, w, preferred_element_type=jnp.float32) + b)
        o_enc_ref[...] = a                     # module's "encoder_output", 1 store

        # --- FC decoder: 4x (Linear + LeakyReLU) -----------------------------
        d = a
        for k in range(n_fc // 2, n_fc):
            w, b = fc_w[k]
            d = _leaky_relu(jnp.dot(d, w, preferred_element_type=jnp.float32) + b)

        # --- decoder LSTM stack; last layer writes straight to the output ----
        def emit_dec(t, hv):
            o_dec_ref[t * B:(t + 1) * B, :] = hv
        _lstm_stack_wavefront(d, dec_w, dec_h, B, T, emit_dec)

    dec2, enc2 = pl.pallas_call(
        kernel,
        out_shape=(jax.ShapeDtypeStruct((T * B, dec_h), jnp.float32),
                   jax.ShapeDtypeStruct((T * B, enc_out_dim), jnp.float32)),
        scratch_shapes=[pltpu.VMEM((T * B, enc_h), jnp.float32)],
    )(x_tm, slab)
    # NOTE (v7x): deliberately NO batch grid axis — at B=2 the kernel is purely
    # latency-bound, so splitting across the two TensorCores buys ~0% and adds
    # a second prologue's worth of weight DMA.  If many sequences are available
    # batch them into one call (extra rows are nearly free on the MXU).
    # TODO(synk): add a ("parallel",) batch grid axis only if deployed batch
    # grows to >=16 per core.

    dec_out = dec2.reshape(T, B, dec_h).transpose(1, 0, 2)
    enc_out = enc2.reshape(T, B, enc_out_dim).transpose(1, 0, 2)
    return dec_out, enc_out


# ----------------------------------------------------------------------------
# Pure-JAX reference (same math, no Pallas) for correctness check
# ----------------------------------------------------------------------------
def _lstm_stack_ref(x, layers):
    B, T, _ = x.shape
    out = x
    for (wih_t, whh_t, b) in layers:
        H = whh_t.shape[0]
        h = jnp.zeros((B, H), jnp.float32)
        c = jnp.zeros((B, H), jnp.float32)
        ys = []
        for t in range(T):
            g_all = out[:, t, :] @ wih_t + h @ whh_t + b
            i = jax.nn.sigmoid(g_all[:, :H])
            f = jax.nn.sigmoid(g_all[:, H:2 * H])
            g = jnp.tanh(g_all[:, 2 * H:3 * H])
            o = jax.nn.sigmoid(g_all[:, 3 * H:])
            c = f * c + i * g
            h = o * jnp.tanh(c)
            ys.append(h)
        out = jnp.stack(ys, axis=1)
    return out


def _forward_ref(x, params):
    def leaky(v):
        return jnp.where(v > 0, v, NEG_SLOPE * v)
    B, T, _ = x.shape
    enc_seq = _lstm_stack_ref(x, params["enc_lstm"])
    h = enc_seq.reshape(B * T, -1)
    for k in range(4):
        w, b = params["fc"][k]
        h = leaky(h @ w + b)
    enc_out = h.reshape(B, T, -1)
    d = h
    for k in range(4, 8):
        w, b = params["fc"][k]
        d = leaky(d @ w + b)
    dec_in = d.reshape(B, T, -1)
    dec_seq = _lstm_stack_ref(dec_in, params["dec_lstm"])
    return dec_seq, enc_out


# ----------------------------------------------------------------------------
# Deterministic parameter init (shapes from __init__; xavier/orthogonal style)
# ----------------------------------------------------------------------------
def init_params(key, input_dim, hidden_dim, latent_dim, num_layers):
    keys = iter(jax.random.split(key, 128))

    def xavier(shape):  # torch (out_features, in_features) convention
        fan_out, fan_in = shape
        std = (2.0 / (fan_in + fan_out)) ** 0.5
        return std * jax.random.normal(next(keys), shape, jnp.float32)

    def orthogonal(shape):
        a = jax.random.normal(next(keys), shape, jnp.float32)
        q, r = jnp.linalg.qr(a)
        d = jnp.diagonal(r)
        q = q * jnp.where(d >= 0, 1.0, -1.0)[None, :]   # sign fix, safe at d == 0
        return q

    def bias_uniform(fan_in, dim):
        bound = 1.0 / (fan_in ** 0.5)
        return jax.random.uniform(next(keys), (1, dim), jnp.float32, -bound, bound)

    def lstm_params(in_dim, hid):
        layers = []
        for l in range(num_layers):
            d = in_dim if l == 0 else hid
            w_ih = xavier((4 * hid, d))                   # xavier_normal_
            w_hh = orthogonal((4 * hid, hid))             # orthogonal_
            b = jnp.zeros((1, 4 * hid), jnp.float32)      # b_ih + b_hh, zero-init
            layers.append((w_ih.T, w_hh.T, b))            # stored transposed
        return layers

    enc_lstm = lstm_params(input_dim, hidden_dim)         # in->hid, hid->hid x2
    dec_lstm = lstm_params(hidden_dim, input_dim)         # hid->in, in->in x2

    fc_dims = [(hidden_dim, latent_dim),  # encoder_fc
               (64, 32),                  # encoder_fc2
               (32, 16),                  # encoder_fc3
               (16, 8),                   # encoder_fc4
               (8, 16),                   # decoder_fc
               (16, 32),                  # decoder_fc2
               (32, 64),                  # decoder_fc3
               (latent_dim, hidden_dim)]  # decoder_fc4
    fc = []
    for din, dout in fc_dims:
        w = xavier((dout, din))
        b = bias_uniform(din, dout)       # default Linear bias init (not re-init'd)
        fc.append((w.T, b))

    return {"enc_lstm": enc_lstm, "dec_lstm": dec_lstm, "fc": fc}


# ----------------------------------------------------------------------------
if __name__ == "__main__":
    INPUT_DIM, HIDDEN_DIM, LATENT_DIM, SEQ_LEN, NUM_LAYERS = 16, 32, 64, 8, 3
    BATCH = 2

    key = jax.random.PRNGKey(0)
    k_params, k_x = jax.random.split(key)
    params = init_params(k_params, INPUT_DIM, HIDDEN_DIM, LATENT_DIM, NUM_LAYERS)
    x = jax.random.normal(k_x, (BATCH, SEQ_LEN, INPUT_DIM), jnp.float32)

    dec_out, enc_out = forward(x, params)
    jax.block_until_ready((dec_out, enc_out))

    assert dec_out.shape == (BATCH, SEQ_LEN, INPUT_DIM)
    assert enc_out.shape == (BATCH, SEQ_LEN, 8)

    with jax.default_matmul_precision("highest"):
        dec_ref, enc_ref = _forward_ref(x, params)
        dec_ref, enc_ref = jax.block_until_ready((dec_ref, enc_ref))
    err = max(float(jnp.max(jnp.abs(dec_out - dec_ref))),
              float(jnp.max(jnp.abs(enc_out - enc_ref))))
    assert err < 1e-3, f"mismatch vs reference: {err}"

    print("KERNEL_OK")
</pallas_src>

<mosaic_0001>
module attributes {stable_mosaic.version = 11 : i64} {
  func.func @kernel(%arg0: memref<16x16xf32, #tpu.memory_space<vmem>>, %arg1: memref<664x128xf32, #tpu.memory_space<vmem>>, %arg2: memref<16x16xf32, #tpu.memory_space<vmem>>, %arg3: memref<16x8xf32, #tpu.memory_space<vmem>>, %arg4: memref<16x32xf32, #tpu.memory_space<vmem>>) attributes {dimension_semantics = [], scalar_prefetch = 0 : i64, scratch_operands = 1 : i64, tpu.core_type = #tpu.core_type<tc>} {
    %c0 = arith.constant 0 : index
    %c0_0 = arith.constant 0 : index
    %0 = vector.load %arg1[%c0, %c0_0] : memref<664x128xf32, #tpu.memory_space<vmem>>, vector<16x128xf32>
    %c16 = arith.constant 16 : index
    %c0_1 = arith.constant 0 : index
    %1 = vector.load %arg1[%c16, %c0_1] : memref<664x128xf32, #tpu.memory_space<vmem>>, vector<32x128xf32>
    %c48 = arith.constant 48 : index
    %c0_2 = arith.constant 0 : index
    %2 = vector.load %arg1[%c48, %c0_2] : memref<664x128xf32, #tpu.memory_space<vmem>>, vector<1x128xf32>
    %c56 = arith.constant 56 : index
    %c0_3 = arith.constant 0 : index
    %3 = vector.load %arg1[%c56, %c0_3] : memref<664x128xf32, #tpu.memory_space<vmem>>, vector<32x128xf32>
    %c88 = arith.constant 88 : index
    %c0_4 = arith.constant 0 : index
    %4 = vector.load %arg1[%c88, %c0_4] : memref<664x128xf32, #tpu.memory_space<vmem>>, vector<32x128xf32>
    %c120 = arith.constant 120 : index
    %c0_5 = arith.constant 0 : index
    %5 = vector.load %arg1[%c120, %c0_5] : memref<664x128xf32, #tpu.memory_space<vmem>>, vector<1x128xf32>
    %c128 = arith.constant 128 : index
    %c0_6 = arith.constant 0 : index
    %6 = vector.load %arg1[%c128, %c0_6] : memref<664x128xf32, #tpu.memory_space<vmem>>, vector<32x128xf32>
    %c160 = arith.constant 160 : index
    %c0_7 = arith.constant 0 : index
    %7 = vector.load %arg1[%c160, %c0_7] : memref<664x128xf32, #tpu.memory_space<vmem>>, vector<32x128xf32>
    %c192 = arith.constant 192 : index
    %c0_8 = arith.constant 0 : index
    %8 = vector.load %arg1[%c192, %c0_8] : memref<664x128xf32, #tpu.memory_space<vmem>>, vector<1x128xf32>
    %c200 = arith.constant 200 : index
    %c0_9 = arith.constant 0 : index
    %9 = vector.load %arg1[%c200, %c0_9] : memref<664x128xf32, #tpu.memory_space<vmem>>, vector<32x64xf32>
    %c232 = arith.constant 232 : index
    %c0_10 = arith.constant 0 : index
    %10 = vector.load %arg1[%c232, %c0_10] : memref<664x128xf32, #tpu.memory_space<vmem>>, vector<16x64xf32>
    %c248 = arith.constant 248 : index
    %c0_11 = arith.constant 0 : index
    %11 = vector.load %arg1[%c248, %c0_11] : memref<664x128xf32, #tpu.memory_space<vmem>>, vector<1x64xf32>
    %c256 = arith.constant 256 : index
    %c0_12 = arith.constant 0 : index
    %12 = vector.load %arg1[%c256, %c0_12] : memref<664x128xf32, #tpu.memory_space<vmem>>, vector<16x64xf32>
    %c272 = arith.constant 272 : index
    %c0_13 = arith.constant 0 : index
    %13 = vector.load %arg1[%c272, %c0_13] : memref<664x128xf32, #tpu.memory_space<vmem>>, vector<16x64xf32>
    %c288 = arith.constant 288 : index
    %c0_14 = arith.constant 0 : index
    %14 = vector.load %arg1[%c288, %c0_14] : memref<664x128xf32, #tpu.memory_space<vmem>>, vector<1x64xf32>
    %c296 = arith.constant 296 : index
    %c0_15 = arith.constant 0 : index
    %15 = vector.load %arg1[%c296, %c0_15] : memref<664x128xf32, #tpu.memory_space<vmem>>, vector<16x64xf32>
    %c312 = arith.constant 312 : index
    %c0_16 = arith.constant 0 : index
    %16 = vector.load %arg1[%c312, %c0_16] : memref<664x128xf32, #tpu.memory_space<vmem>>, vector<16x64xf32>
    %c328 = arith.constant 328 : index
    %c0_17 = arith.constant 0 : index
    %17 = vector.load %arg1[%c328, %c0_17] : memref<664x128xf32, #tpu.memory_space<vmem>>, vector<1x64xf32>
    %c336 = arith.constant 336 : index
    %c0_18 = arith.constant 0 : index
    %18 = vector.load %arg1[%c336, %c0_18] : memref<664x128xf32, #tpu.memory_space<vmem>>, vector<32x64xf32>
    %c368 = arith.constant 368 : index
    %c0_19 = arith.constant 0 : index
    %19 = vector.load %arg1[%c368, %c0_19] : memref<664x128xf32, #tpu.memory_space<vmem>>, vector<1x64xf32>
    %c376 = arith.constant 376 : index
    %c0_20 = arith.constant 0 : index
    %20 = vector.load %arg1[%c376, %c0_20] : memref<664x128xf32, #tpu.memory_space<vmem>>, vector<64x32xf32>
    %c440 = arith.constant 440 : index
    %c0_21 = arith.constant 0 : index
    %21 = vector.load %arg1[%c440, %c0_21] : memref<664x128xf32, #tpu.memory_space<vmem>>, vector<1x32xf32>
    %c448 = arith.constant 448 : index
    %c0_22 = arith.constant 0 : index
    %22 = vector.load %arg1[%c448, %c0_22] : memref<664x128xf32, #tpu.memory_space<vmem>>, vector<32x16xf32>
    %c480 = arith.constant 480 : index
    %c0_23 = arith.constant 0 : index
    %23 = vector.load %arg1[%c480, %c0_23] : memref<664x128xf32, #tpu.memory_space<vmem>>, vector<1x16xf32>
    %c488 = arith.constant 488 : index
    %c0_24 = arith.constant 0 : index
    %24 = vector.load %arg1[%c488, %c0_24] : memref<664x128xf32, #tpu.memory_space<vmem>>, vector<16x8xf32>
    %c504 = arith.constant 504 : index
    %c0_25 = arith.constant 0 : index
    %25 = vector.load %arg1[%c504, %c0_25] : memref<664x128xf32, #tpu.memory_space<vmem>>, vector<1x8xf32>
    %c512 = arith.constant 512 : index
    %c0_26 = arith.constant 0 : index
    %26 = vector.load %arg1[%c512, %c0_26] : memref<664x128xf32, #tpu.memory_space<vmem>>, vector<8x16xf32>
    %c520 = arith.constant 520 : index
    %c0_27 = arith.constant 0 : index
    %27 = vector.load %arg1[%c520, %c0_27] : memref<664x128xf32, #tpu.memory_space<vmem>>, vector<1x16xf32>
    %c528 = arith.constant 528 : index
    %c0_28 = arith.constant 0 : index
    %28 = vector.load %arg1[%c528, %c0_28] : memref<664x128xf32, #tpu.memory_space<vmem>>, vector<16x32xf32>
    %c544 = arith.constant 544 : index
    %c0_29 = arith.constant 0 : index
    %29 = vector.load %arg1[%c544, %c0_29] : memref<664x128xf32, #tpu.memory_space<vmem>>, vector<1x32xf32>
    %c552 = arith.constant 552 : index
    %c0_30 = arith.constant 0 : index
    %30 = vector.load %arg1[%c552, %c0_30] : memref<664x128xf32, #tpu.memory_space<vmem>>, vector<32x64xf32>
    %c584 = arith.constant 584 : index
    %c0_31 = arith.constant 0 : index
    %31 = vector.load %arg1[%c584, %c0_31] : memref<664x128xf32, #tpu.memory_space<vmem>>, vector<1x64xf32>
    %c592 = arith.constant 592 : index
    %c0_32 = arith.constant 0 : index
    %32 = vector.load %arg1[%c592, %c0_32] : memref<664x128xf32, #tpu.memory_space<vmem>>, vector<64x32xf32>
    %c656 = arith.constant 656 : index
    %c0_33 = arith.constant 0 : index
    %33 = vector.load %arg1[%c656, %c0_33] : memref<664x128xf32, #tpu.memory_space<vmem>>, vector<1x32xf32>
    %c0_34 = arith.constant 0 : index
    %c0_35 = arith.constant 0 : index
    %34 = vector.load %arg0[%c0_34, %c0_35] : memref<16x16xf32, #tpu.memory_space<vmem>>, vector<16x16xf32>
    %35 = tpu.iota {dimensions = array<i32: 1>} : vector<2x128xi32>
    %c64_i32 = arith.constant 64 : i32
    %36 = vector.broadcast %c64_i32 : i32 to vector<2x128xi32>
    %37 = arith.cmpi sge, %35, %36 : vector<2x128xi32>
    %c96_i32 = arith.constant 96 : i32
    %38 = vector.broadcast %c96_i32 : i32 to vector<2x128xi32>
    %39 = arith.cmpi slt, %35, %38 : vector<2x128xi32>
    %40 = arith.andi %37, %39 : vector<2x128xi1>
    %cst = arith.constant 1.000000e+00 : f32
    %cst_36 = arith.constant 5.000000e-01 : f32
    %41 = vector.broadcast %cst : f32 to vector<2x128xf32>
    %42 = vector.broadcast %cst_36 : f32 to vector<2x128xf32>
    %43 = arith.select %40, %41, %42 : vector<2x128xi1>, vector<2x128xf32>
    %cst_37 = arith.constant 0.000000e+00 : f32
    %cst_38 = arith.constant 5.000000e-01 : f32
    %44 = vector.broadcast %cst_37 : f32 to vector<2x128xf32>
    %45 = vector.broadcast %cst_38 : f32 to vector<2x128xf32>
    %46 = arith.select %40, %44, %45 : vector<2x128xi1>, vector<2x128xf32>
    %cst_39 = arith.constant dense<0.000000e+00> : vector<16x128xf32>
    %47 = tpu.matmul %34, %0, %cst_39 {dimension_numbers = #tpu.dot_dimension_numbers<[1], [0], [0], [1], [0, 0, 1, 1], [], []>} : vector<16x16xf32>, vector<16x128xf32>, vector<16x128xf32> -> vector<16x128xf32>
    %48 = vector.broadcast %2 : vector<1x128xf32> to vector<16x128xf32>
    %49 = arith.addf %47, %48 : vector<16x128xf32>
    %50 = vector.shape_cast %5 : vector<1x128xf32> to vector<1x128xf32>
    %51 = vector.broadcast %50 : vector<1x128xf32> to vector<2x128xf32>
    %52 = vector.shape_cast %8 : vector<1x128xf32> to vector<1x128xf32>
    %53 = vector.broadcast %52 : vector<1x128xf32> to vector<2x128xf32>
    %cst_40 = arith.constant 0.000000e+00 : f32
    %54 = vector.broadcast %cst_40 : f32 to vector<2x32xf32>
    %cst_41 = arith.constant 0.000000e+00 : f32
    %55 = vector.broadcast %cst_41 : f32 to vector<2x32xf32>
    %cst_42 = arith.constant 0.000000e+00 : f32
    %56 = vector.broadcast %cst_42 : f32 to vector<2x32xf32>
    %cst_43 = arith.constant 0.000000e+00 : f32
    %57 = vector.broadcast %cst_43 : f32 to vector<2x32xf32>
    %cst_44 = arith.constant 0.000000e+00 : f32
    %58 = vector.broadcast %cst_44 : f32 to vector<2x32xf32>
    %cst_45 = arith.constant 0.000000e+00 : f32
    %59 = vector.broadcast %cst_45 : f32 to vector<2x32xf32>
    %cst_46 = arith.constant dense<0.000000e+00> : vector<2x128xf32>
    %60 = tpu.matmul %54, %1, %cst_46 {dimension_numbers = #tpu.dot_dimension_numbers<[1], [0], [0], [1], [0, 0, 1, 1], [], []>} : vector<2x32xf32>, vector<32x128xf32>, vector<2x128xf32> -> vector<2x128xf32>
    %61 = vector.extract_strided_slice %49 {offsets = [0, 0], sizes = [2, 128], strides = [1, 1]} : vector<16x128xf32> to vector<2x128xf32>
    %62 = arith.addf %61, %60 : vector<2x128xf32>
    %63 = arith.mulf %62, %43 : vector<2x128xf32>
    %64 = math.tanh %63 : vector<2x128xf32>
    %65 = arith.mulf %64, %43 : vector<2x128xf32>
    %66 = arith.addf %65, %46 : vector<2x128xf32>
    %67 = vector.extract_strided_slice %66 {offsets = [0, 0], sizes = [2, 32], strides = [1, 1]} : vector<2x128xf32> to vector<2x32xf32>
    %68 = vector.extract_strided_slice %66 {offsets = [0, 32], sizes = [2, 32], strides = [1, 1]} : vector<2x128xf32> to vector<2x32xf32>
    %69 = vector.extract_strided_slice %66 {offsets = [0, 64], sizes = [2, 32], strides = [1, 1]} : vector<2x128xf32> to vector<2x32xf32>
    %70 = vector.extract_strided_slice %66 {offsets = [0, 96], sizes = [2, 32], strides = [1, 1]} : vector<2x128xf32> to vector<2x32xf32>
    %71 = arith.mulf %68, %57 : vector<2x32xf32>
    %72 = arith.mulf %67, %69 : vector<2x32xf32>
    %73 = arith.addf %71, %72 : vector<2x32xf32>
    %74 = math.tanh %73 : vector<2x32xf32>
    %75 = arith.mulf %70, %74 : vector<2x32xf32>
    %cst_47 = arith.constant dense<0.000000e+00> : vector<2x128xf32>
    %76 = tpu.matmul %75, %1, %cst_47 {dimension_numbers = #tpu.dot_dimension_numbers<[1], [0], [0], [1], [0, 0, 1, 1], [], []>} : vector<2x32xf32>, vector<32x128xf32>, vector<2x128xf32> -> vector<2x128xf32>
    %77 = vector.extract_strided_slice %49 {offsets = [2, 0], sizes = [2, 128], strides = [1, 1]} : vector<16x128xf32> to vector<2x128xf32>
    %78 = arith.addf %77, %76 : vector<2x128xf32>
    %79 = arith.mulf %78, %43 : vector<2x128xf32>
    %80 = math.tanh %79 : vector<2x128xf32>
    %81 = arith.mulf %80, %43 : vector<2x128xf32>
    %82 = arith.addf %81, %46 : vector<2x128xf32>
    %83 = vector.extract_strided_slice %82 {offsets = [0, 0], sizes = [2, 32], strides = [1, 1]} : vector<2x128xf32> to vector<2x32xf32>
    %84 = vector.extract_strided_slice %82 {offsets = [0, 32], sizes = [2, 32], strides = [1, 1]} : vector<2x128xf32> to vector<2x32xf32>
    %85 = vector.extract_strided_slice %82 {offsets = [0, 64], sizes = [2, 32], strides = [1, 1]} : vector<2x128xf32> to vector<2x32xf32>
    %86 = vector.extract_strided_slice %82 {offsets = [0, 96], sizes = [2, 32], strides = [1, 1]} : vector<2x128xf32> to vector<2x32xf32>
    %87 = arith.mulf %84, %73 : vector<2x32xf32>
    %88 = arith.mulf %83, %85 : vector<2x32xf32>
    %89 = arith.addf %87, %88 : vector<2x32xf32>
    %90 = math.tanh %89 : vector<2x32xf32>
    %91 = arith.mulf %86, %90 : vector<2x32xf32>
    %cst_48 = arith.constant dense<0.000000e+00> : vector<2x128xf32>
    %92 = tpu.matmul %55, %4, %cst_48 {dimension_numbers = #tpu.dot_dimension_numbers<[1], [0], [0], [1], [0, 0, 1, 1], [], []>} : vector<2x32xf32>, vector<32x128xf32>, vector<2x128xf32> -> vector<2x128xf32>
    %93 = arith.addf %92, %51 : vector<2x128xf32>
    %cst_49 = arith.constant dense<0.000000e+00> : vector<2x128xf32>
    %94 = tpu.matmul %75, %3, %cst_49 {dimension_numbers = #tpu.dot_dimension_numbers<[1], [0], [0], [1], [0, 0, 1, 1], [], []>} : vector<2x32xf32>, vector<32x128xf32>, vector<2x128xf32> -> vector<2x128xf32>
    %95 = arith.addf %93, %94 : vector<2x128xf32>
    %96 = arith.mulf %95, %43 : vector<2x128xf32>
    %97 = math.tanh %96 : vector<2x128xf32>
    %98 = arith.mulf %97, %43 : vector<2x128xf32>
    %99 = arith.addf %98, %46 : vector<2x128xf32>
    %100 = vector.extract_strided_slice %99 {offsets = [0, 0], sizes = [2, 32], strides = [1, 1]} : vector<2x128xf32> to vector<2x32xf32>
    %101 = vector.extract_strided_slice %99 {offsets = [0, 32], sizes = [2, 32], strides = [1, 1]} : vector<2x128xf32> to vector<2x32xf32>
    %102 = vector.extract_strided_slice %99 {offsets = [0, 64], sizes = [2, 32], strides = [1, 1]} : vector<2x128xf32> to vector<2x32xf32>
    %103 = vector.extract_strided_slice %99 {offsets = [0, 96], sizes = [2, 32], strides = [1, 1]} : vector<2x128xf32> to vector<2x32xf32>
    %104 = arith.mulf %101, %58 : vector<2x32xf32>
    %105 = arith.mulf %100, %102 : vector<2x32xf32>
    %106 = arith.addf %104, %105 : vector<2x32xf32>
    %107 = math.tanh %106 : vector<2x32xf32>
    %108 = arith.mulf %103, %107 : vector<2x32xf32>
    %cst_50 = arith.constant dense<0.000000e+00> : vector<2x128xf32>
    %109 = tpu.matmul %91, %1, %cst_50 {dimension_numbers = #tpu.dot_dimension_numbers<[1], [0], [0], [1], [0, 0, 1, 1], [], []>} : vector<2x32xf32>, vector<32x128xf32>, vector<2x128xf32> -> vector<2x128xf32>
    %110 = vector.extract_strided_slice %49 {offsets = [4, 0], sizes = [2, 128], strides = [1, 1]} : vector<16x128xf32> to vector<2x128xf32>
    %111 = arith.addf %110, %109 : vector<2x128xf32>
    %112 = arith.mulf %111, %43 : vector<2x128xf32>
    %113 = math.tanh %112 : vector<2x128xf32>
    %114 = arith.mulf %113, %43 : vector<2x128xf32>
    %115 = arith.addf %114, %46 : vector<2x128xf32>
    %116 = vector.extract_strided_slice %115 {offsets = [0, 0], sizes = [2, 32], strides = [1, 1]} : vector<2x128xf32> to vector<2x32xf32>
    %117 = vector.extract_strided_slice %115 {offsets = [0, 32], sizes = [2, 32], strides = [1, 1]} : vector<2x128xf32> to vector<2x32xf32>
    %118 = vector.extract_strided_slice %115 {offsets = [0, 64], sizes = [2, 32], strides = [1, 1]} : vector<2x128xf32> to vector<2x32xf32>
    %119 = vector.extract_strided_slice %115 {offsets = [0, 96], sizes = [2, 32], strides = [1, 1]} : vector<2x128xf32> to vector<2x32xf32>
    %120 = arith.mulf %117, %89 : vector<2x32xf32>
    %121 = arith.mulf %116, %118 : vector<2x32xf32>
    %122 = arith.addf %120, %121 : vector<2x32xf32>
    %123 = math.tanh %122 : vector<2x32xf32>
    %124 = arith.mulf %119, %123 : vector<2x32xf32>
    %cst_51 = arith.constant dense<0.000000e+00> : vector<2x128xf32>
    %125 = tpu.matmul %108, %4, %cst_51 {dimension_numbers = #tpu.dot_dimension_numbers<[1], [0], [0], [1], [0, 0, 1, 1], [], []>} : vector<2x32xf32>, vector<32x128xf32>, vector<2x128xf32> -> vector<2x128xf32>
    %126 = arith.addf %125, %51 : vector<2x128xf32>
    %cst_52 = arith.constant dense<0.000000e+00> : vector<2x128xf32>
    %127 = tpu.matmul %91, %3, %cst_52 {dimension_numbers = #tpu.dot_dimension_numbers<[1], [0], [0], [1], [0, 0, 1, 1], [], []>} : vector<2x32xf32>, vector<32x128xf32>, vector<2x128xf32> -> vector<2x128xf32>
    %128 = arith.addf %126, %127 : vector<2x128xf32>
    %129 = arith.mulf %128, %43 : vector<2x128xf32>
    %130 = math.tanh %129 : vector<2x128xf32>
    %131 = arith.mulf %130, %43 : vector<2x128xf32>
    %132 = arith.addf %131, %46 : vector<2x128xf32>
    %133 = vector.extract_strided_slice %132 {offsets = [0, 0], sizes = [2, 32], strides = [1, 1]} : vector<2x128xf32> to vector<2x32xf32>
    %134 = vector.extract_strided_slice %132 {offsets = [0, 32], sizes = [2, 32], strides = [1, 1]} : vector<2x128xf32> to vector<2x32xf32>
    %135 = vector.extract_strided_slice %132 {offsets = [0, 64], sizes = [2, 32], strides = [1, 1]} : vector<2x128xf32> to vector<2x32xf32>
    %136 = vector.extract_strided_slice %132 {offsets = [0, 96], sizes = [2, 32], strides = [1, 1]} : vector<2x128xf32> to vector<2x32xf32>
    %137 = arith.mulf %134, %106 : vector<2x32xf32>
    %138 = arith.mulf %133, %135 : vector<2x32xf32>
    %139 = arith.addf %137, %138 : vector<2x32xf32>
    %140 = math.tanh %139 : vector<2x32xf32>
    %141 = arith.mulf %136, %140 : vector<2x32xf32>
    %cst_53 = arith.constant dense<0.000000e+00> : vector<2x128xf32>
    %142 = tpu.matmul %56, %7, %cst_53 {dimension_numbers = #tpu.dot_dimension_numbers<[1], [0], [0], [1], [0, 0, 1, 1], [], []>} : vector<2x32xf32>, vector<32x128xf32>, vector<2x128xf32> -> vector<2x128xf32>
    %143 = arith.addf %142, %53 : vector<2x128xf32>
    %cst_54 = arith.constant dense<0.000000e+00> : vector<2x128xf32>
    %144 = tpu.matmul %108, %6, %cst_54 {dimension_numbers = #tpu.dot_dimension_numbers<[1], [0], [0], [1], [0, 0, 1, 1], [], []>} : vector<2x32xf32>, vector<32x128xf32>, vector<2x128xf32> -> vector<2x128xf32>
    %145 = arith.addf %143, %144 : vector<2x128xf32>
    %146 = arith.mulf %145, %43 : vector<2x128xf32>
    %147 = math.tanh %146 : vector<2x128xf32>
    %148 = arith.mulf %147, %43 : vector<2x128xf32>
    %149 = arith.addf %148, %46 : vector<2x128xf32>
    %150 = vector.extract_strided_slice %149 {offsets = [0, 0], sizes = [2, 32], strides = [1, 1]} : vector<2x128xf32> to vector<2x32xf32>
    %151 = vector.extract_strided_slice %149 {offsets = [0, 32], sizes = [2, 32], strides = [1, 1]} : vector<2x128xf32> to vector<2x32xf32>
    %152 = vector.extract_strided_slice %149 {offsets = [0, 64], sizes = [2, 32], strides = [1, 1]} : vector<2x128xf32> to vector<2x32xf32>
    %153 = vector.extract_strided_slice %149 {offsets = [0, 96], sizes = [2, 32], strides = [1, 1]} : vector<2x128xf32> to vector<2x32xf32>
    %154 = arith.mulf %151, %59 : vector<2x32xf32>
    %155 = arith.mulf %150, %152 : vector<2x32xf32>
    %156 = arith.addf %154, %155 : vector<2x32xf32>
    %157 = math.tanh %156 : vector<2x32xf32>
    %158 = arith.mulf %153, %157 : vector<2x32xf32>
    %c0_55 = arith.constant 0 : index
    %c0_56 = arith.constant 0 : index
    %159 = vector.load %arg4[%c0_55, %c0_56] : memref<16x32xf32, #tpu.memory_space<vmem>>, vector<2x32xf32>
    tpu.vector_store %arg4[%c0_55, %c0_56], %158 {strides = array<i32>} : memref<16x32xf32, #tpu.memory_space<vmem>>, vector<2x32xf32>,
    %cst_57 = arith.constant dense<0.000000e+00> : vector<2x128xf32>
    %160 = tpu.matmul %124, %1, %cst_57 {dimension_numbers = #tpu.dot_dimension_numbers<[1], [0], [0], [1], [0, 0, 1, 1], [], []>} : vector<2x32xf32>, vector<32x128xf32>, vector<2x128xf32> -> vector<2x128xf32>
    %161 = vector.extract_strided_slice %49 {offsets = [6, 0], sizes = [2, 128], strides = [1, 1]} : vector<16x128xf32> to vector<2x128xf32>
    %162 = arith.addf %161, %160 : vector<2x128xf32>
    %163 = arith.mulf %162, %43 : vector<2x128xf32>
    %164 = math.tanh %163 : vector<2x128xf32>
    %165 = arith.mulf %164, %43 : vector<2x128xf32>
    %166 = arith.addf %165, %46 : vector<2x128xf32>
    %167 = vector.extract_strided_slice %166 {offsets = [0, 0], sizes = [2, 32], strides = [1, 1]} : vector<2x128xf32> to vector<2x32xf32>
    %168 = vector.extract_strided_slice %166 {offsets = [0, 32], sizes = [2, 32], strides = [1, 1]} : vector<2x128xf32> to vector<2x32xf32>
    %169 = vector.extract_strided_slice %166 {offsets = [0, 64], sizes = [2, 32], strides = [1, 1]} : vector<2x128xf32> to vector<2x32xf32>
    %170 = vector.extract_strided_slice %166 {offsets = [0, 96], sizes = [2, 32], strides = [1, 1]} : vector<2x128xf32> to vector<2x32xf32>
    %171 = arith.mulf %168, %122 : vector<2x32xf32>
    %172 = arith.mulf %167, %169 : vector<2x32xf32>
    %173 = arith.addf %171, %172 : vector<2x32xf32>
    %174 = math.tanh %173 : vector<2x32xf32>
    %175 = arith.mulf %170, %174 : vector<2x32xf32>
    %cst_58 = arith.constant dense<0.000000e+00> : vector<2x128xf32>
    %176 = tpu.matmul %141, %4, %cst_58 {dimension_numbers = #tpu.dot_dimension_numbers<[1], [0], [0], [1], [0, 0, 1, 1], [], []>} : vector<2x32xf32>, vector<32x128xf32>, vector<2x128xf32> -> vector<2x128xf32>
    %177 = arith.addf %176, %51 : vector<2x128xf32>
    %cst_59 = arith.constant dense<0.000000e+00> : vector<2x128xf32>
    %178 = tpu.matmul %124, %3, %cst_59 {dimension_numbers = #tpu.dot_dimension_numbers<[1], [0], [0], [1], [0, 0, 1, 1], [], []>} : vector<2x32xf32>, vector<32x128xf32>, vector<2x128xf32> -> vector<2x128xf32>
    %179 = arith.addf %177, %178 : vector<2x128xf32>
    %180 = arith.mulf %179, %43 : vector<2x128xf32>
    %181 = math.tanh %180 : vector<2x128xf32>
    %182 = arith.mulf %181, %43 : vector<2x128xf32>
    %183 = arith.addf %182, %46 : vector<2x128xf32>
    %184 = vector.extract_strided_slice %183 {offsets = [0, 0], sizes = [2, 32], strides = [1, 1]} : vector<2x128xf32> to vector<2x32xf32>
    %185 = vector.extract_strided_slice %183 {offsets = [0, 32], sizes = [2, 32], strides = [1, 1]} : vector<2x128xf32> to vector<2x32xf32>
    %186 = vector.extract_strided_slice %183 {offsets = [0, 64], sizes = [2, 32], strides = [1, 1]} : vector<2x128xf32> to vector<2x32xf32>
    %187 = vector.extract_strided_slice %183 {offsets = [0, 96], sizes = [2, 32], strides = [1, 1]} : vector<2x128xf32> to vector<2x32xf32>
    %188 = arith.mulf %185, %139 : vector<2x32xf32>
    %189 = arith.mulf %184, %186 : vector<2x32xf32>
    %190 = arith.addf %188, %189 : vector<2x32xf32>
    %191 = math.tanh %190 : vector<2x32xf32>
    %192 = arith.mulf %187, %191 : vector<2x32xf32>
    %cst_60 = arith.constant dense<0.000000e+00> : vector<2x128xf32>
    %193 = tpu.matmul %158, %7, %cst_60 {dimension_numbers = #tpu.dot_dimension_numbers<[1], [0], [0], [1], [0, 0, 1, 1], [], []>} : vector<2x32xf32>, vector<32x128xf32>, vector<2x128xf32> -> vector<2x128xf32>
    %194 = arith.addf %193, %53 : vector<2x128xf32>
    %cst_61 = arith.constant dense<0.000000e+00> : vector<2x128xf32>
    %195 = tpu.matmul %141, %6, %cst_61 {dimension_numbers = #tpu.dot_dimension_numbers<[1], [0], [0], [1], [0, 0, 1, 1], [], []>} : vector<2x32xf32>, vector<32x128xf32>, vector<2x128xf32> -> vector<2x128xf32>
    %196 = arith.addf %194, %195 : vector<2x128xf32>
    %197 = arith.mulf %196, %43 : vector<2x128xf32>
    %198 = math.tanh %197 : vector<2x128xf32>
    %199 = arith.mulf %198, %43 : vector<2x128xf32>
    %200 = arith.addf %199, %46 : vector<2x128xf32>
    %201 = vector.extract_strided_slice %200 {offsets = [0, 0], sizes = [2, 32], strides = [1, 1]} : vector<2x128xf32> to vector<2x32xf32>
    %202 = vector.extract_strided_slice %200 {offsets = [0, 32], sizes = [2, 32], strides = [1, 1]} : vector<2x128xf32> to vector<2x32xf32>
    %203 = vector.extract_strided_slice %200 {offsets = [0, 64], sizes = [2, 32], strides = [1, 1]} : vector<2x128xf32> to vector<2x32xf32>
    %204 = vector.extract_strided_slice %200 {offsets = [0, 96], sizes = [2, 32], strides = [1, 1]} : vector<2x128xf32> to vector<2x32xf32>
    %205 = arith.mulf %202, %156 : vector<2x32xf32>
    %206 = arith.mulf %201, %203 : vector<2x32xf32>
    %207 = arith.addf %205, %206 : vector<2x32xf32>
    %208 = math.tanh %207 : vector<2x32xf32>
    %209 = arith.mulf %204, %208 : vector<2x32xf32>
    %c2 = arith.constant 2 : index
    %c0_62 = arith.constant 0 : index
    %210 = vector.load %arg4[%c2, %c0_62] : memref<16x32xf32, #tpu.memory_space<vmem>>, vector<2x32xf32>
    tpu.vector_store %arg4[%c2, %c0_62], %209 {strides = array<i32>} : memref<16x32xf32, #tpu.memory_space<vmem>>, vector<2x32xf32>,
    %cst_63 = arith.constant dense<0.000000e+00> : vector<2x128xf32>
    %211 = tpu.matmul %175, %1, %cst_63 {dimension_numbers = #tpu.dot_dimension_numbers<[1], [0], [0], [1], [0, 0, 1, 1], [], []>} : vector<2x32xf32>, vector<32x128xf32>, vector<2x128xf32> -> vector<2x128xf32>
    %212 = vector.extract_strided_slice %49 {offsets = [8, 0], sizes = [2, 128], strides = [1, 1]} : vector<16x128xf32> to vector<2x128xf32>
    %213 = arith.addf %212, %211 : vector<2x128xf32>
    %214 = arith.mulf %213, %43 : vector<2x128xf32>
    %215 = math.tanh %214 : vector<2x128xf32>
    %216 = arith.mulf %215, %43 : vector<2x128xf32>
    %217 = arith.addf %216, %46 : vector<2x128xf32>
    %218 = vector.extract_strided_slice %217 {offsets = [0, 0], sizes = [2, 32], strides = [1, 1]} : vector<2x128xf32> to vector<2x32xf32>
    %219 = vector.extract_strided_slice %217 {offsets = [0, 32], sizes = [2, 32], strides = [1, 1]} : vector<2x128xf32> to vector<2x32xf32>
    %220 = vector.extract_strided_slice %217 {offsets = [0, 64], sizes = [2, 32], strides = [1, 1]} : vector<2x128xf32> to vector<2x32xf32>
    %221 = vector.extract_strided_slice %217 {offsets = [0, 96], sizes = [2, 32], strides = [1, 1]} : vector<2x128xf32> to vector<2x32xf32>
    %222 = arith.mulf %219, %173 : vector<2x32xf32>
    %223 = arith.mulf %218, %220 : vector<2x32xf32>
    %224 = arith.addf %222, %223 : vector<2x32xf32>
    %225 = math.tanh %224 : vector<2x32xf32>
    %226 = arith.mulf %221, %225 : vector<2x32xf32>
    %cst_64 = arith.constant dense<0.000000e+00> : vector<2x128xf32>
    %227 = tpu.matmul %192, %4, %cst_64 {dimension_numbers = #tpu.dot_dimension_numbers<[1], [0], [0], [1], [0, 0, 1, 1], [], []>} : vector<2x32xf32>, vector<32x128xf32>, vector<2x128xf32> -> vector<2x128xf32>
    %228 = arith.addf %227, %51 : vector<2x128xf32>
    %cst_65 = arith.constant dense<0.000000e+00> : vector<2x128xf32>
    %229 = tpu.matmul %175, %3, %cst_65 {dimension_numbers = #tpu.dot_dimension_numbers<[1], [0], [0], [1], [0, 0, 1, 1], [], []>} : vector<2x32xf32>, vector<32x128xf32>, vector<2x128xf32> -> vector<2x128xf32>
    %230 = arith.addf %228, %229 : vector<2x128xf32>
    %231 = arith.mulf %230, %43 : vector<2x128xf32>
    %232 = math.tanh %231 : vector<2x128xf32>
    %233 = arith.mulf %232, %43 : vector<2x128xf32>
    %234 = arith.addf %233, %46 : vector<2x128xf32>
    %235 = vector.extract_strided_slice %234 {offsets = [0, 0], sizes = [2, 32], strides = [1, 1]} : vector<2x128xf32> to vector<2x32xf32>
    %236 = vector.extract_strided_slice %234 {offsets = [0, 32], sizes = [2, 32], strides = [1, 1]} : vector<2x128xf32> to vector<2x32xf32>
    %237 = vector.extract_strided_slice %234 {offsets = [0, 64], sizes = [2, 32], strides = [1, 1]} : vector<2x128xf32> to vector<2x32xf32>
    %238 = vector.extract_strided_slice %234 {offsets = [0, 96], sizes = [2, 32], strides = [1, 1]} : vector<2x128xf32> to vector<2x32xf32>
    %239 = arith.mulf %236, %190 : vector<2x32xf32>
    %240 = arith.mulf %235, %237 : vector<2x32xf32>
    %241 = arith.addf %239, %240 : vector<2x32xf32>
    %242 = math.tanh %241 : vector<2x32xf32>
    %243 = arith.mulf %238, %242 : vector<2x32xf32>
    %cst_66 = arith.constant dense<0.000000e+00> : vector<2x128xf32>
    %244 = tpu.matmul %209, %7, %cst_66 {dimension_numbers = #tpu.dot_dimension_numbers<[1], [0], [0], [1], [0, 0, 1, 1], [], []>} : vector<2x32xf32>, vector<32x128xf32>, vector<2x128xf32> -> vector<2x128xf32>
    %245 = arith.addf %244, %53 : vector<2x128xf32>
    %cst_67 = arith.constant dense<0.000000e+00> : vector<2x128xf32>
    %246 = tpu.matmul %192, %6, %cst_67 {dimension_numbers = #tpu.dot_dimension_numbers<[1], [0], [0], [1], [0, 0, 1, 1], [], []>} : vector<2x32xf32>, vector<32x128xf32>, vector<2x128xf32> -> vector<2x128xf32>
    %247 = arith.addf %245, %246 : vector<2x128xf32>
    %248 = arith.mulf %247, %43 : vector<2x128xf32>
    %249 = math.tanh %248 : vector<2x128xf32>
    %250 = arith.mulf %249, %43 : vector<2x128xf32>
    %251 = arith.addf %250, %46 : vector<2x128xf32>
    %252 = vector.extract_strided_slice %251 {offsets = [0, 0], sizes = [2, 32], strides = [1, 1]} : vector<2x128xf32> to vector<2x32xf32>
    %253 = vector.extract_strided_slice %251 {offsets = [0, 32], sizes = [2, 32], strides = [1, 1]} : vector<2x128xf32> to vector<2x32xf32>
    %254 = vector.extract_strided_slice %251 {offsets = [0, 64], sizes = [2, 32], strides = [1, 1]} : vector<2x128xf32> to vector<2x32xf32>
    %255 = vector.extract_strided_slice %251 {offsets = [0, 96], sizes = [2, 32], strides = [1, 1]} : vector<2x128xf32> to vector<2x32xf32>
    %256 = arith.mulf %253, %207 : vector<2x32xf32>
    %257 = arith.mulf %252, %254 : vector<2x32xf32>
    %258 = arith.addf %256, %257 : vector<2x32xf32>
    %259 = math.tanh %258 : vector<2x32xf32>
    %260 = arith.mulf %255, %259 : vector<2x32xf32>
    %c4 = arith.constant 4 : index
    %c0_68 = arith.constant 0 : index
    %261 = vector.load %arg4[%c4, %c0_68] : memref<16x32xf32, #tpu.memory_space<vmem>>, vector<2x32xf32>
    tpu.vector_store %arg4[%c4, %c0_68], %260 {strides = array<i32>} : memref<16x32xf32, #tpu.memory_space<vmem>>, vector<2x32xf32>,
    %cst_69 = arith.constant dense<0.000000e+00> : vector<2x128xf32>
    %262 = tpu.matmul %226, %1, %cst_69 {dimension_numbers = #tpu.dot_dimension_numbers<[1], [0], [0], [1], [0, 0, 1, 1], [], []>} : vector<2x32xf32>, vector<32x128xf32>, vector<2x128xf32> -> vector<2x128xf32>
    %263 = vector.extract_strided_slice %49 {offsets = [10, 0], sizes = [2, 128], strides = [1, 1]} : vector<16x128xf32> to vector<2x128xf32>
    %264 = arith.addf %263, %262 : vector<2x128xf32>
    %265 = arith.mulf %264, %43 : vector<2x128xf32>
    %266 = math.tanh %265 : vector<2x128xf32>
    %267 = arith.mulf %266, %43 : vector<2x128xf32>
    %268 = arith.addf %267, %46 : vector<2x128xf32>
    %269 = vector.extract_strided_slice %268 {offsets = [0, 0], sizes = [2, 32], strides = [1, 1]} : vector<2x128xf32> to vector<2x32xf32>
    %270 = vector.extract_strided_slice %268 {offsets = [0, 32], sizes = [2, 32], strides = [1, 1]} : vector<2x128xf32> to vector<2x32xf32>
    %271 = vector.extract_strided_slice %268 {offsets = [0, 64], sizes = [2, 32], strides = [1, 1]} : vector<2x128xf32> to vector<2x32xf32>
    %272 = vector.extract_strided_slice %268 {offsets = [0, 96], sizes = [2, 32], strides = [1, 1]} : vector<2x128xf32> to vector<2x32xf32>
    %273 = arith.mulf %270, %224 : vector<2x32xf32>
    %274 = arith.mulf %269, %271 : vector<2x32xf32>
    %275 = arith.addf %273, %274 : vector<2x32xf32>
    %276 = math.tanh %275 : vector<2x32xf32>
    %277 = arith.mulf %272, %276 : vector<2x32xf32>
    %cst_70 = arith.constant dense<0.000000e+00> : vector<2x128xf32>
    %278 = tpu.matmul %243, %4, %cst_70 {dimension_numbers = #tpu.dot_dimension_numbers<[1], [0], [0], [1], [0, 0, 1, 1], [], []>} : vector<2x32xf32>, vector<32x128xf32>, vector<2x128xf32> -> vector<2x128xf32>
    %279 = arith.addf %278, %51 : vector<2x128xf32>
    %cst_71 = arith.constant dense<0.000000e+00> : vector<2x128xf32>
    %280 = tpu.matmul %226, %3, %cst_71 {dimension_numbers = #tpu.dot_dimension_numbers<[1], [0], [0], [1], [0, 0, 1, 1], [], []>} : vector<2x32xf32>, vector<32x128xf32>, vector<2x128xf32> -> vector<2x128xf32>
    %281 = arith.addf %279, %280 : vector<2x128xf32>
    %282 = arith.mulf %281, %43 : vector<2x128xf32>
    %283 = math.tanh %282 : vector<2x128xf32>
    %284 = arith.mulf %283, %43 : vector<2x128xf32>
    %285 = arith.addf %284, %46 : vector<2x128xf32>
    %286 = vector.extract_strided_slice %285 {offsets = [0, 0], sizes = [2, 32], strides = [1, 1]} : vector<2x128xf32> to vector<2x32xf32>
    %287 = vector.extract_strided_slice %285 {offsets = [0, 32], sizes = [2, 32], strides = [1, 1]} : vector<2x128xf32> to vector<2x32xf32>
    %288 = vector.extract_strided_slice %285 {offsets = [0, 64], sizes = [2, 32], strides = [1, 1]} : vector<2x128xf32> to vector<2x32xf32>
    %289 = vector.extract_strided_slice %285 {offsets = [0, 96], sizes = [2, 32], strides = [1, 1]} : vector<2x128xf32> to vector<2x32xf32>
    %290 = arith.mulf %287, %241 : vector<2x32xf32>
    %291 = arith.mulf %286, %288 : vector<2x32xf32>
    %292 = arith.addf %290, %291 : vector<2x32xf32>
    %293 = math.tanh %292 : vector<2x32xf32>
    %294 = arith.mulf %289, %293 : vector<2x32xf32>
    %cst_72 = arith.constant dense<0.000000e+00> : vector<2x128xf32>
    %295 = tpu.matmul %260, %7, %cst_72 {dimension_numbers = #tpu.dot_dimension_numbers<[1], [0], [0], [1], [0, 0, 1, 1], [], []>} : vector<2x32xf32>, vector<32x128xf32>, vector<2x128xf32> -> vector<2x128xf32>
    %296 = arith.addf %295, %53 : vector<2x128xf32>
    %cst_73 = arith.constant dense<0.000000e+00> : vector<2x128xf32>
    %297 = tpu.matmul %243, %6, %cst_73 {dimension_numbers = #tpu.dot_dimension_numbers<[1], [0], [0], [1], [0, 0, 1, 1], [], []>} : vector<2x32xf32>, vector<32x128xf32>, vector<2x128xf32> -> vector<2x128xf32>
    %298 = arith.addf %296, %297 : vector<2x128xf32>
    %299 = arith.mulf %298, %43 : vector<2x128xf32>
    %300 = math.tanh %299 : vector<2x128xf32>
    %301 = arith.mulf %300, %43 : vector<2x128xf32>
    %302 = arith.addf %301, %46 : vector<2x128xf32>
    %303 = vector.extract_strided_slice %302 {offsets = [0, 0], sizes = [2, 32], strides = [1, 1]} : vector<2x128xf32> to vector<2x32xf32>
    %304 = vector.extract_strided_slice %302 {offsets = [0, 32], sizes = [2, 32], strides = [1, 1]} : vector<2x128xf32> to vector<2x32xf32>
    %305 = vector.extract_strided_slice %302 {offsets = [0, 64], sizes = [2, 32], strides = [1, 1]} : vector<2x128xf32> to vector<2x32xf32>
    %306 = vector.extract_strided_slice %302 {offsets = [0, 96], sizes = [2, 32], strides = [1, 1]} : vector<2x128xf32> to vector<2x32xf32>
    %307 = arith.mulf %304, %258 : vector<2x32xf32>
    %308 = arith.mulf %303, %305 : vector<2x32xf32>
    %309 = arith.addf %307, %308 : vector<2x32xf32>
    %310 = math.tanh %309 : vector<2x32xf32>
    %311 = arith.mulf %306, %310 : vector<2x32xf32>
    %c6 = arith.constant 6 : index
    %c0_74 = arith.constant 0 : index
    %312 = vector.load %arg4[%c6, %c0_74] : memref<16x32xf32, #tpu.memory_space<vmem>>, vector<2x32xf32>
    tpu.vector_store %arg4[%c6, %c0_74], %311 {strides = array<i32>} : memref<16x32xf32, #tpu.memory_space<vmem>>, vector<2x32xf32>,
    %cst_75 = arith.constant dense<0.000000e+00> : vector<2x128xf32>
    %313 = tpu.matmul %277, %1, %cst_75 {dimension_numbers = #tpu.dot_dimension_numbers<[1], [0], [0], [1], [0, 0, 1, 1], [], []>} : vector<2x32xf32>, vector<32x128xf32>, vector<2x128xf32> -> vector<2x128xf32>
    %314 = vector.extract_strided_slice %49 {offsets = [12, 0], sizes = [2, 128], strides = [1, 1]} : vector<16x128xf32> to vector<2x128xf32>
    %315 = arith.addf %314, %313 : vector<2x128xf32>
    %316 = arith.mulf %315, %43 : vector<2x128xf32>
    %317 = math.tanh %316 : vector<2x128xf32>
    %318 = arith.mulf %317, %43 : vector<2x128xf32>
    %319 = arith.addf %318, %46 : vector<2x128xf32>
    %320 = vector.extract_strided_slice %319 {offsets = [0, 0], sizes = [2, 32], strides = [1, 1]} : vector<2x128xf32> to vector<2x32xf32>
    %321 = vector.extract_strided_slice %319 {offsets = [0, 32], sizes = [2, 32], strides = [1, 1]} : vector<2x128xf32> to vector<2x32xf32>
    %322 = vector.extract_strided_slice %319 {offsets = [0, 64], sizes = [2, 32], strides = [1, 1]} : vector<2x128xf32> to vector<2x32xf32>
    %323 = vector.extract_strided_slice %319 {offsets = [0, 96], sizes = [2, 32], strides = [1, 1]} : vector<2x128xf32> to vector<2x32xf32>
    %324 = arith.mulf %321, %275 : vector<2x32xf32>
    %325 = arith.mulf %320, %322 : vector<2x32xf32>
    %326 = arith.addf %324, %325 : vector<2x32xf32>
    %327 = math.tanh %326 : vector<2x32xf32>
    %328 = arith.mulf %323, %327 : vector<2x32xf32>
    %cst_76 = arith.constant dense<0.000000e+00> : vector<2x128xf32>
    %329 = tpu.matmul %294, %4, %cst_76 {dimension_numbers = #tpu.dot_dimension_numbers<[1], [0], [0], [1], [0, 0, 1, 1], [], []>} : vector<2x32xf32>, vector<32x128xf32>, vector<2x128xf32> -> vector<2x128xf32>
    %330 = arith.addf %329, %51 : vector<2x128xf32>
    %cst_77 = arith.constant dense<0.000000e+00> : vector<2x128xf32>
    %331 = tpu.matmul %277, %3, %cst_77 {dimension_numbers = #tpu.dot_dimension_numbers<[1], [0], [0], [1], [0, 0, 1, 1], [], []>} : vector<2x32xf32>, vector<32x128xf32>, vector<2x128xf32> -> vector<2x128xf32>
    %332 = arith.addf %330, %331 : vector<2x128xf32>
    %333 = arith.mulf %332, %43 : vector<2x128xf32>
    %334 = math.tanh %333 : vector<2x128xf32>
    %335 = arith.mulf %334, %43 : vector<2x128xf32>
    %336 = arith.addf %335, %46 : vector<2x128xf32>
    %337 = vector.extract_strided_slice %336 {offsets = [0, 0], sizes = [2, 32], strides = [1, 1]} : vector<2x128xf32> to vector<2x32xf32>
    %338 = vector.extract_strided_slice %336 {offsets = [0, 32], sizes = [2, 32], strides = [1, 1]} : vector<2x128xf32> to vector<2x32xf32>
    %339 = vector.extract_strided_slice %336 {offsets = [0, 64], sizes = [2, 32], strides = [1, 1]} : vector<2x128xf32> to vector<2x32xf32>
    %340 = vector.extract_strided_slice %336 {offsets = [0, 96], sizes = [2, 32], strides = [1, 1]} : vector<2x128xf32> to vector<2x32xf32>
    %341 = arith.mulf %338, %292 : vector<2x32xf32>
    %342 = arith.mulf %337, %339 : vector<2x32xf32>
    %343 = arith.addf %341, %342 : vector<2x32xf32>
    %344 = math.tanh %343 : vector<2x32xf32>
    %345 = arith.mulf %340, %344 : vector<2x32xf32>
    %cst_78 = arith.constant dense<0.000000e+00> : vector<2x128xf32>
    %346 = tpu.matmul %311, %7, %cst_78 {dimension_numbers = #tpu.dot_dimension_numbers<[1], [0], [0], [1], [0, 0, 1, 1], [], []>} : vector<2x32xf32>, vector<32x128xf32>, vector<2x128xf32> -> vector<2x128xf32>
    %347 = arith.addf %346, %53 : vector<2x128xf32>
    %cst_79 = arith.constant dense<0.000000e+00> : vector<2x128xf32>
    %348 = tpu.matmul %294, %6, %cst_79 {dimension_numbers = #tpu.dot_dimension_numbers<[1], [0], [0], [1], [0, 0, 1, 1], [], []>} : vector<2x32xf32>, vector<32x128xf32>, vector<2x128xf32> -> vector<2x128xf32>
    %349 = arith.addf %347, %348 : vector<2x128xf32>
    %350 = arith.mulf %349, %43 : vector<2x128xf32>
    %351 = math.tanh %350 : vector<2x128xf32>
    %352 = arith.mulf %351, %43 : vector<2x128xf32>
    %353 = arith.addf %352, %46 : vector<2x128xf32>
    %354 = vector.extract_strided_slice %353 {offsets = [0, 0], sizes = [2, 32], strides = [1, 1]} : vector<2x128xf32> to vector<2x32xf32>
    %355 = vector.extract_strided_slice %353 {offsets = [0, 32], sizes = [2, 32], strides = [1, 1]} : vector<2x128xf32> to vector<2x32xf32>
    %356 = vector.extract_strided_slice %353 {offsets = [0, 64], sizes = [2, 32], strides = [1, 1]} : vector<2x128xf32> to vector<2x32xf32>
    %357 = vector.extract_strided_slice %353 {offsets = [0, 96], sizes = [2, 32], strides = [1, 1]} : vector<2x128xf32> to vector<2x32xf32>
    %358 = arith.mulf %355, %309 : vector<2x32xf32>
    %359 = arith.mulf %354, %356 : vector<2x32xf32>
    %360 = arith.addf %358, %359 : vector<2x32xf32>
    %361 = math.tanh %360 : vector<2x32xf32>
    %362 = arith.mulf %357, %361 : vector<2x32xf32>
    %c8 = arith.constant 8 : index
    %c0_80 = arith.constant 0 : index
    %363 = vector.load %arg4[%c8, %c0_80] : memref<16x32xf32, #tpu.memory_space<vmem>>, vector<2x32xf32>
    tpu.vector_store %arg4[%c8, %c0_80], %362 {strides = array<i32>} : memref<16x32xf32, #tpu.memory_space<vmem>>, vector<2x32xf32>,
    %cst_81 = arith.constant dense<0.000000e+00> : vector<2x128xf32>
    %364 = tpu.matmul %328, %1, %cst_81 {dimension_numbers = #tpu.dot_dimension_numbers<[1], [0], [0], [1], [0, 0, 1, 1], [], []>} : vector<2x32xf32>, vector<32x128xf32>, vector<2x128xf32> -> vector<2x128xf32>
    %365 = vector.extract_strided_slice %49 {offsets = [14, 0], sizes = [2, 128], strides = [1, 1]} : vector<16x128xf32> to vector<2x128xf32>
    %366 = arith.addf %365, %364 : vector<2x128xf32>
    %367 = arith.mulf %366, %43 : vector<2x128xf32>
    %368 = math.tanh %367 : vector<2x128xf32>
    %369 = arith.mulf %368, %43 : vector<2x128xf32>
    %370 = arith.addf %369, %46 : vector<2x128xf32>
    %371 = vector.extract_strided_slice %370 {offsets = [0, 0], sizes = [2, 32], strides = [1, 1]} : vector<2x128xf32> to vector<2x32xf32>
    %372 = vector.extract_strided_slice %370 {offsets = [0, 32], sizes = [2, 32], strides = [1, 1]} : vector<2x128xf32> to vector<2x32xf32>
    %373 = vector.extract_strided_slice %370 {offsets = [0, 64], sizes = [2, 32], strides = [1, 1]} : vector<2x128xf32> to vector<2x32xf32>
    %374 = vector.extract_strided_slice %370 {offsets = [0, 96], sizes = [2, 32], strides = [1, 1]} : vector<2x128xf32> to vector<2x32xf32>
    %375 = arith.mulf %372, %326 : vector<2x32xf32>
    %376 = arith.mulf %371, %373 : vector<2x32xf32>
    %377 = arith.addf %375, %376 : vector<2x32xf32>
    %378 = math.tanh %377 : vector<2x32xf32>
    %379 = arith.mulf %374, %378 : vector<2x32xf32>
    %cst_82 = arith.constant dense<0.000000e+00> : vector<2x128xf32>
    %380 = tpu.matmul %345, %4, %cst_82 {dimension_numbers = #tpu.dot_dimension_numbers<[1], [0], [0], [1], [0, 0, 1, 1], [], []>} : vector<2x32xf32>, vector<32x128xf32>, vector<2x128xf32> -> vector<2x128xf32>
    %381 = arith.addf %380, %51 : vector<2x128xf32>
    %cst_83 = arith.constant dense<0.000000e+00> : vector<2x128xf32>
    %382 = tpu.matmul %328, %3, %cst_83 {dimension_numbers = #tpu.dot_dimension_numbers<[1], [0], [0], [1], [0, 0, 1, 1], [], []>} : vector<2x32xf32>, vector<32x128xf32>, vector<2x128xf32> -> vector<2x128xf32>
    %383 = arith.addf %381, %382 : vector<2x128xf32>
    %384 = arith.mulf %383, %43 : vector<2x128xf32>
    %385 = math.tanh %384 : vector<2x128xf32>
    %386 = arith.mulf %385, %43 : vector<2x128xf32>
    %387 = arith.addf %386, %46 : vector<2x128xf32>
    %388 = vector.extract_strided_slice %387 {offsets = [0, 0], sizes = [2, 32], strides = [1, 1]} : vector<2x128xf32> to vector<2x32xf32>
    %389 = vector.extract_strided_slice %387 {offsets = [0, 32], sizes = [2, 32], strides = [1, 1]} : vector<2x128xf32> to vector<2x32xf32>
    %390 = vector.extract_strided_slice %387 {offsets = [0, 64], sizes = [2, 32], strides = [1, 1]} : vector<2x128xf32> to vector<2x32xf32>
    %391 = vector.extract_strided_slice %387 {offsets = [0, 96], sizes = [2, 32], strides = [1, 1]} : vector<2x128xf32> to vector<2x32xf32>
    %392 = arith.mulf %389, %343 : vector<2x32xf32>
    %393 = arith.mulf %388, %390 : vector<2x32xf32>
    %394 = arith.addf %392, %393 : vector<2x32xf32>
    %395 = math.tanh %394 : vector<2x32xf32>
    %396 = arith.mulf %391, %395 : vector<2x32xf32>
    %cst_84 = arith.constant dense<0.000000e+00> : vector<2x128xf32>
    %397 = tpu.matmul %362, %7, %cst_84 {dimension_numbers = #tpu.dot_dimension_numbers<[1], [0], [0], [1], [0, 0, 1, 1], [], []>} : vector<2x32xf32>, vector<32x128xf32>, vector<2x128xf32> -> vector<2x128xf32>
    %398 = arith.addf %397, %53 : vector<2x128xf32>
    %cst_85 = arith.constant dense<0.000000e+00> : vector<2x128xf32>
    %399 = tpu.matmul %345, %6, %cst_85 {dimension_numbers = #tpu.dot_dimension_numbers<[1], [0], [0], [1], [0, 0, 1, 1], [], []>} : vector<2x32xf32>, vector<32x128xf32>, vector<2x128xf32> -> vector<2x128xf32>
    %400 = arith.addf %398, %399 : vector<2x128xf32>
    %401 = arith.mulf %400, %43 : vector<2x128xf32>
    %402 = math.tanh %401 : vector<2x128xf32>
    %403 = arith.mulf %402, %43 : vector<2x128xf32>
    %404 = arith.addf %403, %46 : vector<2x128xf32>
    %405 = vector.extract_strided_slice %404 {offsets = [0, 0], sizes = [2, 32], strides = [1, 1]} : vector<2x128xf32> to vector<2x32xf32>
    %406 = vector.extract_strided_slice %404 {offsets = [0, 32], sizes = [2, 32], strides = [1, 1]} : vector<2x128xf32> to vector<2x32xf32>
    %407 = vector.extract_strided_slice %404 {offsets = [0, 64], sizes = [2, 32], strides = [1, 1]} : vector<2x128xf32> to vector<2x32xf32>
    %408 = vector.extract_strided_slice %404 {offsets = [0, 96], sizes = [2, 32], strides = [1, 1]} : vector<2x128xf32> to vector<2x32xf32>
    %409 = arith.mulf %406, %360 : vector<2x32xf32>
    %410 = arith.mulf %405, %407 : vector<2x32xf32>
    %411 = arith.addf %409, %410 : vector<2x32xf32>
    %412 = math.tanh %411 : vector<2x32xf32>
    %413 = arith.mulf %408, %412 : vector<2x32xf32>
    %c10 = arith.constant 10 : index
    %c0_86 = arith.constant 0 : index
    %414 = vector.load %arg4[%c10, %c0_86] : memref<16x32xf32, #tpu.memory_space<vmem>>, vector<2x32xf32>
    tpu.vector_store %arg4[%c10, %c0_86], %413 {strides = array<i32>} : memref<16x32xf32, #tpu.memory_space<vmem>>, vector<2x32xf32>,
    %cst_87 = arith.constant dense<0.000000e+00> : vector<2x128xf32>
    %415 = tpu.matmul %396, %4, %cst_87 {dimension_numbers = #tpu.dot_dimension_numbers<[1], [0], [0], [1], [0, 0, 1, 1], [], []>} : vector<2x32xf32>, vector<32x128xf32>, vector<2x128xf32> -> vector<2x128xf32>
    %416 = arith.addf %415, %51 : vector<2x128xf32>
    %cst_88 = arith.constant dense<0.000000e+00> : vector<2x128xf32>
    %417 = tpu.matmul %379, %3, %cst_88 {dimension_numbers = #tpu.dot_dimension_numbers<[1], [0], [0], [1], [0, 0, 1, 1], [], []>} : vector<2x32xf32>, vector<32x128xf32>, vector<2x128xf32> -> vector<2x128xf32>
    %418 = arith.addf %416, %417 : vector<2x128xf32>
    %419 = arith.mulf %418, %43 : vector<2x128xf32>
    %420 = math.tanh %419 : vector<2x128xf32>
    %421 = arith.mulf %420, %43 : vector<2x128xf32>
    %422 = arith.addf %421, %46 : vector<2x128xf32>
    %423 = vector.extract_strided_slice %422 {offsets = [0, 0], sizes = [2, 32], strides = [1, 1]} : vector<2x128xf32> to vector<2x32xf32>
    %424 = vector.extract_strided_slice %422 {offsets = [0, 32], sizes = [2, 32], strides = [1, 1]} : vector<2x128xf32> to vector<2x32xf32>
    %425 = vector.extract_strided_slice %422 {offsets = [0, 64], sizes = [2, 32], strides = [1, 1]} : vector<2x128xf32> to vector<2x32xf32>
    %426 = vector.extract_strided_slice %422 {offsets = [0, 96], sizes = [2, 32], strides = [1, 1]} : vector<2x128xf32> to vector<2x32xf32>
    %427 = arith.mulf %424, %394 : vector<2x32xf32>
    %428 = arith.mulf %423, %425 : vector<2x32xf32>
    %429 = arith.addf %427, %428 : vector<2x32xf32>
    %430 = math.tanh %429 : vector<2x32xf32>
    %431 = arith.mulf %426, %430 : vector<2x32xf32>
    %cst_89 = arith.constant dense<0.000000e+00> : vector<2x128xf32>
    %432 = tpu.matmul %413, %7, %cst_89 {dimension_numbers = #tpu.dot_dimension_numbers<[1], [0], [0], [1], [0, 0, 1, 1], [], []>} : vector<2x32xf32>, vector<32x128xf32>, vector<2x128xf32> -> vector<2x128xf32>
    %433 = arith.addf %432, %53 : vector<2x128xf32>
    %cst_90 = arith.constant dense<0.000000e+00> : vector<2x128xf32>
    %434 = tpu.matmul %396, %6, %cst_90 {dimension_numbers = #tpu.dot_dimension_numbers<[1], [0], [0], [1], [0, 0, 1, 1], [], []>} : vector<2x32xf32>, vector<32x128xf32>, vector<2x128xf32> -> vector<2x128xf32>
    %435 = arith.addf %433, %434 : vector<2x128xf32>
    %436 = arith.mulf %435, %43 : vector<2x128xf32>
    %437 = math.tanh %436 : vector<2x128xf32>
    %438 = arith.mulf %437, %43 : vector<2x128xf32>
    %439 = arith.addf %438, %46 : vector<2x128xf32>
    %440 = vector.extract_strided_slice %439 {offsets = [0, 0], sizes = [2, 32], strides = [1, 1]} : vector<2x128xf32> to vector<2x32xf32>
    %441 = vector.extract_strided_slice %439 {offsets = [0, 32], sizes = [2, 32], strides = [1, 1]} : vector<2x128xf32> to vector<2x32xf32>
    %442 = vector.extract_strided_slice %439 {offsets = [0, 64], sizes = [2, 32], strides = [1, 1]} : vector<2x128xf32> to vector<2x32xf32>
    %443 = vector.extract_strided_slice %439 {offsets = [0, 96], sizes = [2, 32], strides = [1, 1]} : vector<2x128xf32> to vector<2x32xf32>
    %444 = arith.mulf %441, %411 : vector<2x32xf32>
    %445 = arith.mulf %440, %442 : vector<2x32xf32>
    %446 = arith.addf %444, %445 : vector<2x32xf32>
    %447 = math.tanh %446 : vector<2x32xf32>
    %448 = arith.mulf %443, %447 : vector<2x32xf32>
    %c12 = arith.constant 12 : index
    %c0_91 = arith.constant 0 : index
    %449 = vector.load %arg4[%c12, %c0_91] : memref<16x32xf32, #tpu.memory_space<vmem>>, vector<2x32xf32>
    tpu.vector_store %arg4[%c12, %c0_91], %448 {strides = array<i32>} : memref<16x32xf32, #tpu.memory_space<vmem>>, vector<2x32xf32>,
    %cst_92 = arith.constant dense<0.000000e+00> : vector<2x128xf32>
    %450 = tpu.matmul %448, %7, %cst_92 {dimension_numbers = #tpu.dot_dimension_numbers<[1], [0], [0], [1], [0, 0, 1, 1], [], []>} : vector<2x32xf32>, vector<32x128xf32>, vector<2x128xf32> -> vector<2x128xf32>
    %451 = arith.addf %450, %53 : vector<2x128xf32>
    %cst_93 = arith.constant dense<0.000000e+00> : vector<2x128xf32>
    %452 = tpu.matmul %431, %6, %cst_93 {dimension_numbers = #tpu.dot_dimension_numbers<[1], [0], [0], [1], [0, 0, 1, 1], [], []>} : vector<2x32xf32>, vector<32x128xf32>, vector<2x128xf32> -> vector<2x128xf32>
    %453 = arith.addf %451, %452 : vector<2x128xf32>
    %454 = arith.mulf %453, %43 : vector<2x128xf32>
    %455 = math.tanh %454 : vector<2x128xf32>
    %456 = arith.mulf %455, %43 : vector<2x128xf32>
    %457 = arith.addf %456, %46 : vector<2x128xf32>
    %458 = vector.extract_strided_slice %457 {offsets = [0, 0], sizes = [2, 32], strides = [1, 1]} : vector<2x128xf32> to vector<2x32xf32>
    %459 = vector.extract_strided_slice %457 {offsets = [0, 32], sizes = [2, 32], strides = [1, 1]} : vector<2x128xf32> to vector<2x32xf32>
    %460 = vector.extract_strided_slice %457 {offsets = [0, 64], sizes = [2, 32], strides = [1, 1]} : vector<2x128xf32> to vector<2x32xf32>
    %461 = vector.extract_strided_slice %457 {offsets = [0, 96], sizes = [2, 32], strides = [1, 1]} : vector<2x128xf32> to vector<2x32xf32>
    %462 = arith.mulf %459, %446 : vector<2x32xf32>
    %463 = arith.mulf %458, %460 : vector<2x32xf32>
    %464 = arith.addf %462, %463 : vector<2x32xf32>
    %465 = math.tanh %464 : vector<2x32xf32>
    %466 = arith.mulf %461, %465 : vector<2x32xf32>
    %c14 = arith.constant 14 : index
    %c0_94 = arith.constant 0 : index
    %467 = vector.load %arg4[%c14, %c0_94] : memref<16x32xf32, #tpu.memory_space<vmem>>, vector<2x32xf32>
    tpu.vector_store %arg4[%c14, %c0_94], %466 {strides = array<i32>} : memref<16x32xf32, #tpu.memory_space<vmem>>, vector<2x32xf32>,
    %c0_95 = arith.constant 0 : index
    %c0_96 = arith.constant 0 : index
    %468 = vector.load %arg4[%c0_95, %c0_96] : memref<16x32xf32, #tpu.memory_space<vmem>>, vector<16x32xf32>
    %cst_97 = arith.constant dense<0.000000e+00> : vector<16x64xf32>
    %469 = tpu.matmul %468, %18, %cst_97 {dimension_numbers = #tpu.dot_dimension_numbers<[1], [0], [0], [1], [0, 0, 1, 1], [], []>} : vector<16x32xf32>, vector<32x64xf32>, vector<16x64xf32> -> vector<16x64xf32>
    %470 = vector.broadcast %19 : vector<1x64xf32> to vector<16x64xf32>
    %471 = arith.addf %469, %470 : vector<16x64xf32>
    %cst_98 = arith.constant 0.00999999977 : f32
    %472 = vector.broadcast %cst_98 : f32 to vector<16x64xf32>
    %473 = arith.mulf %472, %471 : vector<16x64xf32>
    %474 = arith.maximumf %471, %473 : vector<16x64xf32>
    %cst_99 = arith.constant dense<0.000000e+00> : vector<16x32xf32>
    %475 = tpu.matmul %474, %20, %cst_99 {dimension_numbers = #tpu.dot_dimension_numbers<[1], [0], [0], [1], [0, 0, 1, 1], [], []>} : vector<16x64xf32>, vector<64x32xf32>, vector<16x32xf32> -> vector<16x32xf32>
    %476 = vector.broadcast %21 : vector<1x32xf32> to vector<16x32xf32>
    %477 = arith.addf %475, %476 : vector<16x32xf32>
    %cst_100 = arith.constant 0.00999999977 : f32
    %478 = vector.broadcast %cst_100 : f32 to vector<16x32xf32>
    %479 = arith.mulf %478, %477 : vector<16x32xf32>
    %480 = arith.maximumf %477, %479 : vector<16x32xf32>
    %cst_101 = arith.constant dense<0.000000e+00> : vector<16x16xf32>
    %481 = tpu.matmul %480, %22, %cst_101 {dimension_numbers = #tpu.dot_dimension_numbers<[1], [0], [0], [1], [0, 0, 1, 1], [], []>} : vector<16x32xf32>, vector<32x16xf32>, vector<16x16xf32> -> vector<16x16xf32>
    %482 = vector.broadcast %23 : vector<1x16xf32> to vector<16x16xf32>
    %483 = arith.addf %481, %482 : vector<16x16xf32>
    %cst_102 = arith.constant 0.00999999977 : f32
    %484 = vector.broadcast %cst_102 : f32 to vector<16x16xf32>
    %485 = arith.mulf %484, %483 : vector<16x16xf32>
    %486 = arith.maximumf %483, %485 : vector<16x16xf32>
    %cst_103 = arith.constant dense<0.000000e+00> : vector<16x8xf32>
    %487 = tpu.matmul %486, %24, %cst_103 {dimension_numbers = #tpu.dot_dimension_numbers<[1], [0], [0], [1], [0, 0, 1, 1], [], []>} : vector<16x16xf32>, vector<16x8xf32>, vector<16x8xf32> -> vector<16x8xf32>
    %488 = vector.broadcast %25 : vector<1x8xf32> to vector<16x8xf32>
    %489 = arith.addf %487, %488 : vector<16x8xf32>
    %cst_104 = arith.constant 0.00999999977 : f32
    %490 = vector.broadcast %cst_104 : f32 to vector<16x8xf32>
    %491 = arith.mulf %490, %489 : vector<16x8xf32>
    %492 = arith.maximumf %489, %491 : vector<16x8xf32>
    %c0_105 = arith.constant 0 : index
    %c0_106 = arith.constant 0 : index
    %493 = vector.load %arg3[%c0_105, %c0_106] : memref<16x8xf32, #tpu.memory_space<vmem>>, vector<16x8xf32>
    tpu.vector_store %arg3[%c0_105, %c0_106], %492 {strides = array<i32>} : memref<16x8xf32, #tpu.memory_space<vmem>>, vector<16x8xf32>,
    %cst_107 = arith.constant dense<0.000000e+00> : vector<16x16xf32>
    %494 = tpu.matmul %492, %26, %cst_107 {dimension_numbers = #tpu.dot_dimension_numbers<[1], [0], [0], [1], [0, 0, 1, 1], [], []>} : vector<16x8xf32>, vector<8x16xf32>, vector<16x16xf32> -> vector<16x16xf32>
    %495 = vector.broadcast %27 : vector<1x16xf32> to vector<16x16xf32>
    %496 = arith.addf %494, %495 : vector<16x16xf32>
    %cst_108 = arith.constant 0.00999999977 : f32
    %497 = vector.broadcast %cst_108 : f32 to vector<16x16xf32>
    %498 = arith.mulf %497, %496 : vector<16x16xf32>
    %499 = arith.maximumf %496, %498 : vector<16x16xf32>
    %cst_109 = arith.constant dense<0.000000e+00> : vector<16x32xf32>
    %500 = tpu.matmul %499, %28, %cst_109 {dimension_numbers = #tpu.dot_dimension_numbers<[1], [0], [0], [1], [0, 0, 1, 1], [], []>} : vector<16x16xf32>, vector<16x32xf32>, vector<16x32xf32> -> vector<16x32xf32>
    %501 = vector.broadcast %29 : vector<1x32xf32> to vector<16x32xf32>
    %502 = arith.addf %500, %501 : vector<16x32xf32>
    %cst_110 = arith.constant 0.00999999977 : f32
    %503 = vector.broadcast %cst_110 : f32 to vector<16x32xf32>
    %504 = arith.mulf %503, %502 : vector<16x32xf32>
    %505 = arith.maximumf %502, %504 : vector<16x32xf32>
    %cst_111 = arith.constant dense<0.000000e+00> : vector<16x64xf32>
    %506 = tpu.matmul %505, %30, %cst_111 {dimension_numbers = #tpu.dot_dimension_numbers<[1], [0], [0], [1], [0, 0, 1, 1], [], []>} : vector<16x32xf32>, vector<32x64xf32>, vector<16x64xf32> -> vector<16x64xf32>
    %507 = vector.broadcast %31 : vector<1x64xf32> to vector<16x64xf32>
    %508 = arith.addf %506, %507 : vector<16x64xf32>
    %cst_112 = arith.constant 0.00999999977 : f32
    %509 = vector.broadcast %cst_112 : f32 to vector<16x64xf32>
    %510 = arith.mulf %509, %508 : vector<16x64xf32>
    %511 = arith.maximumf %508, %510 : vector<16x64xf32>
    %cst_113 = arith.constant dense<0.000000e+00> : vector<16x32xf32>
    %512 = tpu.matmul %511, %32, %cst_113 {dimension_numbers = #tpu.dot_dimension_numbers<[1], [0], [0], [1], [0, 0, 1, 1], [], []>} : vector<16x64xf32>, vector<64x32xf32>, vector<16x32xf32> -> vector<16x32xf32>
    %513 = vector.broadcast %33 : vector<1x32xf32> to vector<16x32xf32>
    %514 = arith.addf %512, %513 : vector<16x32xf32>
    %cst_114 = arith.constant 0.00999999977 : f32
    %515 = vector.broadcast %cst_114 : f32 to vector<16x32xf32>
    %516 = arith.mulf %515, %514 : vector<16x32xf32>
    %517 = arith.maximumf %514, %516 : vector<16x32xf32>
    %518 = tpu.iota {dimensions = array<i32: 1>} : vector<2x64xi32>
    %c32_i32 = arith.constant 32 : i32
    %519 = vector.broadcast %c32_i32 : i32 to vector<2x64xi32>
    %520 = arith.cmpi sge, %518, %519 : vector<2x64xi32>
    %c48_i32 = arith.constant 48 : i32
    %521 = vector.broadcast %c48_i32 : i32 to vector<2x64xi32>
    %522 = arith.cmpi slt, %518, %521 : vector<2x64xi32>
    %523 = arith.andi %520, %522 : vector<2x64xi1>
    %cst_115 = arith.constant 1.000000e+00 : f32
    %cst_116 = arith.constant 5.000000e-01 : f32
    %524 = vector.broadcast %cst_115 : f32 to vector<2x64xf32>
    %525 = vector.broadcast %cst_116 : f32 to vector<2x64xf32>
    %526 = arith.select %523, %524, %525 : vector<2x64xi1>, vector<2x64xf32>
    %cst_117 = arith.constant 0.000000e+00 : f32
    %cst_118 = arith.constant 5.000000e-01 : f32
    %527 = vector.broadcast %cst_117 : f32 to vector<2x64xf32>
    %528 = vector.broadcast %cst_118 : f32 to vector<2x64xf32>
    %529 = arith.select %523, %527, %528 : vector<2x64xi1>, vector<2x64xf32>
    %cst_119 = arith.constant dense<0.000000e+00> : vector<16x64xf32>
    %530 = tpu.matmul %517, %9, %cst_119 {dimension_numbers = #tpu.dot_dimension_numbers<[1], [0], [0], [1], [0, 0, 1, 1], [], []>} : vector<16x32xf32>, vector<32x64xf32>, vector<16x64xf32> -> vector<16x64xf32>
    %531 = vector.broadcast %11 : vector<1x64xf32> to vector<16x64xf32>
    %532 = arith.addf %530, %531 : vector<16x64xf32>
    %533 = vector.shape_cast %14 : vector<1x64xf32> to vector<1x64xf32>
    %534 = vector.broadcast %533 : vector<1x64xf32> to vector<2x64xf32>
    %535 = vector.shape_cast %17 : vector<1x64xf32> to vector<1x64xf32>
    %536 = vector.broadcast %535 : vector<1x64xf32> to vector<2x64xf32>
    %cst_120 = arith.constant 0.000000e+00 : f32
    %537 = vector.broadcast %cst_120 : f32 to vector<2x16xf32>
    %cst_121 = arith.constant 0.000000e+00 : f32
    %538 = vector.broadcast %cst_121 : f32 to vector<2x16xf32>
    %cst_122 = arith.constant 0.000000e+00 : f32
    %539 = vector.broadcast %cst_122 : f32 to vector<2x16xf32>
    %cst_123 = arith.constant 0.000000e+00 : f32
    %540 = vector.broadcast %cst_123 : f32 to vector<2x16xf32>
    %cst_124 = arith.constant 0.000000e+00 : f32
    %541 = vector.broadcast %cst_124 : f32 to vector<2x16xf32>
    %cst_125 = arith.constant 0.000000e+00 : f32
    %542 = vector.broadcast %cst_125 : f32 to vector<2x16xf32>
    %cst_126 = arith.constant dense<0.000000e+00> : vector<2x64xf32>
    %543 = tpu.matmul %537, %10, %cst_126 {dimension_numbers = #tpu.dot_dimension_numbers<[1], [0], [0], [1], [0, 0, 1, 1], [], []>} : vector<2x16xf32>, vector<16x64xf32>, vector<2x64xf32> -> vector<2x64xf32>
    %544 = vector.extract_strided_slice %532 {offsets = [0, 0], sizes = [2, 64], strides = [1, 1]} : vector<16x64xf32> to vector<2x64xf32>
    %545 = arith.addf %544, %543 : vector<2x64xf32>
    %546 = arith.mulf %545, %526 : vector<2x64xf32>
    %547 = math.tanh %546 : vector<2x64xf32>
    %548 = arith.mulf %547, %526 : vector<2x64xf32>
    %549 = arith.addf %548, %529 : vector<2x64xf32>
    %550 = vector.extract_strided_slice %549 {offsets = [0, 0], sizes = [2, 16], strides = [1, 1]} : vector<2x64xf32> to vector<2x16xf32>
    %551 = vector.extract_strided_slice %549 {offsets = [0, 16], sizes = [2, 16], strides = [1, 1]} : vector<2x64xf32> to vector<2x16xf32>
    %552 = vector.extract_strided_slice %549 {offsets = [0, 32], sizes = [2, 16], strides = [1, 1]} : vector<2x64xf32> to vector<2x16xf32>
    %553 = vector.extract_strided_slice %549 {offsets = [0, 48], sizes = [2, 16], strides = [1, 1]} : vector<2x64xf32> to vector<2x16xf32>
    %554 = arith.mulf %551, %540 : vector<2x16xf32>
    %555 = arith.mulf %550, %552 : vector<2x16xf32>
    %556 = arith.addf %554, %555 : vector<2x16xf32>
    %557 = math.tanh %556 : vector<2x16xf32>
    %558 = arith.mulf %553, %557 : vector<2x16xf32>
    %cst_127 = arith.constant dense<0.000000e+00> : vector<2x64xf32>
    %559 = tpu.matmul %558, %10, %cst_127 {dimension_numbers = #tpu.dot_dimension_numbers<[1], [0], [0], [1], [0, 0, 1, 1], [], []>} : vector<2x16xf32>, vector<16x64xf32>, vector<2x64xf32> -> vector<2x64xf32>
    %560 = vector.extract_strided_slice %532 {offsets = [2, 0], sizes = [2, 64], strides = [1, 1]} : vector<16x64xf32> to vector<2x64xf32>
    %561 = arith.addf %560, %559 : vector<2x64xf32>
    %562 = arith.mulf %561, %526 : vector<2x64xf32>
    %563 = math.tanh %562 : vector<2x64xf32>
    %564 = arith.mulf %563, %526 : vector<2x64xf32>
    %565 = arith.addf %564, %529 : vector<2x64xf32>
    %566 = vector.extract_strided_slice %565 {offsets = [0, 0], sizes = [2, 16], strides = [1, 1]} : vector<2x64xf32> to vector<2x16xf32>
    %567 = vector.extract_strided_slice %565 {offsets = [0, 16], sizes = [2, 16], strides = [1, 1]} : vector<2x64xf32> to vector<2x16xf32>
    %568 = vector.extract_strided_slice %565 {offsets = [0, 32], sizes = [2, 16], strides = [1, 1]} : vector<2x64xf32> to vector<2x16xf32>
    %569 = vector.extract_strided_slice %565 {offsets = [0, 48], sizes = [2, 16], strides = [1, 1]} : vector<2x64xf32> to vector<2x16xf32>
    %570 = arith.mulf %567, %556 : vector<2x16xf32>
    %571 = arith.mulf %566, %568 : vector<2x16xf32>
    %572 = arith.addf %570, %571 : vector<2x16xf32>
    %573 = math.tanh %572 : vector<2x16xf32>
    %574 = arith.mulf %569, %573 : vector<2x16xf32>
    %cst_128 = arith.constant dense<0.000000e+00> : vector<2x64xf32>
    %575 = tpu.matmul %538, %13, %cst_128 {dimension_numbers = #tpu.dot_dimension_numbers<[1], [0], [0], [1], [0, 0, 1, 1], [], []>} : vector<2x16xf32>, vector<16x64xf32>, vector<2x64xf32> -> vector<2x64xf32>
    %576 = arith.addf %575, %534 : vector<2x64xf32>
    %cst_129 = arith.constant dense<0.000000e+00> : vector<2x64xf32>
    %577 = tpu.matmul %558, %12, %cst_129 {dimension_numbers = #tpu.dot_dimension_numbers<[1], [0], [0], [1], [0, 0, 1, 1], [], []>} : vector<2x16xf32>, vector<16x64xf32>, vector<2x64xf32> -> vector<2x64xf32>
    %578 = arith.addf %576, %577 : vector<2x64xf32>
    %579 = arith.mulf %578, %526 : vector<2x64xf32>
    %580 = math.tanh %579 : vector<2x64xf32>
    %581 = arith.mulf %580, %526 : vector<2x64xf32>
    %582 = arith.addf %581, %529 : vector<2x64xf32>
    %583 = vector.extract_strided_slice %582 {offsets = [0, 0], sizes = [2, 16], strides = [1, 1]} : vector<2x64xf32> to vector<2x16xf32>
    %584 = vector.extract_strided_slice %582 {offsets = [0, 16], sizes = [2, 16], strides = [1, 1]} : vector<2x64xf32> to vector<2x16xf32>
    %585 = vector.extract_strided_slice %582 {offsets = [0, 32], sizes = [2, 16], strides = [1, 1]} : vector<2x64xf32> to vector<2x16xf32>
    %586 = vector.extract_strided_slice %582 {offsets = [0, 48], sizes = [2, 16], strides = [1, 1]} : vector<2x64xf32> to vector<2x16xf32>
    %587 = arith.mulf %584, %541 : vector<2x16xf32>
    %588 = arith.mulf %583, %585 : vector<2x16xf32>
    %589 = arith.addf %587, %588 : vector<2x16xf32>
    %590 = math.tanh %589 : vector<2x16xf32>
    %591 = arith.mulf %586, %590 : vector<2x16xf32>
    %cst_130 = arith.constant dense<0.000000e+00> : vector<2x64xf32>
    %592 = tpu.matmul %574, %10, %cst_130 {dimension_numbers = #tpu.dot_dimension_numbers<[1], [0], [0], [1], [0, 0, 1, 1], [], []>} : vector<2x16xf32>, vector<16x64xf32>, vector<2x64xf32> -> vector<2x64xf32>
    %593 = vector.extract_strided_slice %532 {offsets = [4, 0], sizes = [2, 64], strides = [1, 1]} : vector<16x64xf32> to vector<2x64xf32>
    %594 = arith.addf %593, %592 : vector<2x64xf32>
    %595 = arith.mulf %594, %526 : vector<2x64xf32>
    %596 = math.tanh %595 : vector<2x64xf32>
    %597 = arith.mulf %596, %526 : vector<2x64xf32>
    %598 = arith.addf %597, %529 : vector<2x64xf32>
    %599 = vector.extract_strided_slice %598 {offsets = [0, 0], sizes = [2, 16], strides = [1, 1]} : vector<2x64xf32> to vector<2x16xf32>
    %600 = vector.extract_strided_slice %598 {offsets = [0, 16], sizes = [2, 16], strides = [1, 1]} : vector<2x64xf32> to vector<2x16xf32>
    %601 = vector.extract_strided_slice %598 {offsets = [0, 32], sizes = [2, 16], strides = [1, 1]} : vector<2x64xf32> to vector<2x16xf32>
    %602 = vector.extract_strided_slice %598 {offsets = [0, 48], sizes = [2, 16], strides = [1, 1]} : vector<2x64xf32> to vector<2x16xf32>
    %603 = arith.mulf %600, %572 : vector<2x16xf32>
    %604 = arith.mulf %599, %601 : vector<2x16xf32>
    %605 = arith.addf %603, %604 : vector<2x16xf32>
    %606 = math.tanh %605 : vector<2x16xf32>
    %607 = arith.mulf %602, %606 : vector<2x16xf32>
    %cst_131 = arith.constant dense<0.000000e+00> : vector<2x64xf32>
    %608 = tpu.matmul %591, %13, %cst_131 {dimension_numbers = #tpu.dot_dimension_numbers<[1], [0], [0], [1], [0, 0, 1, 1], [], []>} : vector<2x16xf32>, vector<16x64xf32>, vector<2x64xf32> -> vector<2x64xf32>
    %609 = arith.addf %608, %534 : vector<2x64xf32>
    %cst_132 = arith.constant dense<0.000000e+00> : vector<2x64xf32>
    %610 = tpu.matmul %574, %12, %cst_132 {dimension_numbers = #tpu.dot_dimension_numbers<[1], [0], [0], [1], [0, 0, 1, 1], [], []>} : vector<2x16xf32>, vector<16x64xf32>, vector<2x64xf32> -> vector<2x64xf32>
    %611 = arith.addf %609, %610 : vector<2x64xf32>
    %612 = arith.mulf %611, %526 : vector<2x64xf32>
    %613 = math.tanh %612 : vector<2x64xf32>
    %614 = arith.mulf %613, %526 : vector<2x64xf32>
    %615 = arith.addf %614, %529 : vector<2x64xf32>
    %616 = vector.extract_strided_slice %615 {offsets = [0, 0], sizes = [2, 16], strides = [1, 1]} : vector<2x64xf32> to vector<2x16xf32>
    %617 = vector.extract_strided_slice %615 {offsets = [0, 16], sizes = [2, 16], strides = [1, 1]} : vector<2x64xf32> to vector<2x16xf32>
    %618 = vector.extract_strided_slice %615 {offsets = [0, 32], sizes = [2, 16], strides = [1, 1]} : vector<2x64xf32> to vector<2x16xf32>
    %619 = vector.extract_strided_slice %615 {offsets = [0, 48], sizes = [2, 16], strides = [1, 1]} : vector<2x64xf32> to vector<2x16xf32>
    %620 = arith.mulf %617, %589 : vector<2x16xf32>
    %621 = arith.mulf %616, %618 : vector<2x16xf32>
    %622 = arith.addf %620, %621 : vector<2x16xf32>
    %623 = math.tanh %622 : vector<2x16xf32>
    %624 = arith.mulf %619, %623 : vector<2x16xf32>
    %cst_133 = arith.constant dense<0.000000e+00> : vector<2x64xf32>
    %625 = tpu.matmul %539, %16, %cst_133 {dimension_numbers = #tpu.dot_dimension_numbers<[1], [0], [0], [1], [0, 0, 1, 1], [], []>} : vector<2x16xf32>, vector<16x64xf32>, vector<2x64xf32> -> vector<2x64xf32>
    %626 = arith.addf %625, %536 : vector<2x64xf32>
    %cst_134 = arith.constant dense<0.000000e+00> : vector<2x64xf32>
    %627 = tpu.matmul %591, %15, %cst_134 {dimension_numbers = #tpu.dot_dimension_numbers<[1], [0], [0], [1], [0, 0, 1, 1], [], []>} : vector<2x16xf32>, vector<16x64xf32>, vector<2x64xf32> -> vector<2x64xf32>
    %628 = arith.addf %626, %627 : vector<2x64xf32>
    %629 = arith.mulf %628, %526 : vector<2x64xf32>
    %630 = math.tanh %629 : vector<2x64xf32>
    %631 = arith.mulf %630, %526 : vector<2x64xf32>
    %632 = arith.addf %631, %529 : vector<2x64xf32>
    %633 = vector.extract_strided_slice %632 {offsets = [0, 0], sizes = [2, 16], strides = [1, 1]} : vector<2x64xf32> to vector<2x16xf32>
    %634 = vector.extract_strided_slice %632 {offsets = [0, 16], sizes = [2, 16], strides = [1, 1]} : vector<2x64xf32> to vector<2x16xf32>
    %635 = vector.extract_strided_slice %632 {offsets = [0, 32], sizes = [2, 16], strides = [1, 1]} : vector<2x64xf32> to vector<2x16xf32>
    %636 = vector.extract_strided_slice %632 {offsets = [0, 48], sizes = [2, 16], strides = [1, 1]} : vector<2x64xf32> to vector<2x16xf32>
    %637 = arith.mulf %634, %542 : vector<2x16xf32>
    %638 = arith.mulf %633, %635 : vector<2x16xf32>
    %639 = arith.addf %637, %638 : vector<2x16xf32>
    %640 = math.tanh %639 : vector<2x16xf32>
    %641 = arith.mulf %636, %640 : vector<2x16xf32>
    %c0_135 = arith.constant 0 : index
    %c0_136 = arith.constant 0 : index
    %642 = vector.load %arg2[%c0_135, %c0_136] : memref<16x16xf32, #tpu.memory_space<vmem>>, vector<2x16xf32>
    tpu.vector_store %arg2[%c0_135, %c0_136], %641 {strides = array<i32>} : memref<16x16xf32, #tpu.memory_space<vmem>>, vector<2x16xf32>,
    %cst_137 = arith.constant dense<0.000000e+00> : vector<2x64xf32>
    %643 = tpu.matmul %607, %10, %cst_137 {dimension_numbers = #tpu.dot_dimension_numbers<[1], [0], [0], [1], [0, 0, 1, 1], [], []>} : vector<2x16xf32>, vector<16x64xf32>, vector<2x64xf32> -> vector<2x64xf32>
    %644 = vector.extract_strided_slice %532 {offsets = [6, 0], sizes = [2, 64], strides = [1, 1]} : vector<16x64xf32> to vector<2x64xf32>
    %645 = arith.addf %644, %643 : vector<2x64xf32>
    %646 = arith.mulf %645, %526 : vector<2x64xf32>
    %647 = math.tanh %646 : vector<2x64xf32>
    %648 = arith.mulf %647, %526 : vector<2x64xf32>
    %649 = arith.addf %648, %529 : vector<2x64xf32>
    %650 = vector.extract_strided_slice %649 {offsets = [0, 0], sizes = [2, 16], strides = [1, 1]} : vector<2x64xf32> to vector<2x16xf32>
    %651 = vector.extract_strided_slice %649 {offsets = [0, 16], sizes = [2, 16], strides = [1, 1]} : vector<2x64xf32> to vector<2x16xf32>
    %652 = vector.extract_strided_slice %649 {offsets = [0, 32], sizes = [2, 16], strides = [1, 1]} : vector<2x64xf32> to vector<2x16xf32>
    %653 = vector.extract_strided_slice %649 {offsets = [0, 48], sizes = [2, 16], strides = [1, 1]} : vector<2x64xf32> to vector<2x16xf32>
    %654 = arith.mulf %651, %605 : vector<2x16xf32>
    %655 = arith.mulf %650, %652 : vector<2x16xf32>
    %656 = arith.addf %654, %655 : vector<2x16xf32>
    %657 = math.tanh %656 : vector<2x16xf32>
    %658 = arith.mulf %653, %657 : vector<2x16xf32>
    %cst_138 = arith.constant dense<0.000000e+00> : vector<2x64xf32>
    %659 = tpu.matmul %624, %13, %cst_138 {dimension_numbers = #tpu.dot_dimension_numbers<[1], [0], [0], [1], [0, 0, 1, 1], [], []>} : vector<2x16xf32>, vector<16x64xf32>, vector<2x64xf32> -> vector<2x64xf32>
    %660 = arith.addf %659, %534 : vector<2x64xf32>
    %cst_139 = arith.constant dense<0.000000e+00> : vector<2x64xf32>
    %661 = tpu.matmul %607, %12, %cst_139 {dimension_numbers = #tpu.dot_dimension_numbers<[1], [0], [0], [1], [0, 0, 1, 1], [], []>} : vector<2x16xf32>, vector<16x64xf32>, vector<2x64xf32> -> vector<2x64xf32>
    %662 = arith.addf %660, %661 : vector<2x64xf32>
    %663 = arith.mulf %662, %526 : vector<2x64xf32>
    %664 = math.tanh %663 : vector<2x64xf32>
    %665 = arith.mulf %664, %526 : vector<2x64xf32>
    %666 = arith.addf %665, %529 : vector<2x64xf32>
    %667 = vector.extract_strided_slice %666 {offsets = [0, 0], sizes = [2, 16], strides = [1, 1]} : vector<2x64xf32> to vector<2x16xf32>
    %668 = vector.extract_strided_slice %666 {offsets = [0, 16], sizes = [2, 16], strides = [1, 1]} : vector<2x64xf32> to vector<2x16xf32>
    %669 = vector.extract_strided_slice %666 {offsets = [0, 32], sizes = [2, 16], strides = [1, 1]} : vector<2x64xf32> to vector<2x16xf32>
    %670 = vector.extract_strided_slice %666 {offsets = [0, 48], sizes = [2, 16], strides = [1, 1]} : vector<2x64xf32> to vector<2x16xf32>
    %671 = arith.mulf %668, %622 : vector<2x16xf32>
    %672 = arith.mulf %667, %669 : vector<2x16xf32>
    %673 = arith.addf %671, %672 : vector<2x16xf32>
    %674 = math.tanh %673 : vector<2x16xf32>
    %675 = arith.mulf %670, %674 : vector<2x16xf32>
    %cst_140 = arith.constant dense<0.000000e+00> : vector<2x64xf32>
    %676 = tpu.matmul %641, %16, %cst_140 {dimension_numbers = #tpu.dot_dimension_numbers<[1], [0], [0], [1], [0, 0, 1, 1], [], []>} : vector<2x16xf32>, vector<16x64xf32>, vector<2x64xf32> -> vector<2x64xf32>
    %677 = arith.addf %676, %536 : vector<2x64xf32>
    %cst_141 = arith.constant dense<0.000000e+00> : vector<2x64xf32>
    %678 = tpu.matmul %624, %15, %cst_141 {dimension_numbers = #tpu.dot_dimension_numbers<[1], [0], [0], [1], [0, 0, 1, 1], [], []>} : vector<2x16xf32>, vector<16x64xf32>, vector<2x64xf32> -> vector<2x64xf32>
    %679 = arith.addf %677, %678 : vector<2x64xf32>
    %680 = arith.mulf %679, %526 : vector<2x64xf32>
    %681 = math.tanh %680 : vector<2x64xf32>
    %682 = arith.mulf %681, %526 : vector<2x64xf32>
    %683 = arith.addf %682, %529 : vector<2x64xf32>
    %684 = vector.extract_strided_slice %683 {offsets = [0, 0], sizes = [2, 16], strides = [1, 1]} : vector<2x64xf32> to vector<2x16xf32>
    %685 = vector.extract_strided_slice %683 {offsets = [0, 16], sizes = [2, 16], strides = [1, 1]} : vector<2x64xf32> to vector<2x16xf32>
    %686 = vector.extract_strided_slice %683 {offsets = [0, 32], sizes = [2, 16], strides = [1, 1]} : vector<2x64xf32> to vector<2x16xf32>
    %687 = vector.extract_strided_slice %683 {offsets = [0, 48], sizes = [2, 16], strides = [1, 1]} : vector<2x64xf32> to vector<2x16xf32>
    %688 = arith.mulf %685, %639 : vector<2x16xf32>
    %689 = arith.mulf %684, %686 : vector<2x16xf32>
    %690 = arith.addf %688, %689 : vector<2x16xf32>
    %691 = math.tanh %690 : vector<2x16xf32>
    %692 = arith.mulf %687, %691 : vector<2x16xf32>
    %c2_142 = arith.constant 2 : index
    %c0_143 = arith.constant 0 : index
    %693 = vector.load %arg2[%c2_142, %c0_143] : memref<16x16xf32, #tpu.memory_space<vmem>>, vector<2x16xf32>
    tpu.vector_store %arg2[%c2_142, %c0_143], %692 {strides = array<i32>} : memref<16x16xf32, #tpu.memory_space<vmem>>, vector<2x16xf32>,
    %cst_144 = arith.constant dense<0.000000e+00> : vector<2x64xf32>
    %694 = tpu.matmul %658, %10, %cst_144 {dimension_numbers = #tpu.dot_dimension_numbers<[1], [0], [0], [1], [0, 0, 1, 1], [], []>} : vector<2x16xf32>, vector<16x64xf32>, vector<2x64xf32> -> vector<2x64xf32>
    %695 = vector.extract_strided_slice %532 {offsets = [8, 0], sizes = [2, 64], strides = [1, 1]} : vector<16x64xf32> to vector<2x64xf32>
    %696 = arith.addf %695, %694 : vector<2x64xf32>
    %697 = arith.mulf %696, %526 : vector<2x64xf32>
    %698 = math.tanh %697 : vector<2x64xf32>
    %699 = arith.mulf %698, %526 : vector<2x64xf32>
    %700 = arith.addf %699, %529 : vector<2x64xf32>
    %701 = vector.extract_strided_slice %700 {offsets = [0, 0], sizes = [2, 16], strides = [1, 1]} : vector<2x64xf32> to vector<2x16xf32>
    %702 = vector.extract_strided_slice %700 {offsets = [0, 16], sizes = [2, 16], strides = [1, 1]} : vector<2x64xf32> to vector<2x16xf32>
    %703 = vector.extract_strided_slice %700 {offsets = [0, 32], sizes = [2, 16], strides = [1, 1]} : vector<2x64xf32> to vector<2x16xf32>
    %704 = vector.extract_strided_slice %700 {offsets = [0, 48], sizes = [2, 16], strides = [1, 1]} : vector<2x64xf32> to vector<2x16xf32>
    %705 = arith.mulf %702, %656 : vector<2x16xf32>
    %706 = arith.mulf %701, %703 : vector<2x16xf32>
    %707 = arith.addf %705, %706 : vector<2x16xf32>
    %708 = math.tanh %707 : vector<2x16xf32>
    %709 = arith.mulf %704, %708 : vector<2x16xf32>
    %cst_145 = arith.constant dense<0.000000e+00> : vector<2x64xf32>
    %710 = tpu.matmul %675, %13, %cst_145 {dimension_numbers = #tpu.dot_dimension_numbers<[1], [0], [0], [1], [0, 0, 1, 1], [], []>} : vector<2x16xf32>, vector<16x64xf32>, vector<2x64xf32> -> vector<2x64xf32>
    %711 = arith.addf %710, %534 : vector<2x64xf32>
    %cst_146 = arith.constant dense<0.000000e+00> : vector<2x64xf32>
    %712 = tpu.matmul %658, %12, %cst_146 {dimension_numbers = #tpu.dot_dimension_numbers<[1], [0], [0], [1], [0, 0, 1, 1], [], []>} : vector<2x16xf32>, vector<16x64xf32>, vector<2x64xf32> -> vector<2x64xf32>
    %713 = arith.addf %711, %712 : vector<2x64xf32>
    %714 = arith.mulf %713, %526 : vector<2x64xf32>
    %715 = math.tanh %714 : vector<2x64xf32>
    %716 = arith.mulf %715, %526 : vector<2x64xf32>
    %717 = arith.addf %716, %529 : vector<2x64xf32>
    %718 = vector.extract_strided_slice %717 {offsets = [0, 0], sizes = [2, 16], strides = [1, 1]} : vector<2x64xf32> to vector<2x16xf32>
    %719 = vector.extract_strided_slice %717 {offsets = [0, 16], sizes = [2, 16], strides = [1, 1]} : vector<2x64xf32> to vector<2x16xf32>
    %720 = vector.extract_strided_slice %717 {offsets = [0, 32], sizes = [2, 16], strides = [1, 1]} : vector<2x64xf32> to vector<2x16xf32>
    %721 = vector.extract_strided_slice %717 {offsets = [0, 48], sizes = [2, 16], strides = [1, 1]} : vector<2x64xf32> to vector<2x16xf32>
    %722 = arith.mulf %719, %673 : vector<2x16xf32>
    %723 = arith.mulf %718, %720 : vector<2x16xf32>
    %724 = arith.addf %722, %723 : vector<2x16xf32>
    %725 = math.tanh %724 : vector<2x16xf32>
    %726 = arith.mulf %721, %725 : vector<2x16xf32>
    %cst_147 = arith.constant dense<0.000000e+00> : vector<2x64xf32>
    %727 = tpu.matmul %692, %16, %cst_147 {dimension_numbers = #tpu.dot_dimension_numbers<[1], [0], [0], [1], [0, 0, 1, 1], [], []>} : vector<2x16xf32>, vector<16x64xf32>, vector<2x64xf32> -> vector<2x64xf32>
    %728 = arith.addf %727, %536 : vector<2x64xf32>
    %cst_148 = arith.constant dense<0.000000e+00> : vector<2x64xf32>
    %729 = tpu.matmul %675, %15, %cst_148 {dimension_numbers = #tpu.dot_dimension_numbers<[1], [0], [0], [1], [0, 0, 1, 1], [], []>} : vector<2x16xf32>, vector<16x64xf32>, vector<2x64xf32> -> vector<2x64xf32>
    %730 = arith.addf %728, %729 : vector<2x64xf32>
    %731 = arith.mulf %730, %526 : vector<2x64xf32>
    %732 = math.tanh %731 : vector<2x64xf32>
    %733 = arith.mulf %732, %526 : vector<2x64xf32>
    %734 = arith.addf %733, %529 : vector<2x64xf32>
    %735 = vector.extract_strided_slice %734 {offsets = [0, 0], sizes = [2, 16], strides = [1, 1]} : vector<2x64xf32> to vector<2x16xf32>
    %736 = vector.extract_strided_slice %734 {offsets = [0, 16], sizes = [2, 16], strides = [1, 1]} : vector<2x64xf32> to vector<2x16xf32>
    %737 = vector.extract_strided_slice %734 {offsets = [0, 32], sizes = [2, 16], strides = [1, 1]} : vector<2x64xf32> to vector<2x16xf32>
    %738 = vector.extract_strided_slice %734 {offsets = [0, 48], sizes = [2, 16], strides = [1, 1]} : vector<2x64xf32> to vector<2x16xf32>
    %739 = arith.mulf %736, %690 : vector<2x16xf32>
    %740 = arith.mulf %735, %737 : vector<2x16xf32>
    %741 = arith.addf %739, %740 : vector<2x16xf32>
    %742 = math.tanh %741 : vector<2x16xf32>
    %743 = arith.mulf %738, %742 : vector<2x16xf32>
    %c4_149 = arith.constant 4 : index
    %c0_150 = arith.constant 0 : index
    %744 = vector.load %arg2[%c4_149, %c0_150] : memref<16x16xf32, #tpu.memory_space<vmem>>, vector<2x16xf32>
    tpu.vector_store %arg2[%c4_149, %c0_150], %743 {strides = array<i32>} : memref<16x16xf32, #tpu.memory_space<vmem>>, vector<2x16xf32>,
    %cst_151 = arith.constant dense<0.000000e+00> : vector<2x64xf32>
    %745 = tpu.matmul %709, %10, %cst_151 {dimension_numbers = #tpu.dot_dimension_numbers<[1], [0], [0], [1], [0, 0, 1, 1], [], []>} : vector<2x16xf32>, vector<16x64xf32>, vector<2x64xf32> -> vector<2x64xf32>
    %746 = vector.extract_strided_slice %532 {offsets = [10, 0], sizes = [2, 64], strides = [1, 1]} : vector<16x64xf32> to vector<2x64xf32>
    %747 = arith.addf %746, %745 : vector<2x64xf32>
    %748 = arith.mulf %747, %526 : vector<2x64xf32>
    %749 = math.tanh %748 : vector<2x64xf32>
    %750 = arith.mulf %749, %526 : vector<2x64xf32>
    %751 = arith.addf %750, %529 : vector<2x64xf32>
    %752 = vector.extract_strided_slice %751 {offsets = [0, 0], sizes = [2, 16], strides = [1, 1]} : vector<2x64xf32> to vector<2x16xf32>
    %753 = vector.extract_strided_slice %751 {offsets = [0, 16], sizes = [2, 16], strides = [1, 1]} : vector<2x64xf32> to vector<2x16xf32>
    %754 = vector.extract_strided_slice %751 {offsets = [0, 32], sizes = [2, 16], strides = [1, 1]} : vector<2x64xf32> to vector<2x16xf32>
    %755 = vector.extract_strided_slice %751 {offsets = [0, 48], sizes = [2, 16], strides = [1, 1]} : vector<2x64xf32> to vector<2x16xf32>
    %756 = arith.mulf %753, %707 : vector<2x16xf32>
    %757 = arith.mulf %752, %754 : vector<2x16xf32>
    %758 = arith.addf %756, %757 : vector<2x16xf32>
    %759 = math.tanh %758 : vector<2x16xf32>
    %760 = arith.mulf %755, %759 : vector<2x16xf32>
    %cst_152 = arith.constant dense<0.000000e+00> : vector<2x64xf32>
    %761 = tpu.matmul %726, %13, %cst_152 {dimension_numbers = #tpu.dot_dimension_numbers<[1], [0], [0], [1], [0, 0, 1, 1], [], []>} : vector<2x16xf32>, vector<16x64xf32>, vector<2x64xf32> -> vector<2x64xf32>
    %762 = arith.addf %761, %534 : vector<2x64xf32>
    %cst_153 = arith.constant dense<0.000000e+00> : vector<2x64xf32>
    %763 = tpu.matmul %709, %12, %cst_153 {dimension_numbers = #tpu.dot_dimension_numbers<[1], [0], [0], [1], [0, 0, 1, 1], [], []>} : vector<2x16xf32>, vector<16x64xf32>, vector<2x64xf32> -> vector<2x64xf32>
    %764 = arith.addf %762, %763 : vector<2x64xf32>
    %765 = arith.mulf %764, %526 : vector<2x64xf32>
    %766 = math.tanh %765 : vector<2x64xf32>
    %767 = arith.mulf %766, %526 : vector<2x64xf32>
    %768 = arith.addf %767, %529 : vector<2x64xf32>
    %769 = vector.extract_strided_slice %768 {offsets = [0, 0], sizes = [2, 16], strides = [1, 1]} : vector<2x64xf32> to vector<2x16xf32>
    %770 = vector.extract_strided_slice %768 {offsets = [0, 16], sizes = [2, 16], strides = [1, 1]} : vector<2x64xf32> to vector<2x16xf32>
    %771 = vector.extract_strided_slice %768 {offsets = [0, 32], sizes = [2, 16], strides = [1, 1]} : vector<2x64xf32> to vector<2x16xf32>
    %772 = vector.extract_strided_slice %768 {offsets = [0, 48], sizes = [2, 16], strides = [1, 1]} : vector<2x64xf32> to vector<2x16xf32>
    %773 = arith.mulf %770, %724 : vector<2x16xf32>
    %774 = arith.mulf %769, %771 : vector<2x16xf32>
    %775 = arith.addf %773, %774 : vector<2x16xf32>
    %776 = math.tanh %775 : vector<2x16xf32>
    %777 = arith.mulf %772, %776 : vector<2x16xf32>
    %cst_154 = arith.constant dense<0.000000e+00> : vector<2x64xf32>
    %778 = tpu.matmul %743, %16, %cst_154 {dimension_numbers = #tpu.dot_dimension_numbers<[1], [0], [0], [1], [0, 0, 1, 1], [], []>} : vector<2x16xf32>, vector<16x64xf32>, vector<2x64xf32> -> vector<2x64xf32>
    %779 = arith.addf %778, %536 : vector<2x64xf32>
    %cst_155 = arith.constant dense<0.000000e+00> : vector<2x64xf32>
    %780 = tpu.matmul %726, %15, %cst_155 {dimension_numbers = #tpu.dot_dimension_numbers<[1], [0], [0], [1], [0, 0, 1, 1], [], []>} : vector<2x16xf32>, vector<16x64xf32>, vector<2x64xf32> -> vector<2x64xf32>
    %781 = arith.addf %779, %780 : vector<2x64xf32>
    %782 = arith.mulf %781, %526 : vector<2x64xf32>
    %783 = math.tanh %782 : vector<2x64xf32>
    %784 = arith.mulf %783, %526 : vector<2x64xf32>
    %785 = arith.addf %784, %529 : vector<2x64xf32>
    %786 = vector.extract_strided_slice %785 {offsets = [0, 0], sizes = [2, 16], strides = [1, 1]} : vector<2x64xf32> to vector<2x16xf32>
    %787 = vector.extract_strided_slice %785 {offsets = [0, 16], sizes = [2, 16], strides = [1, 1]} : vector<2x64xf32> to vector<2x16xf32>
    %788 = vector.extract_strided_slice %785 {offsets = [0, 32], sizes = [2, 16], strides = [1, 1]} : vector<2x64xf32> to vector<2x16xf32>
    %789 = vector.extract_strided_slice %785 {offsets = [0, 48], sizes = [2, 16], strides = [1, 1]} : vector<2x64xf32> to vector<2x16xf32>
    %790 = arith.mulf %787, %741 : vector<2x16xf32>
    %791 = arith.mulf %786, %788 : vector<2x16xf32>
    %792 = arith.addf %790, %791 : vector<2x16xf32>
    %793 = math.tanh %792 : vector<2x16xf32>
    %794 = arith.mulf %789, %793 : vector<2x16xf32>
    %c6_156 = arith.constant 6 : index
    %c0_157 = arith.constant 0 : index
    %795 = vector.load %arg2[%c6_156, %c0_157] : memref<16x16xf32, #tpu.memory_space<vmem>>, vector<2x16xf32>
    tpu.vector_store %arg2[%c6_156, %c0_157], %794 {strides = array<i32>} : memref<16x16xf32, #tpu.memory_space<vmem>>, vector<2x16xf32>,
    %cst_158 = arith.constant dense<0.000000e+00> : vector<2x64xf32>
    %796 = tpu.matmul %760, %10, %cst_158 {dimension_numbers = #tpu.dot_dimension_numbers<[1], [0], [0], [1], [0, 0, 1, 1], [], []>} : vector<2x16xf32>, vector<16x64xf32>, vector<2x64xf32> -> vector<2x64xf32>
    %797 = vector.extract_strided_slice %532 {offsets = [12, 0], sizes = [2, 64], strides = [1, 1]} : vector<16x64xf32> to vector<2x64xf32>
    %798 = arith.addf %797, %796 : vector<2x64xf32>
    %799 = arith.mulf %798, %526 : vector<2x64xf32>
    %800 = math.tanh %799 : vector<2x64xf32>
    %801 = arith.mulf %800, %526 : vector<2x64xf32>
    %802 = arith.addf %801, %529 : vector<2x64xf32>
    %803 = vector.extract_strided_slice %802 {offsets = [0, 0], sizes = [2, 16], strides = [1, 1]} : vector<2x64xf32> to vector<2x16xf32>
    %804 = vector.extract_strided_slice %802 {offsets = [0, 16], sizes = [2, 16], strides = [1, 1]} : vector<2x64xf32> to vector<2x16xf32>
    %805 = vector.extract_strided_slice %802 {offsets = [0, 32], sizes = [2, 16], strides = [1, 1]} : vector<2x64xf32> to vector<2x16xf32>
    %806 = vector.extract_strided_slice %802 {offsets = [0, 48], sizes = [2, 16], strides = [1, 1]} : vector<2x64xf32> to vector<2x16xf32>
    %807 = arith.mulf %804, %758 : vector<2x16xf32>
    %808 = arith.mulf %803, %805 : vector<2x16xf32>
    %809 = arith.addf %807, %808 : vector<2x16xf32>
    %810 = math.tanh %809 : vector<2x16xf32>
    %811 = arith.mulf %806, %810 : vector<2x16xf32>
    %cst_159 = arith.constant dense<0.000000e+00> : vector<2x64xf32>
    %812 = tpu.matmul %777, %13, %cst_159 {dimension_numbers = #tpu.dot_dimension_numbers<[1], [0], [0], [1], [0, 0, 1, 1], [], []>} : vector<2x16xf32>, vector<16x64xf32>, vector<2x64xf32> -> vector<2x64xf32>
    %813 = arith.addf %812, %534 : vector<2x64xf32>
    %cst_160 = arith.constant dense<0.000000e+00> : vector<2x64xf32>
    %814 = tpu.matmul %760, %12, %cst_160 {dimension_numbers = #tpu.dot_dimension_numbers<[1], [0], [0], [1], [0, 0, 1, 1], [], []>} : vector<2x16xf32>, vector<16x64xf32>, vector<2x64xf32> -> vector<2x64xf32>
    %815 = arith.addf %813, %814 : vector<2x64xf32>
    %816 = arith.mulf %815, %526 : vector<2x64xf32>
    %817 = math.tanh %816 : vector<2x64xf32>
    %818 = arith.mulf %817, %526 : vector<2x64xf32>
    %819 = arith.addf %818, %529 : vector<2x64xf32>
    %820 = vector.extract_strided_slice %819 {offsets = [0, 0], sizes = [2, 16], strides = [1, 1]} : vector<2x64xf32> to vector<2x16xf32>
    %821 = vector.extract_strided_slice %819 {offsets = [0, 16], sizes = [2, 16], strides = [1, 1]} : vector<2x64xf32> to vector<2x16xf32>
    %822 = vector.extract_strided_slice %819 {offsets = [0, 32], sizes = [2, 16], strides = [1, 1]} : vector<2x64xf32> to vector<2x16xf32>
    %823 = vector.extract_strided_slice %819 {offsets = [0, 48], sizes = [2, 16], strides = [1, 1]} : vector<2x64xf32> to vector<2x16xf32>
    %824 = arith.mulf %821, %775 : vector<2x16xf32>
    %825 = arith.mulf %820, %822 : vector<2x16xf32>
    %826 = arith.addf %824, %825 : vector<2x16xf32>
    %827 = math.tanh %826 : vector<2x16xf32>
    %828 = arith.mulf %823, %827 : vector<2x16xf32>
    %cst_161 = arith.constant dense<0.000000e+00> : vector<2x64xf32>
    %829 = tpu.matmul %794, %16, %cst_161 {dimension_numbers = #tpu.dot_dimension_numbers<[1], [0], [0], [1], [0, 0, 1, 1], [], []>} : vector<2x16xf32>, vector<16x64xf32>, vector<2x64xf32> -> vector<2x64xf32>
    %830 = arith.addf %829, %536 : vector<2x64xf32>
    %cst_162 = arith.constant dense<0.000000e+00> : vector<2x64xf32>
    %831 = tpu.matmul %777, %15, %cst_162 {dimension_numbers = #tpu.dot_dimension_numbers<[1], [0], [0], [1], [0, 0, 1, 1], [], []>} : vector<2x16xf32>, vector<16x64xf32>, vector<2x64xf32> -> vector<2x64xf32>
    %832 = arith.addf %830, %831 : vector<2x64xf32>
    %833 = arith.mulf %832, %526 : vector<2x64xf32>
    %834 = math.tanh %833 : vector<2x64xf32>
    %835 = arith.mulf %834, %526 : vector<2x64xf32>
    %836 = arith.addf %835, %529 : vector<2x64xf32>
    %837 = vector.extract_strided_slice %836 {offsets = [0, 0], sizes = [2, 16], strides = [1, 1]} : vector<2x64xf32> to vector<2x16xf32>
    %838 = vector.extract_strided_slice %836 {offsets = [0, 16], sizes = [2, 16], strides = [1, 1]} : vector<2x64xf32> to vector<2x16xf32>
    %839 = vector.extract_strided_slice %836 {offsets = [0, 32], sizes = [2, 16], strides = [1, 1]} : vector<2x64xf32> to vector<2x16xf32>
    %840 = vector.extract_strided_slice %836 {offsets = [0, 48], sizes = [2, 16], strides = [1, 1]} : vector<2x64xf32> to vector<2x16xf32>
    %841 = arith.mulf %838, %792 : vector<2x16xf32>
    %842 = arith.mulf %837, %839 : vector<2x16xf32>
    %843 = arith.addf %841, %842 : vector<2x16xf32>
    %844 = math.tanh %843 : vector<2x16xf32>
    %845 = arith.mulf %840, %844 : vector<2x16xf32>
    %c8_163 = arith.constant 8 : index
    %c0_164 = arith.constant 0 : index
    %846 = vector.load %arg2[%c8_163, %c0_164] : memref<16x16xf32, #tpu.memory_space<vmem>>, vector<2x16xf32>
    tpu.vector_store %arg2[%c8_163, %c0_164], %845 {strides = array<i32>} : memref<16x16xf32, #tpu.memory_space<vmem>>, vector<2x16xf32>,
    %cst_165 = arith.constant dense<0.000000e+00> : vector<2x64xf32>
    %847 = tpu.matmul %811, %10, %cst_165 {dimension_numbers = #tpu.dot_dimension_numbers<[1], [0], [0], [1], [0, 0, 1, 1], [], []>} : vector<2x16xf32>, vector<16x64xf32>, vector<2x64xf32> -> vector<2x64xf32>
    %848 = vector.extract_strided_slice %532 {offsets = [14, 0], sizes = [2, 64], strides = [1, 1]} : vector<16x64xf32> to vector<2x64xf32>
    %849 = arith.addf %848, %847 : vector<2x64xf32>
    %850 = arith.mulf %849, %526 : vector<2x64xf32>
    %851 = math.tanh %850 : vector<2x64xf32>
    %852 = arith.mulf %851, %526 : vector<2x64xf32>
    %853 = arith.addf %852, %529 : vector<2x64xf32>
    %854 = vector.extract_strided_slice %853 {offsets = [0, 0], sizes = [2, 16], strides = [1, 1]} : vector<2x64xf32> to vector<2x16xf32>
    %855 = vector.extract_strided_slice %853 {offsets = [0, 16], sizes = [2, 16], strides = [1, 1]} : vector<2x64xf32> to vector<2x16xf32>
    %856 = vector.extract_strided_slice %853 {offsets = [0, 32], sizes = [2, 16], strides = [1, 1]} : vector<2x64xf32> to vector<2x16xf32>
    %857 = vector.extract_strided_slice %853 {offsets = [0, 48], sizes = [2, 16], strides = [1, 1]} : vector<2x64xf32> to vector<2x16xf32>
    %858 = arith.mulf %855, %809 : vector<2x16xf32>
    %859 = arith.mulf %854, %856 : vector<2x16xf32>
    %860 = arith.addf %858, %859 : vector<2x16xf32>
    %861 = math.tanh %860 : vector<2x16xf32>
    %862 = arith.mulf %857, %861 : vector<2x16xf32>
    %cst_166 = arith.constant dense<0.000000e+00> : vector<2x64xf32>
    %863 = tpu.matmul %828, %13, %cst_166 {dimension_numbers = #tpu.dot_dimension_numbers<[1], [0], [0], [1], [0, 0, 1, 1], [], []>} : vector<2x16xf32>, vector<16x64xf32>, vector<2x64xf32> -> vector<2x64xf32>
    %864 = arith.addf %863, %534 : vector<2x64xf32>
    %cst_167 = arith.constant dense<0.000000e+00> : vector<2x64xf32>
    %865 = tpu.matmul %811, %12, %cst_167 {dimension_numbers = #tpu.dot_dimension_numbers<[1], [0], [0], [1], [0, 0, 1, 1], [], []>} : vector<2x16xf32>, vector<16x64xf32>, vector<2x64xf32> -> vector<2x64xf32>
    %866 = arith.addf %864, %865 : vector<2x64xf32>
    %867 = arith.mulf %866, %526 : vector<2x64xf32>
    %868 = math.tanh %867 : vector<2x64xf32>
    %869 = arith.mulf %868, %526 : vector<2x64xf32>
    %870 = arith.addf %869, %529 : vector<2x64xf32>
    %871 = vector.extract_strided_slice %870 {offsets = [0, 0], sizes = [2, 16], strides = [1, 1]} : vector<2x64xf32> to vector<2x16xf32>
    %872 = vector.extract_strided_slice %870 {offsets = [0, 16], sizes = [2, 16], strides = [1, 1]} : vector<2x64xf32> to vector<2x16xf32>
    %873 = vector.extract_strided_slice %870 {offsets = [0, 32], sizes = [2, 16], strides = [1, 1]} : vector<2x64xf32> to vector<2x16xf32>
    %874 = vector.extract_strided_slice %870 {offsets = [0, 48], sizes = [2, 16], strides = [1, 1]} : vector<2x64xf32> to vector<2x16xf32>
    %875 = arith.mulf %872, %826 : vector<2x16xf32>
    %876 = arith.mulf %871, %873 : vector<2x16xf32>
    %877 = arith.addf %875, %876 : vector<2x16xf32>
    %878 = math.tanh %877 : vector<2x16xf32>
    %879 = arith.mulf %874, %878 : vector<2x16xf32>
    %cst_168 = arith.constant dense<0.000000e+00> : vector<2x64xf32>
    %880 = tpu.matmul %845, %16, %cst_168 {dimension_numbers = #tpu.dot_dimension_numbers<[1], [0], [0], [1], [0, 0, 1, 1], [], []>} : vector<2x16xf32>, vector<16x64xf32>, vector<2x64xf32> -> vector<2x64xf32>
    %881 = arith.addf %880, %536 : vector<2x64xf32>
    %cst_169 = arith.constant dense<0.000000e+00> : vector<2x64xf32>
    %882 = tpu.matmul %828, %15, %cst_169 {dimension_numbers = #tpu.dot_dimension_numbers<[1], [0], [0], [1], [0, 0, 1, 1], [], []>} : vector<2x16xf32>, vector<16x64xf32>, vector<2x64xf32> -> vector<2x64xf32>
    %883 = arith.addf %881, %882 : vector<2x64xf32>
    %884 = arith.mulf %883, %526 : vector<2x64xf32>
    %885 = math.tanh %884 : vector<2x64xf32>
    %886 = arith.mulf %885, %526 : vector<2x64xf32>
    %887 = arith.addf %886, %529 : vector<2x64xf32>
    %888 = vector.extract_strided_slice %887 {offsets = [0, 0], sizes = [2, 16], strides = [1, 1]} : vector<2x64xf32> to vector<2x16xf32>
    %889 = vector.extract_strided_slice %887 {offsets = [0, 16], sizes = [2, 16], strides = [1, 1]} : vector<2x64xf32> to vector<2x16xf32>
    %890 = vector.extract_strided_slice %887 {offsets = [0, 32], sizes = [2, 16], strides = [1, 1]} : vector<2x64xf32> to vector<2x16xf32>
    %891 = vector.extract_strided_slice %887 {offsets = [0, 48], sizes = [2, 16], strides = [1, 1]} : vector<2x64xf32> to vector<2x16xf32>
    %892 = arith.mulf %889, %843 : vector<2x16xf32>
    %893 = arith.mulf %888, %890 : vector<2x16xf32>
    %894 = arith.addf %892, %893 : vector<2x16xf32>
    %895 = math.tanh %894 : vector<2x16xf32>
    %896 = arith.mulf %891, %895 : vector<2x16xf32>
    %c10_170 = arith.constant 10 : index
    %c0_171 = arith.constant 0 : index
    %897 = vector.load %arg2[%c10_170, %c0_171] : memref<16x16xf32, #tpu.memory_space<vmem>>, vector<2x16xf32>
    tpu.vector_store %arg2[%c10_170, %c0_171], %896 {strides = array<i32>} : memref<16x16xf32, #tpu.memory_space<vmem>>, vector<2x16xf32>,
    %cst_172 = arith.constant dense<0.000000e+00> : vector<2x64xf32>
    %898 = tpu.matmul %879, %13, %cst_172 {dimension_numbers = #tpu.dot_dimension_numbers<[1], [0], [0], [1], [0, 0, 1, 1], [], []>} : vector<2x16xf32>, vector<16x64xf32>, vector<2x64xf32> -> vector<2x64xf32>
    %899 = arith.addf %898, %534 : vector<2x64xf32>
    %cst_173 = arith.constant dense<0.000000e+00> : vector<2x64xf32>
    %900 = tpu.matmul %862, %12, %cst_173 {dimension_numbers = #tpu.dot_dimension_numbers<[1], [0], [0], [1], [0, 0, 1, 1], [], []>} : vector<2x16xf32>, vector<16x64xf32>, vector<2x64xf32> -> vector<2x64xf32>
    %901 = arith.addf %899, %900 : vector<2x64xf32>
    %902 = arith.mulf %901, %526 : vector<2x64xf32>
    %903 = math.tanh %902 : vector<2x64xf32>
    %904 = arith.mulf %903, %526 : vector<2x64xf32>
    %905 = arith.addf %904, %529 : vector<2x64xf32>
    %906 = vector.extract_strided_slice %905 {offsets = [0, 0], sizes = [2, 16], strides = [1, 1]} : vector<2x64xf32> to vector<2x16xf32>
    %907 = vector.extract_strided_slice %905 {offsets = [0, 16], sizes = [2, 16], strides = [1, 1]} : vector<2x64xf32> to vector<2x16xf32>
    %908 = vector.extract_strided_slice %905 {offsets = [0, 32], sizes = [2, 16], strides = [1, 1]} : vector<2x64xf32> to vector<2x16xf32>
    %909 = vector.extract_strided_slice %905 {offsets = [0, 48], sizes = [2, 16], strides = [1, 1]} : vector<2x64xf32> to vector<2x16xf32>
    %910 = arith.mulf %907, %877 : vector<2x16xf32>
    %911 = arith.mulf %906, %908 : vector<2x16xf32>
    %912 = arith.addf %910, %911 : vector<2x16xf32>
    %913 = math.tanh %912 : vector<2x16xf32>
    %914 = arith.mulf %909, %913 : vector<2x16xf32>
    %cst_174 = arith.constant dense<0.000000e+00> : vector<2x64xf32>
    %915 = tpu.matmul %896, %16, %cst_174 {dimension_numbers = #tpu.dot_dimension_numbers<[1], [0], [0], [1], [0, 0, 1, 1], [], []>} : vector<2x16xf32>, vector<16x64xf32>, vector<2x64xf32> -> vector<2x64xf32>
    %916 = arith.addf %915, %536 : vector<2x64xf32>
    %cst_175 = arith.constant dense<0.000000e+00> : vector<2x64xf32>
    %917 = tpu.matmul %879, %15, %cst_175 {dimension_numbers = #tpu.dot_dimension_numbers<[1], [0], [0], [1], [0, 0, 1, 1], [], []>} : vector<2x16xf32>, vector<16x64xf32>, vector<2x64xf32> -> vector<2x64xf32>
    %918 = arith.addf %916, %917 : vector<2x64xf32>
    %919 = arith.mulf %918, %526 : vector<2x64xf32>
    %920 = math.tanh %919 : vector<2x64xf32>
    %921 = arith.mulf %920, %526 : vector<2x64xf32>
    %922 = arith.addf %921, %529 : vector<2x64xf32>
    %923 = vector.extract_strided_slice %922 {offsets = [0, 0], sizes = [2, 16], strides = [1, 1]} : vector<2x64xf32> to vector<2x16xf32>
    %924 = vector.extract_strided_slice %922 {offsets = [0, 16], sizes = [2, 16], strides = [1, 1]} : vector<2x64xf32> to vector<2x16xf32>
    %925 = vector.extract_strided_slice %922 {offsets = [0, 32], sizes = [2, 16], strides = [1, 1]} : vector<2x64xf32> to vector<2x16xf32>
    %926 = vector.extract_strided_slice %922 {offsets = [0, 48], sizes = [2, 16], strides = [1, 1]} : vector<2x64xf32> to vector<2x16xf32>
    %927 = arith.mulf %924, %894 : vector<2x16xf32>
    %928 = arith.mulf %923, %925 : vector<2x16xf32>
    %929 = arith.addf %927, %928 : vector<2x16xf32>
    %930 = math.tanh %929 : vector<2x16xf32>
    %931 = arith.mulf %926, %930 : vector<2x16xf32>
    %c12_176 = arith.constant 12 : index
    %c0_177 = arith.constant 0 : index
    %932 = vector.load %arg2[%c12_176, %c0_177] : memref<16x16xf32, #tpu.memory_space<vmem>>, vector<2x16xf32>
    tpu.vector_store %arg2[%c12_176, %c0_177], %931 {strides = array<i32>} : memref<16x16xf32, #tpu.memory_space<vmem>>, vector<2x16xf32>,
    %cst_178 = arith.constant dense<0.000000e+00> : vector<2x64xf32>
    %933 = tpu.matmul %931, %16, %cst_178 {dimension_numbers = #tpu.dot_dimension_numbers<[1], [0], [0], [1], [0, 0, 1, 1], [], []>} : vector<2x16xf32>, vector<16x64xf32>, vector<2x64xf32> -> vector<2x64xf32>
    %934 = arith.addf %933, %536 : vector<2x64xf32>
    %cst_179 = arith.constant dense<0.000000e+00> : vector<2x64xf32>
    %935 = tpu.matmul %914, %15, %cst_179 {dimension_numbers = #tpu.dot_dimension_numbers<[1], [0], [0], [1], [0, 0, 1, 1], [], []>} : vector<2x16xf32>, vector<16x64xf32>, vector<2x64xf32> -> vector<2x64xf32>
    %936 = arith.addf %934, %935 : vector<2x64xf32>
    %937 = arith.mulf %936, %526 : vector<2x64xf32>
    %938 = math.tanh %937 : vector<2x64xf32>
    %939 = arith.mulf %938, %526 : vector<2x64xf32>
    %940 = arith.addf %939, %529 : vector<2x64xf32>
    %941 = vector.extract_strided_slice %940 {offsets = [0, 0], sizes = [2, 16], strides = [1, 1]} : vector<2x64xf32> to vector<2x16xf32>
    %942 = vector.extract_strided_slice %940 {offsets = [0, 16], sizes = [2, 16], strides = [1, 1]} : vector<2x64xf32> to vector<2x16xf32>
    %943 = vector.extract_strided_slice %940 {offsets = [0, 32], sizes = [2, 16], strides = [1, 1]} : vector<2x64xf32> to vector<2x16xf32>
    %944 = vector.extract_strided_slice %940 {offsets = [0, 48], sizes = [2, 16], strides = [1, 1]} : vector<2x64xf32> to vector<2x16xf32>
    %945 = arith.mulf %942, %929 : vector<2x16xf32>
    %946 = arith.mulf %941, %943 : vector<2x16xf32>
    %947 = arith.addf %945, %946 : vector<2x16xf32>
    %948 = math.tanh %947 : vector<2x16xf32>
    %949 = arith.mulf %944, %948 : vector<2x16xf32>
    %c14_180 = arith.constant 14 : index
    %c0_181 = arith.constant 0 : index
    %950 = vector.load %arg2[%c14_180, %c0_181] : memref<16x16xf32, #tpu.memory_space<vmem>>, vector<2x16xf32>
    tpu.vector_store %arg2[%c14_180, %c0_181], %949 {strides = array<i32>} : memref<16x16xf32, #tpu.memory_space<vmem>>, vector<2x16xf32>,
    return
  }
}

</mosaic_0001>

<bundles_post_ra>
// kernel: tpu_custom_call.1
= control target key start
LH: loop header
LB: loop body
LE: loop exit
PB: predicated region body
PF: predicated region fallthrough
CT: control target
= control target key end

     0   :  { %9 = vsyncpa [#allocation4], 0  ;;  %s11211_s0 = inlined_call_operand.hbm [shape: f32[16,16], index: 0, kind: input, shape index: {}]   ;;  %s11212_s1 = inlined_call_operand.hbm [shape: f32[664,128], index: 1, kind: input, shape index: {}]   ;;  %s11213_s2 = inlined_call_operand.hbm [shape: f32[16,16], index: 2, kind: output, shape index: {0}]   ;;  %s11214_s3 = inlined_call_operand.vmem [shape: f32[16,8], index: 3, kind: output, shape index: {1}]  }
   0x1   :  { %10 = vsyncpa [#allocation7], 0 }
   0x2   :  { %11 = vsyncpa [#allocation5], 0  ;;  %s9708_s12 = smov [#allocation3]  }
   0x3   :  { %s17_s13 = sshll.u32 %s9708_s12, 4  ;;  %s18_s13 = int_to_ptr.vmem [resolvable:$true] %s17_s13 }
   0x4   :  { %s9650_s14 = scalar_lea.vmem %s18_s13, 256  ;;  %p9655_p1 = scmp.lt.s32.totalorder %s18_s13, %s18_s13 }
   0x5   :  { %p9651_p0 = scmp.ne.s32.totalorder %s18_s13, %s9650_s14  ;;  %p9656_p2 = scmp.lt.s32.totalorder %s9650_s14, %s9650_s14 }
   0x7   :  { %p9657_p3 = por %p9656_p2, %p9655_p1 }
   0x9   :  { %p9658_p4 = pnand %p9657_p3, %p9651_p0 }
   0xb   :  { %9661 = shalt.err (!%p9658_p4)
}
   0xc   :  { %s9709_s15 = smov 128   ;;  %s9710_s16 = smov 8  }
   0xd   :  { %23 = dma.hbm_to_vmem [thread:$0]  %s11211_s0, 256, %s18_s13, [#allocation4], %s9709_s15, %s9709_s15, %s9710_s16  }
   0xe   :  { %s9711_s19 = smov [#allocation6]  }
   0xf   :  { %s29_s20 = sshll.u32 %s9711_s19, 4  ;;  %s30_s20 = int_to_ptr.vmem [resolvable:$true] %s29_s20 }
  0x10   :  { %s9670_s21 = scalar_lea.vmem %s30_s20, 10624  ;;  %p9675_p6 = scmp.lt.s32.totalorder %s30_s20, %s30_s20 }
  0x11   :  { %p9671_p5 = scmp.ne.s32.totalorder %s30_s20, %s9670_s21  ;;  %p9676_p7 = scmp.lt.s32.totalorder %s9670_s21, %s9670_s21 }
  0x13   :  { %p9677_p8 = por %p9676_p7, %p9675_p6 }
  0x15   :  { %p9678_p9 = pnand %p9677_p8, %p9671_p5 }
  0x17   :  { %9681 = shalt.err (!%p9678_p9)
}
  0x18   :  { %35 = dma.hbm_to_vmem [thread:$0]  %s11212_s1, 10624, %s30_s20, [#allocation7], %s9709_s15, %s9709_s15, %s9710_s16  }
  0x19   :  { %9702 = dma.done.wait [#allocation4], 256  }
  0x1a   :  { %9703 = vsyncadd [#allocation4], 4294967040 }
  0x1b   :  { %9704 = dma.done.wait [#allocation7], 10624  }
  0x1c   :  { %9705 = vsyncadd [#allocation7], 4294956672  ;;  %v9712_v0 = vmov 0.0   ;;  %vm9713_vm0 = vmmov 0   ;;  %v43_v1 = vld [vmem:[#allocation6 + $0x8] sm:$0xff]  ;;  %v42_v3 = vld [vmem:[#allocation6] sm:$0xff]  ;;  %v127_v9 = vlaneseq }
  0x1d   :  { %8582 = vmatprep.subr.mxu1 %v9712_v0  ;;  %8590 = vmatprep.mubr.msk.f32.mxu1 %vm9713_vm0, %v9712_v0  ;;  %v9756_v2 = vld [vmem:[#allocation6 + $0x28] sm:$0xff]  ;;  %v9759_v4 = vld [vmem:[#allocation6 + $0x20] sm:$0xff]  ;;  %v125_v5 = vld [vmem:[#allocation3] sm:$0xff]  ;;  %vm138_vm1 = vcmask 130048   ;;  %v9714_v16 = vmov 0.5   ;;  %s9715_s0 = smov 64  }
  0x1e   :  { %8575 = vmatprep.subr.mxu0 %v43_v1  ;;  %8583 = vmatpush3.msra.mxu1 %v9756_v2  ;;  %v126_v6 = vld [vmem:[#allocation3 + $0x8] sm:$0xff]  ;;  %v9768_v8 = vld [vmem:[#allocation6 + $0x10] sm:$0xff]  ;;  %v9788_v10 = vand.u32 127, %v127_v9  ;;  %s9716_s1 = smov 32   ;;  %v9816_v33 = vld [vmem:[#allocation6 + $0x68] sm:$0xff]  ;;  %vm228_vm5 = vcmask 261120  }
  0x1f   :  { %8576 = vmatpush3.msra.mxu0 %v43_v1  ;;  %8584 = vmatprep.subr.mxu1 %v9712_v0  ;;  %v9763_v7 = vld [vmem:[#allocation6 + $0x18] sm:$0xff]  ;;  %v8088_v11 = vld [vmem:[#allocation6 + $0x30] ss:$0 sm:$0xff]  ;;  %v9820_v34 = vld [vmem:[#allocation6 + $0x60] sm:$0xff]  ;;  %vm1026_vm6 = vcmask 254976   ;;  %vm3835_vm7 = vcmask 523264  }
  0x20   :  { %8577 = vmatprep.subr.mxu0 %v42_v3  ;;  %8585 = vmatpush3.msra.mxu1 %v9759_v4  ;;  %vm129_vm2 = vcmp.ge.s32.totalorder %v9788_v10, 64  ;;  %vm130_vm3 = vcmp.lt.s32.totalorder %v9788_v10, 96  ;;  %v9811_v31 = vld [vmem:[#allocation6 + $0x70] sm:$0xff]  ;;  %v9824_v35 = vld [vmem:[#allocation6 + $0x58] sm:$0xff]  ;;  %v9843_v40 = vld [vmem:[#allocation6 + $0x48] sm:$0xff]  ;;  %vm4099_vm8 = vcmask 64512  }
  0x21   :  { %8578 = vmatpush3.msra.mxu0 %v42_v3  ;;  %8579 = vmatprep.mubr.msk.f32.mxu0 %vm138_vm1, %v125_v5  ;;  %vm131_vm4 = vmand %vm129_vm2, %vm130_vm3  ;;  %v9840_v38 = vld [vmem:[#allocation6 + $0x50] sm:$0xff]  ;;  %v9849_v41 = vld [vmem:[#allocation6 + $0x40] sm:$0xff]  ;;  %vm4458_vm9 = vcmp.ge.s32.totalorder %v9788_v10, 32  ;;  %vm4459_vm10 = vcmp.lt.s32.totalorder %v9788_v10, 48  ;;  %s9718_s28 = smov 16   ;;  %s9719_s29 = smov 80  }
  0x22   :  { %8586 = vmatprep.subr.mxu1 %v9712_v0  ;;  %8580 = vmatmul.mubr.msk.f32.vlgmr.msra.gmra.mxu0 %vm138_vm1, %v126_v6  ;;  %v9797_v17 = vsel %vm131_vm4, 1.0, %v9714_v16  ;;  %v9802_v23 = vsel %vm131_vm4, 0.0, %v9714_v16  ;;  %v9853_v42 = vld [vmem:[#allocation6 + $0x38] sm:$0xff]  ;;  %vm4460_vm11 = vmand %vm4458_vm9, %vm4459_vm10  ;;  %vm5352_vm12 = vcmask 123904   ;;  %s9720_s30 = smov [#allocation8]  }
  0x23   :  { %8587 = vmatpush3.msra.mxu1 %v9763_v7  ;;  %8593 = vmatprep.subr.mxu0 %v9712_v0  ;;  %v9870_v48 = vld [vmem:[#allocation6 + $0x78] ss:$0 sm:$0xff]  ;;  %v10632_v10 = vsel %vm4460_vm11, 0.0, %v9714_v16  ;;  %s8071_s4 = sshll.u32 %s9720_s30, 4  ;;  %s8072_s4 = int_to_ptr.vmem [resolvable:$true] %s8071_s4 }
  0x24   :  { %8588 = vmatprep.subr.mxu1 %v9712_v0  ;;  %8594 = vmatpush3.msra.mxu0 %v9756_v2  ;;  %s9682_s5 = scalar_lea.vmem %s8072_s4, 256  ;;  %p9687_p11 = scmp.lt.s32.totalorder %s8072_s4, %s8072_s4 }
  0x25   :  { %8589 = vmatpush3.msra.mxu1 %v9768_v8  ;;  %8595 = vmatprep.subr.mxu0 %v9712_v0  ;;  %p9683_p10 = scmp.ne.s32.totalorder %s8072_s4, %s9682_s5  ;;  %p9688_p12 = scmp.lt.s32.totalorder %s9682_s5, %s9682_s5 }
  0x26   :  { %8591 = vmatmul.mubr.f32.vlgmr.msra.gmra.mxu1 %v9712_v0  ;;  %8596 = vmatpush3.msra.mxu0 %v9759_v4 }
  0x27   :  { %8597 = vmatprep.subr.mxu0 %v9712_v0  ;;  %8604 = vmatprep.subr.mxu1 %v9712_v0  ;;  %p9689_p13 = por %p9688_p12, %p9687_p11 }
  0x28   :  { %8598 = vmatpush3.msra.mxu0 %v9763_v7  ;;  %8601 = vmatprep.mubr.msk.f32.mxu0 %vm9713_vm0, %v9712_v0 }
  0x29   :  { %8599 = vmatprep.subr.mxu0 %v9712_v0  ;;  %8612 = vmatprep.mubr.msk.f32.mxu1 %vm9713_vm0, %v9712_v0  ;;  %p9690_p0 = pnand %p9689_p13, %p9683_p10 }
  0x2a   :  { %8600 = vmatpush3.msra.mxu0 %v9768_v8  ;;  %8605 = vmatpush3.msra.mxu1 %v9811_v31 }
  0x2b   :  { %8615 = vmatprep.subr.mxu0 %v9712_v0  ;;  %8606 = vmatprep.subr.mxu1 %v9712_v0 }
  0x2c   :  { %8607 = vmatpush3.msra.mxu1 %v9816_v33 }
  0x2d   :  { %8608 = vmatprep.subr.mxu1 %v9712_v0 }
  0x2e   :  { %8609 = vmatpush3.msra.mxu1 %v9820_v34 }
  0x2f   :  { %8610 = vmatprep.subr.mxu1 %v9712_v0 }
  0x30   :  { %8611 = vmatpush3.msra.mxu1 %v9824_v35 }
  0x31   :  { %8613 = vmatmul.mubr.f32.vlgmr.msra.gmra.mxu1 %v9712_v0  ;;  %8626 = vmatprep.subr.mxu1 %v9712_v0 }
  0x32   :  { %8627 = vmatpush3.msra.mxu1 %v9756_v2  ;;  %8634 = vmatprep.mubr.msk.f32.mxu1 %vm9713_vm0, %v9712_v0 }
  0x33   :  { %8628 = vmatprep.subr.mxu1 %v9712_v0 }
  0x34   :  { %8629 = vmatpush3.msra.mxu1 %v9759_v4 }
  0x35   :  { %8630 = vmatprep.subr.mxu1 %v9712_v0 }
  0x36   :  { %8631 = vmatpush3.msra.mxu1 %v9763_v7 }
  0x37   :  { %8632 = vmatprep.subr.mxu1 %v9712_v0 }
  0x38   :  { %8633 = vmatpush3.msra.mxu1 %v9768_v8 }
  0x39   :  { %8648 = vmatprep.subr.mxu1 %v9712_v0 }
  0xe2   :  { %v8581_v12 = vpop.f32.mrf.mxu0 }
  0xe3   :  { %v9792_v13 = vadd.f32 %v8581_v12, %v8088_v11 }
  0xe4   :  { %v211_v14 = vpop.f32.mrf.mxu0 }
  0xe5   :  { %v9794_v15 = vadd.f32 %v8088_v11, %v211_v14 }
  0xe6   :  { %v298_v18 = vpop.f32.mrf.mxu1 }
  0xe7   :  { %v302_v19 = vadd.f32 %v298_v18, %v9794_v15 }
  0xe8   :  { %v8592_v20 = vpop.f32.mrf.mxu1 }
  0xe9   :  { %v303_v21 = vmul.f32 %v302_v19, %v9797_v17 }
  0xeb   :  { %9416 = vtanh.f32 %v303_v21 }
  0xf1   :  { %v493_v43 = vpop.f32.mrf.mxu1 }
  0xf2   :  { %v494_v51 = vadd.f32 %v9870_v48, %v493_v43  ;;  %v9927_v43 = vld [vmem:[#allocation6 + $0x88] sm:$0xff] }
  0xf3   :  { %v8614_v44 = vpop.f32.mrf.mxu1 }
  0xf4   :  { %v9933_v44 = vld [vmem:[#allocation6 + $0x80] sm:$0xff] }
  0xf8   :  { %v9417_v22 = vpop.eup %9416 }
  0xf9   :  { %v305_v24 = vmul.f32 %v9417_v22, %v9797_v17 }
  0xfb   :  { %v306_v25 = vadd.f32 %v305_v24, %v9802_v23 }
  0xfd   :  { %309 = vrot.lane.b32.xlu0 %v306_v25, %s9715_s0  ;;  %v307_v28 = vmul.f32 0.0, %v306_v25 }
 0x16f   :  { %v310_v26 = vpop.permute.xlu0 %309 }
 0x170   :  { %v312_v27 = vmul.f32 %v310_v26, %v306_v25 }
 0x172   :  { %314 = vrot.lane.b32.xlu0 %v312_v27, %s9716_s1 }
 0x1e4   :  { %v315_v29 = vpop.permute.xlu0 %314 }
 0x1e5   :  { %v9808_v30 = vadd.f32 %v315_v29, %v307_v28  ;;  %v9900_v28 = vld [vmem:[#allocation6 + $0xb8] sm:$0xff] }
 0x1e7   :  { %9418 = vtanh.f32 %v9808_v30  ;;  %v408_v5 = vrot.slane %v9808_v30, 6  ;;  %v9905_v30 = vld [vmem:[#allocation6 + $0xb0] sm:$0xff] }
 0x1f4   :  { %v9419_v32 = vpop.eup %9418 }
 0x1f5   :  { %320 = vrot.lane.b32.xlu1 %v9419_v32, %s9715_s0  ;;  %v9911_v32 = vld [vmem:[#allocation6 + $0x98] sm:$0xff] }
 0x267   :  { %v321_v36 = vpop.permute.xlu1 %320 }
 0x268   :  { %v323_v37 = vmul.f32 %v321_v36, %v306_v25  ;;  %v9915_v36 = vld [vmem:[#allocation6 + $0xa8] sm:$0xff] }
 0x26a   :  { %325 = vrot.lane.b32.xlu1 %v323_v37, %s9716_s1  ;;  %v9919_v37 = vld [vmem:[#allocation6 + $0x90] sm:$0xff] }
 0x2dc   :  { %v326_v39 = vpop.permute.xlu1 %325 }
 0x2dd   :  { %8602 = vmatmul.mubr.msk.f32.vlgmr.msra.gmra.mxu0 %vm228_vm5, %v326_v39 }
 0x2de   :  { %8616 = vmatpush3.msra.mxu0 %v9840_v38  ;;  %8623 = vmatprep.mubr.msk.f32.mxu0 %vm9713_vm0, %v9712_v0 }
 0x2df   :  { %8617 = vmatprep.subr.mxu0 %v9712_v0 }
 0x2e0   :  { %8618 = vmatpush3.msra.mxu0 %v9843_v40 }
 0x2e1   :  { %8619 = vmatprep.subr.mxu0 %v9712_v0 }
 0x2e2   :  { %8620 = vmatpush3.msra.mxu0 %v9849_v41 }
 0x2e3   :  { %8621 = vmatprep.subr.mxu0 %v9712_v0 }
 0x2e4   :  { %8622 = vmatpush3.msra.mxu0 %v9853_v42 }
 0x2e5   :  { %8624 = vmatmul.mubr.msk.f32.vlgmr.msra.gmra.mxu0 %vm228_vm5, %v326_v39  ;;  %8637 = vmatprep.subr.mxu0 %v9712_v0  ;;  %v9923_v39 = vld [vmem:[#allocation6 + $0xa0] sm:$0xff] }
 0x2e6   :  { %8638 = vmatpush3.msra.mxu0 %v9811_v31  ;;  %8645 = vmatprep.mubr.msk.f32.mxu0 %vm9713_vm0, %v9712_v0 }
 0x2e7   :  { %8639 = vmatprep.subr.mxu0 %v9712_v0 }
 0x2e8   :  { %8640 = vmatpush3.msra.mxu0 %v9816_v33 }
 0x2e9   :  { %8641 = vmatprep.subr.mxu0 %v9712_v0 }
 0x2ea   :  { %8642 = vmatpush3.msra.mxu0 %v9820_v34 }
 0x2eb   :  { %8643 = vmatprep.subr.mxu0 %v9712_v0 }
 0x2ec   :  { %8644 = vmatpush3.msra.mxu0 %v9824_v35 }
 0x2ed   :  { %8659 = vmatprep.subr.mxu0 %v9712_v0 }
 0x39d   :  { %v395_v45 = vpop.f32.mrf.mxu0 }
 0x39e   :  { %v400_v46 = vrot.slane %v395_v45, 6 }
 0x39f   :  { %v8603_v47 = vpop.f32.mrf.mxu0 }
 0x3a0   :  { %v402_v49 = vadd.f32 %v400_v46, %v9794_v15 }
 0x3a2   :  { %v403_v50 = vmul.f32 %v402_v49, %v9797_v17 }
 0x3a4   :  { %9420 = vtanh.f32 %v403_v50 }
 0x3a5   :  { %v563_v52 = vpop.f32.mrf.mxu0 }
 0x3a6   :  { %v567_v53 = vadd.f32 %v563_v52, %v494_v51 }
 0x3a7   :  { %v8625_v54 = vpop.f32.mrf.mxu0 }
 0x3a8   :  { %v568_v55 = vmul.f32 %v567_v53, %v9797_v17 }
 0x3aa   :  { %9422 = vtanh.f32 %v568_v55 }
 0x3b1   :  { %v9421_v56 = vpop.eup %9420 }
 0x3b2   :  { %v405_v57 = vmul.f32 %v9421_v56, %v9797_v17 }
 0x3b4   :  { %v406_v58 = vadd.f32 %v405_v57, %v9802_v23 }
 0x3b6   :  { %412 = vrot.lane.b32.xlu0 %v406_v58, %s9715_s0  ;;  %v410_v6 = vmul.f32 %v408_v5, %v406_v58 }
 0x3b7   :  { %v9423_v59 = vpop.eup %9422 }
 0x3b8   :  { %v570_v60 = vmul.f32 %v9423_v59, %v9797_v17 }
 0x3ba   :  { %v571_v61 = vadd.f32 %v570_v60, %v9802_v23 }
 0x3bc   :  { %574 = vrot.lane.b32.xlu1 %v571_v61, %s9715_s0  ;;  %v572_v12 = vmul.f32 0.0, %v571_v61 }
 0x428   :  { %v413_v62 = vpop.permute.xlu0 %412 }
 0x429   :  { %v415_v63 = vmul.f32 %v413_v62, %v406_v58 }
 0x42b   :  { %417 = vrot.lane.b32.xlu0 %v415_v63, %s9716_s1 }
 0x42e   :  { %v575_v1 = vpop.permute.xlu1 %574 }
 0x42f   :  { %v577_v3 = vmul.f32 %v575_v1, %v571_v61 }
 0x431   :  { %579 = vrot.lane.b32.xlu1 %v577_v3, %s9716_s1 }
 0x49d   :  { %v418_v9 = vpop.permute.xlu0 %417 }
 0x49e   :  { %v9885_v11 = vadd.f32 %v418_v9, %v410_v6 }
 0x4a0   :  { %9424 = vtanh.f32 %v9885_v11 }
 0x4a3   :  { %v580_v14 = vpop.permute.xlu1 %579 }
 0x4a4   :  { %v9888_v18 = vadd.f32 %v580_v14, %v572_v12 }
 0x4a6   :  { %9426 = vtanh.f32 %v9888_v18 }
 0x4ad   :  { %v9425_v19 = vpop.eup %9424 }
 0x4ae   :  { %423 = vrot.lane.b32.xlu0 %v9425_v19, %s9715_s0 }
 0x4b3   :  { %v9427_v20 = vpop.eup %9426 }
 0x4b4   :  { %585 = vrot.lane.b32.xlu1 %v9427_v20, %s9715_s0 }
 0x520   :  { %v424_v21 = vpop.permute.xlu0 %423 }
 0x521   :  { %v426_v22 = vmul.f32 %v424_v21, %v406_v58  ;;  %v9970_v58 = vld [vmem:[#allocation6 + $0xc0] ss:$0 sm:$0xff] }
 0x523   :  { %v590_v24 = vrot.slane %v426_v22, 2 }
 0x525   :  { %591 = vrot.lane.b32.xlu0 %v590_v24, %s9716_s1 }
 0x526   :  { %v586_v25 = vpop.permute.xlu1 %585 }
 0x527   :  { %v588_v26 = vmul.f32 %v586_v25, %v571_v61 }
 0x529   :  { %694 = vrot.lane.b32.xlu1 %v588_v26, %s9716_s1 }
 0x597   :  { %v592_v27 = vpop.permute.xlu0 %591 }
 0x598   :  { %8635 = vmatmul.mubr.msk.f32.vlgmr.msra.gmra.mxu1 %vm228_vm5, %v592_v27 }
 0x599   :  { %8649 = vmatpush3.msra.mxu1 %v9840_v38  ;;  %8656 = vmatprep.mubr.msk.f32.mxu1 %vm9713_vm0, %v9712_v0 }
 0x59a   :  { %8650 = vmatprep.subr.mxu1 %v9712_v0 }
 0x59b   :  { %8651 = vmatpush3.msra.mxu1 %v9843_v40  ;;  %v695_v29 = vpop.permute.xlu1 %694 }
 0x59c   :  { %8646 = vmatmul.mubr.msk.f32.vlgmr.msra.gmra.mxu0 %vm228_vm5, %v695_v29  ;;  %8652 = vmatprep.subr.mxu1 %v9712_v0 }
 0x59d   :  { %8653 = vmatpush3.msra.mxu1 %v9849_v41  ;;  %8660 = vmatpush3.msra.mxu0 %v9900_v28 }
 0x59e   :  { %8654 = vmatprep.subr.mxu1 %v9712_v0  ;;  %8661 = vmatprep.subr.mxu0 %v9712_v0 }
 0x59f   :  { %8655 = vmatpush3.msra.mxu1 %v9853_v42  ;;  %8662 = vmatpush3.msra.mxu0 %v9905_v30 }
 0x5a0   :  { %8657 = vmatmul.mubr.msk.f32.vlgmr.msra.gmra.mxu1 %vm228_vm5, %v592_v27  ;;  %8670 = vmatprep.subr.mxu1 %v9712_v0 }
 0x5a1   :  { %8671 = vmatpush3.msra.mxu1 %v9911_v32  ;;  %8663 = vmatprep.subr.mxu0 %v9712_v0 }
 0x5a2   :  { %8672 = vmatprep.subr.mxu1 %v9712_v0  ;;  %8664 = vmatpush3.msra.mxu0 %v9915_v36 }
 0x5a3   :  { %8673 = vmatpush3.msra.mxu1 %v9919_v37  ;;  %8665 = vmatprep.subr.mxu0 %v9712_v0 }
 0x5a4   :  { %8674 = vmatprep.subr.mxu1 %v9712_v0  ;;  %8666 = vmatpush3.msra.mxu0 %v9923_v39 }
 0x5a5   :  { %8667 = vmatprep.mubr.msk.f32.mxu0 %vm9713_vm0, %v9712_v0  ;;  %8675 = vmatpush3.msra.mxu1 %v9927_v43 }
 0x5a6   :  { %8668 = vmatmul.mubr.f32.vlgmr.msra.gmra.mxu0 %v9712_v0  ;;  %8676 = vmatprep.subr.mxu1 %v9712_v0 }
 0x5a7   :  { %8677 = vmatpush3.msra.mxu1 %v9933_v44  ;;  %8678 = vmatprep.mubr.msk.f32.mxu1 %vm9713_vm0, %v9712_v0 }
 0x5a8   :  { %8679 = vmatmul.mubr.msk.f32.vlgmr.msra.gmra.mxu1 %vm228_vm5, %v695_v29  ;;  %8681 = vmatprep.subr.mxu0 %v9712_v0 }
 0x5a9   :  { %8682 = vmatpush3.msra.mxu0 %v9756_v2  ;;  %8692 = vmatprep.subr.mxu1 %v9712_v0 }
 0x5aa   :  { %8683 = vmatprep.subr.mxu0 %v9712_v0  ;;  %8693 = vmatpush3.msra.mxu1 %v9811_v31 }
 0x5ab   :  { %8684 = vmatpush3.msra.mxu0 %v9759_v4  ;;  %8694 = vmatprep.subr.mxu1 %v9712_v0 }
 0x5ac   :  { %8685 = vmatprep.subr.mxu0 %v9712_v0  ;;  %8695 = vmatpush3.msra.mxu1 %v9816_v33 }
 0x5ad   :  { %8686 = vmatpush3.msra.mxu0 %v9763_v7  ;;  %8689 = vmatprep.mubr.msk.f32.mxu0 %vm9713_vm0, %v9712_v0 }
 0x5ae   :  { %8687 = vmatprep.subr.mxu0 %v9712_v0  ;;  %8696 = vmatprep.subr.mxu1 %v9712_v0 }
 0x5af   :  { %8688 = vmatpush3.msra.mxu0 %v9768_v8  ;;  %8697 = vmatpush3.msra.mxu1 %v9820_v34 }
 0x5b0   :  { %8703 = vmatprep.subr.mxu0 %v9712_v0  ;;  %8698 = vmatprep.subr.mxu1 %v9712_v0 }
 0x5b1   :  { %8699 = vmatpush3.msra.mxu1 %v9824_v35  ;;  %8700 = vmatprep.mubr.msk.f32.mxu1 %vm9713_vm0, %v9712_v0 }
 0x5b2   :  { %8714 = vmatprep.subr.mxu1 %v9712_v0 }
 0x658   :  { %v661_v45 = vpop.f32.mrf.mxu1 }
 0x659   :  { %v666_v46 = vrot.slane %v661_v45, 4 }
 0x65a   :  { %v8636_v47 = vpop.f32.mrf.mxu1 }
 0x65b   :  { %v668_v49 = vadd.f32 %v666_v46, %v9794_v15  ;;  %v674_v46 = vrot.slane %v9885_v11, 6 }
 0x65c   :  { %v764_v50 = vpop.f32.mrf.mxu0 }
 0x65d   :  { %v669_v51 = vmul.f32 %v668_v49, %v9797_v17  ;;  %v765_v53 = vadd.f32 %v9870_v48, %v764_v50 }
 0x65e   :  { %v8647_v52 = vpop.f32.mrf.mxu0 }
 0x65f   :  { %9428 = vtanh.f32 %v669_v51 }
 0x660   :  { %v834_v54 = vpop.f32.mrf.mxu1 }
 0x661   :  { %v838_v55 = vadd.f32 %v834_v54, %v765_v53 }
 0x662   :  { %v8658_v56 = vpop.f32.mrf.mxu1 }
 0x663   :  { %v839_v57 = vmul.f32 %v838_v55, %v9797_v17 }
 0x665   :  { %9430 = vtanh.f32 %v839_v57 }
 0x666   :  { %v926_v59 = vpop.f32.mrf.mxu0 }
 0x667   :  { %v927_v60 = vadd.f32 %v9970_v58, %v926_v59 }
 0x668   :  { %v996_v61 = vpop.f32.mrf.mxu1  ;;  %v8669_v62 = vpop.f32.mrf.mxu0 }
 0x669   :  { %v1000_v63 = vadd.f32 %v996_v61, %v927_v60 }
 0x66a   :  { %v8680_v1 = vpop.f32.mrf.mxu1 }
 0x66b   :  { %v1001_v3 = vmul.f32 %v1000_v63, %v9797_v17 }
 0x66c   :  { %v9429_v5 = vpop.eup %9428 }
 0x66d   :  { %9432 = vtanh.f32 %v1001_v3  ;;  %v671_v6 = vmul.f32 %v9429_v5, %v9797_v17 }
 0x66f   :  { %v672_v9 = vadd.f32 %v671_v6, %v9802_v23 }
 0x671   :  { %678 = vrot.lane.b32.xlu0 %v672_v9, %s9715_s0  ;;  %v676_v47 = vmul.f32 %v674_v46, %v672_v9 }
 0x672   :  { %v9431_v12 = vpop.eup %9430 }
 0x673   :  { %v841_v14 = vmul.f32 %v9431_v12, %v9797_v17 }
 0x675   :  { %v842_v19 = vadd.f32 %v841_v14, %v9802_v23 }
 0x677   :  { %845 = vrot.lane.b32.xlu1 %v842_v19, %s9715_s0  ;;  %v843_v51 = vmul.f32 %v842_v19, %v9888_v18 }
 0x67a   :  { %v9433_v20 = vpop.eup %9432 }
 0x67b   :  { %v1003_v21 = vmul.f32 %v9433_v20, %v9797_v17 }
 0x67d   :  { %v1004_v22 = vadd.f32 %v1003_v21, %v9802_v23 }
 0x67f   :  { %1007 = vrot.lane.b32.xlu0 %v1004_v22, %s9715_s0  ;;  %v1005_v54 = vmul.f32 0.0, %v1004_v22 }
 0x6e3   :  { %v679_v24 = vpop.permute.xlu0 %678 }
 0x6e4   :  { %v681_v25 = vmul.f32 %v679_v24, %v672_v9 }
 0x6e6   :  { %683 = vrot.lane.b32.xlu1 %v681_v25, %s9716_s1 }
 0x6e9   :  { %v846_v26 = vpop.permute.xlu1 %845 }
 0x6ea   :  { %v848_v27 = vmul.f32 %v846_v26, %v842_v19 }
 0x6ec   :  { %850 = vrot.lane.b32.xlu0 %v848_v27, %s9716_s1 }
 0x6f1   :  { %v1008_v29 = vpop.permute.xlu0 %1007 }
 0x6f2   :  { %v1010_v45 = vmul.f32 %v1008_v29, %v1004_v22 }
 0x6f4   :  { %1012 = vrot.lane.b32.xlu1 %v1010_v45, %s9716_s1 }
 0x758   :  { %v684_v49 = vpop.permute.xlu1 %683 }
 0x759   :  { %v9987_v50 = vadd.f32 %v684_v49, %v676_v47 }
 0x75b   :  { %9434 = vtanh.f32 %v9987_v50 }
 0x75e   :  { %v851_v52 = vpop.permute.xlu0 %850 }
 0x75f   :  { %v9991_v53 = vadd.f32 %v851_v52, %v843_v51 }
 0x761   :  { %9436 = vtanh.f32 %v9991_v53 }
 0x766   :  { %v1013_v55 = vpop.permute.xlu1 %1012 }
 0x767   :  { %v9994_v56 = vadd.f32 %v1013_v55, %v1005_v54 }
 0x768   :  { %v9435_v57 = vpop.eup %9434 }
 0x769   :  { %9438 = vtanh.f32 %v9994_v56  ;;  %689 = vrot.lane.b32.xlu0 %v9435_v57, %s9715_s0 }
 0x76e   :  { %v9437_v11 = vpop.eup %9436 }
 0x76f   :  { %856 = vrot.lane.b32.xlu1 %v9437_v11, %s9715_s0 }
 0x776   :  { %v9439_v59 = vpop.eup %9438 }
 0x777   :  { %1018 = vrot.lane.b32.xlu0 %v9439_v59, %s9715_s0 }
 0x7db   :  { %v690_v18 = vpop.permute.xlu0 %689 }
 0x7dc   :  { %v692_v60 = vmul.f32 %v690_v18, %v672_v9 }
 0x7de   :  { %v1029_v61 = vrot.slane %v692_v60, 4 }
 0x7e0   :  { %1030 = vrot.lane.b32.xlu1 %v1029_v61, %s9716_s1 }
 0x7e1   :  { %v857_v62 = vpop.permute.xlu1 %856 }
 0x7e2   :  { %v859_v63 = vmul.f32 %v857_v62, %v842_v19 }
 0x7e4   :  { %1133 = vrot.lane.b32.xlu0 %v859_v63, %s9716_s1 }
 0x7e9   :  { %v1019_v1 = vpop.permute.xlu0 %1018 }
 0x7ea   :  { %v1021_v3 = vmul.f32 %v1019_v1, %v1004_v22 }
 0x7ec   :  { %1023 = vrot.lane.b32.xlu1 %v1021_v3, %s9716_s1 }
 0x852   :  { %v1031_v5 = vpop.permute.xlu1 %1030 }
 0x853   :  { %8690 = vmatmul.mubr.msk.f32.vlgmr.msra.gmra.mxu0 %vm228_vm5, %v1031_v5 }
 0x854   :  { %8704 = vmatpush3.msra.mxu0 %v9840_v38  ;;  %8711 = vmatprep.mubr.msk.f32.mxu0 %vm9713_vm0, %v9712_v0 }
 0x855   :  { %8705 = vmatprep.subr.mxu0 %v9712_v0 }
 0x856   :  { %8706 = vmatpush3.msra.mxu0 %v9843_v40  ;;  %v1134_v6 = vpop.permute.xlu0 %1133 }
 0x857   :  { %8701 = vmatmul.mubr.msk.f32.vlgmr.msra.gmra.mxu1 %vm228_vm5, %v1134_v6  ;;  %8707 = vmatprep.subr.mxu0 %v9712_v0 }
 0x858   :  { %8708 = vmatpush3.msra.mxu0 %v9849_v41  ;;  %8715 = vmatpush3.msra.mxu1 %v9900_v28 }
 0x859   :  { %8709 = vmatprep.subr.mxu0 %v9712_v0  ;;  %8716 = vmatprep.subr.mxu1 %v9712_v0 }
 0x85a   :  { %8710 = vmatpush3.msra.mxu0 %v9853_v42  ;;  %8717 = vmatpush3.msra.mxu1 %v9905_v30 }
 0x85b   :  { %8712 = vmatmul.mubr.msk.f32.vlgmr.msra.gmra.mxu0 %vm228_vm5, %v1031_v5  ;;  %8718 = vmatprep.subr.mxu1 %v9712_v0 }
 0x85c   :  { %8725 = vmatprep.subr.mxu0 %v9712_v0  ;;  %8719 = vmatpush3.msra.mxu1 %v9915_v36 }
 0x85d   :  { %8726 = vmatpush3.msra.mxu0 %v9911_v32  ;;  %8720 = vmatprep.subr.mxu1 %v9712_v0 }
 0x85e   :  { %8727 = vmatprep.subr.mxu0 %v9712_v0  ;;  %v1024_v9 = vpop.permute.xlu1 %1023  ;;  %8721 = vmatpush3.msra.mxu1 %v9923_v39 }
 0x85f   :  { %8728 = vmatpush3.msra.mxu0 %v9919_v37  ;;  %1027 = vst.msk [vmem:[#allocation2] sm:$0x3] %vm1026_vm6, %v1024_v9  ;;  %8722 = vmatprep.mubr.msk.f32.mxu1 %vm9713_vm0, %v9712_v0 }
 0x860   :  { %8723 = vmatmul.mubr.msk.f32.vlgmr.msra.gmra.mxu1 %vm228_vm5, %v1024_v9  ;;  %8729 = vmatprep.subr.mxu0 %v9712_v0 }
 0x861   :  { %8730 = vmatpush3.msra.mxu0 %v9927_v43  ;;  %8733 = vmatprep.mubr.msk.f32.mxu0 %vm9713_vm0, %v9712_v0 }
 0x862   :  { %8731 = vmatprep.subr.mxu0 %v9712_v0  ;;  %8736 = vmatprep.subr.mxu1 %v9712_v0 }
 0x863   :  { %8732 = vmatpush3.msra.mxu0 %v9933_v44  ;;  %8737 = vmatpush3.msra.mxu1 %v9756_v2 }
 0x864   :  { %8734 = vmatmul.mubr.msk.f32.vlgmr.msra.gmra.mxu0 %vm228_vm5, %v1134_v6  ;;  %8738 = vmatprep.subr.mxu1 %v9712_v0 }
 0x865   :  { %8739 = vmatpush3.msra.mxu1 %v9759_v4  ;;  %8747 = vmatprep.subr.mxu0 %v9712_v0 }
 0x866   :  { %8740 = vmatprep.subr.mxu1 %v9712_v0  ;;  %8748 = vmatpush3.msra.mxu0 %v9811_v31 }
 0x867   :  { %8741 = vmatpush3.msra.mxu1 %v9763_v7  ;;  %8749 = vmatprep.subr.mxu0 %v9712_v0 }
 0x868   :  { %8742 = vmatprep.subr.mxu1 %v9712_v0  ;;  %8750 = vmatpush3.msra.mxu0 %v9816_v33 }
 0x869   :  { %8743 = vmatpush3.msra.mxu1 %v9768_v8  ;;  %8744 = vmatprep.mubr.msk.f32.mxu1 %vm9713_vm0, %v9712_v0 }
 0x86a   :  { %8751 = vmatprep.subr.mxu0 %v9712_v0  ;;  %8758 = vmatprep.subr.mxu1 %v9712_v0 }
 0x86b   :  { %8752 = vmatpush3.msra.mxu0 %v9820_v34  ;;  %8755 = vmatprep.mubr.msk.f32.mxu0 %vm9713_vm0, %v9712_v0 }
 0x86c   :  { %8753 = vmatprep.subr.mxu0 %v9712_v0 }
 0x86d   :  { %8754 = vmatpush3.msra.mxu0 %v9824_v35 }
 0x86e   :  { %8769 = vmatprep.subr.mxu0 %v9712_v0 }
 0x913   :  { %v1100_v12 = vpop.f32.mrf.mxu0 }
 0x914   :  { %v1105_v14 = vrot.slane %v1100_v12, 2 }
 0x915   :  { %v8691_v19 = vpop.f32.mrf.mxu0 }
 0x916   :  { %v1107_v20 = vadd.f32 %v1105_v14, %v9794_v15  ;;  %v1113_v14 = vrot.slane %v9987_v50, 6 }
 0x917   :  { %v1203_v21 = vpop.f32.mrf.mxu1 }
 0x918   :  { %v1108_v22 = vmul.f32 %v1107_v20, %v9797_v17  ;;  %v1204_v25 = vadd.f32 %v9870_v48, %v1203_v21 }
 0x919   :  { %v8702_v24 = vpop.f32.mrf.mxu1 }
 0x91a   :  { %9440 = vtanh.f32 %v1108_v22 }
 0x91b   :  { %v1273_v26 = vpop.f32.mrf.mxu0 }
 0x91c   :  { %v1277_v27 = vadd.f32 %v1273_v26, %v1204_v25 }
 0x91d   :  { %v8713_v29 = vpop.f32.mrf.mxu0 }
 0x91e   :  { %v1278_v45 = vmul.f32 %v1277_v27, %v9797_v17 }
 0x920   :  { %9442 = vtanh.f32 %v1278_v45  ;;  %v1367_v46 = vpop.f32.mrf.mxu1 }
 0x921   :  { %v1368_v49 = vadd.f32 %v9970_v58, %v1367_v46 }
 0x922   :  { %v8724_v47 = vpop.f32.mrf.mxu1 }
 0x924   :  { %v1437_v51 = vpop.f32.mrf.mxu0 }
 0x925   :  { %v1441_v52 = vadd.f32 %v1437_v51, %v1368_v49 }
 0x926   :  { %v8735_v15 = vpop.f32.mrf.mxu0 }
 0x927   :  { %v9441_v54 = vpop.eup %9440  ;;  %v1442_v55 = vmul.f32 %v1441_v52, %v9797_v17 }
 0x928   :  { %v1110_v57 = vmul.f32 %v9441_v54, %v9797_v17 }
 0x929   :  { %9444 = vtanh.f32 %v1442_v55 }
 0x92a   :  { %v1111_v11 = vadd.f32 %v1110_v57, %v9802_v23 }
 0x92c   :  { %1117 = vrot.lane.b32.xlu0 %v1111_v11, %s9715_s0  ;;  %v1115_v19 = vmul.f32 %v1113_v14, %v1111_v11 }
 0x92d   :  { %v9443_v59 = vpop.eup %9442 }
 0x92e   :  { %v1280_v18 = vmul.f32 %v9443_v59, %v9797_v17 }
 0x930   :  { %v1281_v60 = vadd.f32 %v1280_v18, %v9802_v23 }
 0x932   :  { %1284 = vrot.lane.b32.xlu1 %v1281_v60, %s9715_s0  ;;  %v1282_v22 = vmul.f32 %v1281_v60, %v9991_v53 }
 0x936   :  { %v9445_v61 = vpop.eup %9444 }
 0x937   :  { %v1444_v62 = vmul.f32 %v9445_v61, %v9797_v17 }
 0x939   :  { %v1445_v63 = vadd.f32 %v1444_v62, %v9802_v23 }
 0x93b   :  { %1448 = vrot.lane.b32.xlu0 %v1445_v63, %s9715_s0  ;;  %v1446_v26 = vmul.f32 %v1445_v63, %v9994_v56 }
 0x99e   :  { %v1118_v1 = vpop.permute.xlu0 %1117 }
 0x99f   :  { %v1120_v3 = vmul.f32 %v1118_v1, %v1111_v11 }
 0x9a1   :  { %1122 = vrot.lane.b32.xlu1 %v1120_v3, %s9716_s1 }
 0x9a4   :  { %v1285_v5 = vpop.permute.xlu1 %1284 }
 0x9a5   :  { %v1287_v6 = vmul.f32 %v1285_v5, %v1281_v60 }
 0x9a7   :  { %1289 = vrot.lane.b32.xlu0 %v1287_v6, %s9716_s1 }
 0x9ad   :  { %v1449_v9 = vpop.permute.xlu0 %1448 }
 0x9ae   :  { %v1451_v12 = vmul.f32 %v1449_v9, %v1445_v63 }
 0x9b0   :  { %1453 = vrot.lane.b32.xlu1 %v1451_v12, %s9716_s1 }
 0xa13   :  { %v1123_v20 = vpop.permute.xlu1 %1122 }
 0xa14   :  { %v10078_v21 = vadd.f32 %v1123_v20, %v1115_v19 }
 0xa16   :  { %9446 = vtanh.f32 %v10078_v21 }
 0xa19   :  { %v1290_v24 = vpop.permute.xlu0 %1289 }
 0xa1a   :  { %v10082_v25 = vadd.f32 %v1290_v24, %v1282_v22 }
 0xa1c   :  { %9448 = vtanh.f32 %v10082_v25 }
 0xa22   :  { %v1454_v27 = vpop.permute.xlu1 %1453 }
 0xa23   :  { %v9447_v29 = vpop.eup %9446  ;;  %v10086_v45 = vadd.f32 %v1454_v27, %v1446_v26 }
 0xa24   :  { %1128 = vrot.lane.b32.xlu0 %v9447_v29, %s9715_s0 }
 0xa25   :  { %9450 = vtanh.f32 %v10086_v45 }
 0xa29   :  { %v9449_v50 = vpop.eup %9448 }
 0xa2a   :  { %1295 = vrot.lane.b32.xlu1 %v9449_v50, %s9715_s0 }
 0xa32   :  { %v9451_v46 = vpop.eup %9450 }
 0xa33   :  { %1459 = vrot.lane.b32.xlu0 %v9451_v46, %s9715_s0 }
 0xa96   :  { %v1129_v53 = vpop.permute.xlu0 %1128 }
 0xa97   :  { %v1131_v47 = vmul.f32 %v1129_v53, %v1111_v11 }
 0xa99   :  { %v1469_v49 = vrot.slane %v1131_v47, 6 }
 0xa9b   :  { %1470 = vrot.lane.b32.xlu1 %v1469_v49, %s9716_s1  ;;  %v1550_v49 = vrot.slane %v10078_v21, 6 }
 0xa9c   :  { %v1296_v56 = vpop.permute.xlu1 %1295 }
 0xa9d   :  { %v1298_v51 = vmul.f32 %v1296_v56, %v1281_v60 }
 0xa9f   :  { %1570 = vrot.lane.b32.xlu0 %v1298_v51, %s9716_s1 }
 0xaa5   :  { %v1460_v52 = vpop.permute.xlu0 %1459 }
 0xaa6   :  { %v1462_v15 = vmul.f32 %v1460_v52, %v1445_v63 }
 0xaa8   :  { %1464 = vrot.lane.b32.xlu1 %v1462_v15, %s9716_s1 }
 0xb0d   :  { %v1471_v54 = vpop.permute.xlu1 %1470 }
 0xb0e   :  { %8745 = vmatmul.mubr.msk.f32.vlgmr.msra.gmra.mxu1 %vm228_vm5, %v1471_v54 }
 0xb0f   :  { %8759 = vmatpush3.msra.mxu1 %v9840_v38  ;;  %8766 = vmatprep.mubr.msk.f32.mxu1 %vm9713_vm0, %v9712_v0 }
 0xb10   :  { %8760 = vmatprep.subr.mxu1 %v9712_v0 }
 0xb11   :  { %8761 = vmatpush3.msra.mxu1 %v9843_v40  ;;  %v1571_v55 = vpop.permute.xlu0 %1570 }
 0xb12   :  { %8756 = vmatmul.mubr.msk.f32.vlgmr.msra.gmra.mxu0 %vm228_vm5, %v1571_v55  ;;  %8762 = vmatprep.subr.mxu1 %v9712_v0 }
 0xb13   :  { %8763 = vmatpush3.msra.mxu1 %v9849_v41  ;;  %8770 = vmatpush3.msra.mxu0 %v9900_v28 }
 0xb14   :  { %8764 = vmatprep.subr.mxu1 %v9712_v0  ;;  %8771 = vmatprep.subr.mxu0 %v9712_v0 }
 0xb15   :  { %8765 = vmatpush3.msra.mxu1 %v9853_v42  ;;  %8772 = vmatpush3.msra.mxu0 %v9905_v30 }
 0xb16   :  { %8767 = vmatmul.mubr.msk.f32.vlgmr.msra.gmra.mxu1 %vm228_vm5, %v1471_v54  ;;  %8773 = vmatprep.subr.mxu0 %v9712_v0 }
 0xb17   :  { %8780 = vmatprep.subr.mxu1 %v9712_v0  ;;  %8774 = vmatpush3.msra.mxu0 %v9915_v36 }
 0xb18   :  { %8781 = vmatpush3.msra.mxu1 %v9911_v32  ;;  %8775 = vmatprep.subr.mxu0 %v9712_v0 }
 0xb19   :  { %8782 = vmatprep.subr.mxu1 %v9712_v0  ;;  %8776 = vmatpush3.msra.mxu0 %v9923_v39 }
 0xb1a   :  { %8783 = vmatpush3.msra.mxu1 %v9919_v37  ;;  %v1465_v57 = vpop.permute.xlu1 %1464  ;;  %8777 = vmatprep.mubr.msk.f32.mxu0 %vm9713_vm0, %v9712_v0 }
 0xb1b   :  { %1467 = vst.msk [vmem:[#allocation2 + $0x2] sm:$0x3] %vm1026_vm6, %v1465_v57  ;;  %8778 = vmatmul.mubr.msk.f32.vlgmr.msra.gmra.mxu0 %vm228_vm5, %v1465_v57  ;;  %8784 = vmatprep.subr.mxu1 %v9712_v0 }
 0xb1c   :  { %8785 = vmatpush3.msra.mxu1 %v9927_v43  ;;  %8788 = vmatprep.mubr.msk.f32.mxu1 %vm9713_vm0, %v9712_v0 }
 0xb1d   :  { %8786 = vmatprep.subr.mxu1 %v9712_v0  ;;  %8791 = vmatprep.subr.mxu0 %v9712_v0 }
 0xb1e   :  { %8787 = vmatpush3.msra.mxu1 %v9933_v44  ;;  %8792 = vmatpush3.msra.mxu0 %v9756_v2 }
 0xb1f   :  { %8789 = vmatmul.mubr.msk.f32.vlgmr.msra.gmra.mxu1 %vm228_vm5, %v1571_v55  ;;  %8793 = vmatprep.subr.mxu0 %v9712_v0 }
 0xb20   :  { %8794 = vmatpush3.msra.mxu0 %v9759_v4  ;;  %8799 = vmatprep.mubr.msk.f32.mxu0 %vm9713_vm0, %v9712_v0 }
 0xb21   :  { %8795 = vmatprep.subr.mxu0 %v9712_v0  ;;  %8802 = vmatprep.subr.mxu1 %v9712_v0 }
 0xb22   :  { %8796 = vmatpush3.msra.mxu0 %v9763_v7  ;;  %8803 = vmatpush3.msra.mxu1 %v9811_v31 }
 0xb23   :  { %8797 = vmatprep.subr.mxu0 %v9712_v0  ;;  %8804 = vmatprep.subr.mxu1 %v9712_v0 }
 0xb24   :  { %8798 = vmatpush3.msra.mxu0 %v9768_v8  ;;  %8805 = vmatpush3.msra.mxu1 %v9816_v33 }
 0xb25   :  { %8813 = vmatprep.subr.mxu0 %v9712_v0  ;;  %8806 = vmatprep.subr.mxu1 %v9712_v0 }
 0xb26   :  { %8807 = vmatpush3.msra.mxu1 %v9820_v34  ;;  %8810 = vmatprep.mubr.msk.f32.mxu1 %vm9713_vm0, %v9712_v0 }
 0xb27   :  { %8808 = vmatprep.subr.mxu1 %v9712_v0 }
 0xb28   :  { %8809 = vmatpush3.msra.mxu1 %v9824_v35 }
 0xb29   :  { %8824 = vmatprep.subr.mxu1 %v9712_v0 }
 0xbce   :  { %v1540_v2 = vpop.f32.mrf.mxu1 }
 0xbcf   :  { %v1544_v4 = vadd.f32 %v1540_v2, %v9792_v13 }
 0xbd0   :  { %v8746_v7 = vpop.f32.mrf.mxu1 }
 0xbd1   :  { %v1545_v8 = vmul.f32 %v1544_v4, %v9797_v17 }
 0xbd2   :  { %v1640_v31 = vpop.f32.mrf.mxu0 }
 0xbd3   :  { %9452 = vtanh.f32 %v1545_v8  ;;  %v1641_v34 = vadd.f32 %v9870_v48, %v1640_v31 }
 0xbd4   :  { %v8757_v33 = vpop.f32.mrf.mxu0 }
 0xbd6   :  { %v1710_v11 = vpop.f32.mrf.mxu1 }
 0xbd7   :  { %v1714_v59 = vadd.f32 %v1710_v11, %v1641_v34 }
 0xbd8   :  { %v8768_v18 = vpop.f32.mrf.mxu1 }
 0xbd9   :  { %v1715_v60 = vmul.f32 %v1714_v59, %v9797_v17 }
 0xbdb   :  { %9454 = vtanh.f32 %v1715_v60  ;;  %v1804_v35 = vpop.f32.mrf.mxu0  ;;  %v10253_v60 = vld [vmem:[#allocation6 + $0x58] sm:$0xff] }
 0xbdc   :  { %v1805_v62 = vadd.f32 %v9970_v58, %v1804_v35 }
 0xbdd   :  { %v8779_v61 = vpop.f32.mrf.mxu0 }
 0xbdf   :  { %v1874_v63 = vpop.f32.mrf.mxu1 }
 0xbe0   :  { %v9453_v1 = vpop.eup %9452  ;;  %v1878_v3 = vadd.f32 %v1874_v63, %v1805_v62 }
 0xbe1   :  { %v8790_v5 = vpop.f32.mrf.mxu1  ;;  %v1547_v6 = vmul.f32 %v9453_v1, %v9797_v17 }
 0xbe2   :  { %v1879_v9 = vmul.f32 %v1878_v3, %v9797_v17 }
 0xbe3   :  { %v1548_v12 = vadd.f32 %v1547_v6, %v9802_v23 }
 0xbe4   :  { %9456 = vtanh.f32 %v1879_v9 }
 0xbe5   :  { %1554 = vrot.lane.b32.xlu0 %v1548_v12, %s9715_s0  ;;  %v1552_v56 = vmul.f32 %v1550_v49, %v1548_v12 }
 0xbe8   :  { %v9455_v14 = vpop.eup %9454 }
 0xbe9   :  { %v1717_v19 = vmul.f32 %v9455_v14, %v9797_v17 }
 0xbeb   :  { %v1718_v20 = vadd.f32 %v1717_v19, %v9802_v23 }
 0xbed   :  { %1721 = vrot.lane.b32.xlu1 %v1718_v20, %s9715_s0  ;;  %v1719_v15 = vmul.f32 %v1718_v20, %v10082_v25 }
 0xbf1   :  { %v9457_v22 = vpop.eup %9456 }
 0xbf2   :  { %v1881_v24 = vmul.f32 %v9457_v22, %v9797_v17 }
 0xbf4   :  { %v1882_v26 = vadd.f32 %v1881_v24, %v9802_v23 }
 0xbf6   :  { %1885 = vrot.lane.b32.xlu0 %v1882_v26, %s9715_s0  ;;  %v1883_v2 = vmul.f32 %v1882_v26, %v10086_v45 }
 0xc57   :  { %v1555_v27 = vpop.permute.xlu0 %1554 }
 0xc58   :  { %v1557_v29 = vmul.f32 %v1555_v27, %v1548_v12 }
 0xc5a   :  { %1559 = vrot.lane.b32.xlu1 %v1557_v29, %s9716_s1 }
 0xc5f   :  { %v1722_v50 = vpop.permute.xlu1 %1721 }
 0xc60   :  { %v1724_v46 = vmul.f32 %v1722_v50, %v1718_v20 }
 0xc62   :  { %1726 = vrot.lane.b32.xlu0 %v1724_v46, %s9716_s1 }
 0xc68   :  { %v1886_v53 = vpop.permute.xlu0 %1885 }
 0xc69   :  { %v1888_v47 = vmul.f32 %v1886_v53, %v1882_v26 }
 0xc6b   :  { %1890 = vrot.lane.b32.xlu1 %v1888_v47, %s9716_s1 }
 0xccc   :  { %v1560_v51 = vpop.permute.xlu1 %1559 }
 0xccd   :  { %v10170_v52 = vadd.f32 %v1560_v51, %v1552_v56 }
 0xccf   :  { %9458 = vtanh.f32 %v10170_v52 }
 0xcd4   :  { %v1727_v54 = vpop.permute.xlu0 %1726 }
 0xcd5   :  { %v10174_v55 = vadd.f32 %v1727_v54, %v1719_v15 }
 0xcd7   :  { %9460 = vtanh.f32 %v10174_v55 }
 0xcdc   :  { %v9459_v57 = vpop.eup %9458 }
 0xcdd   :  { %v1891_v4 = vpop.permute.xlu1 %1890  ;;  %1565 = vrot.lane.b32.xlu0 %v9459_v57, %s9715_s0 }
 0xcde   :  { %v10179_v21 = vadd.f32 %v1891_v4, %v1883_v2 }
 0xce0   :  { %9462 = vtanh.f32 %v10179_v21 }
 0xce4   :  { %v9461_v7 = vpop.eup %9460 }
 0xce5   :  { %1732 = vrot.lane.b32.xlu1 %v9461_v7, %s9715_s0 }
 0xced   :  { %v9463_v8 = vpop.eup %9462 }
 0xcee   :  { %1896 = vrot.lane.b32.xlu0 %v9463_v8, %s9715_s0 }
 0xd4f   :  { %v1566_v25 = vpop.permute.xlu0 %1565 }
 0xd50   :  { %v1568_v31 = vmul.f32 %v1566_v25, %v1548_v12 }
 0xd52   :  { %1906 = vrot.lane.b32.xlu1 %v1568_v31, %s9716_s1  ;;  %v1989_v31 = vrot.slane %v10170_v52, 6 }
 0xd57   :  { %v1733_v33 = vpop.permute.xlu1 %1732 }
 0xd58   :  { %v1735_v34 = vmul.f32 %v1733_v33, %v1718_v20 }
 0xd5a   :  { %2009 = vrot.lane.b32.xlu0 %v1735_v34, %s9716_s1 }
 0xd60   :  { %v1897_v45 = vpop.permute.xlu0 %1896 }
 0xd61   :  { %v1899_v11 = vmul.f32 %v1897_v45, %v1882_v26 }
 0xd63   :  { %1901 = vrot.lane.b32.xlu1 %v1899_v11, %s9716_s1 }
 0xdc4   :  { %v1907_v59 = vpop.permute.xlu1 %1906 }
 0xdc5   :  { %8800 = vmatmul.mubr.msk.f32.vlgmr.msra.gmra.mxu0 %vm228_vm5, %v1907_v59 }
 0xdc6   :  { %8814 = vmatpush3.msra.mxu0 %v9840_v38  ;;  %8821 = vmatprep.mubr.msk.f32.mxu0 %vm9713_vm0, %v9712_v0 }
 0xdc7   :  { %8815 = vmatprep.subr.mxu0 %v9712_v0 }
 0xdc8   :  { %8816 = vmatpush3.msra.mxu0 %v9843_v40  ;;  %v10222_v40 = vld [vmem:[#allocation6 + $0x28] sm:$0xff] }
 0xdc9   :  { %8817 = vmatprep.subr.mxu0 %v9712_v0 }
 0xdca   :  { %8818 = vmatpush3.msra.mxu0 %v9849_v41  ;;  %v10227_v41 = vld [vmem:[#allocation6 + $0x70] sm:$0xff] }
 0xdcb   :  { %8819 = vmatprep.subr.mxu0 %v9712_v0 }
 0xdcc   :  { %8820 = vmatpush3.msra.mxu0 %v9853_v42  ;;  %v2010_v18 = vpop.permute.xlu0 %2009  ;;  %v10230_v42 = vld [vmem:[#allocation6 + $0x20] sm:$0xff] }
 0xdcd   :  { %8811 = vmatmul.mubr.msk.f32.vlgmr.msra.gmra.mxu1 %vm228_vm5, %v2010_v18  ;;  %8822 = vmatmul.mubr.msk.f32.vlgmr.msra.gmra.mxu0 %vm228_vm5, %v1907_v59 }
 0xdce   :  { %8835 = vmatprep.subr.mxu0 %v9712_v0  ;;  %8825 = vmatpush3.msra.mxu1 %v9900_v28  ;;  %v10237_v28 = vld [vmem:[#allocation6 + $0x18] sm:$0xff] }
 0xdcf   :  { %8836 = vmatpush3.msra.mxu0 %v9911_v32  ;;  %8826 = vmatprep.subr.mxu1 %v9712_v0  ;;  %v10245_v32 = vld [vmem:[#allocation6 + $0x10] sm:$0xff] }
 0xdd0   :  { %8837 = vmatprep.subr.mxu0 %v9712_v0  ;;  %8827 = vmatpush3.msra.mxu1 %v9905_v30  ;;  %v10240_v30 = vld [vmem:[#allocation6 + $0x68] sm:$0xff] }
 0xdd1   :  { %8838 = vmatpush3.msra.mxu0 %v9919_v37  ;;  %8828 = vmatprep.subr.mxu1 %v9712_v0 }
 0xdd2   :  { %8839 = vmatprep.subr.mxu0 %v9712_v0  ;;  %8829 = vmatpush3.msra.mxu1 %v9915_v36  ;;  %v10248_v36 = vld [vmem:[#allocation6 + $0x60] sm:$0xff] }
 0xdd3   :  { %8840 = vmatpush3.msra.mxu0 %v9927_v43  ;;  %8830 = vmatprep.subr.mxu1 %v9712_v0 }
 0xdd4   :  { %8841 = vmatprep.subr.mxu0 %v9712_v0  ;;  %8843 = vmatprep.mubr.msk.f32.mxu0 %vm9713_vm0, %v9712_v0 }
 0xdd5   :  { %8842 = vmatpush3.msra.mxu0 %v9933_v44  ;;  %v1902_v38 = vpop.permute.xlu1 %1901  ;;  %8831 = vmatpush3.msra.mxu1 %v9923_v39 }
 0xdd6   :  { %1904 = vst.msk [vmem:[#allocation2 + $0x4] sm:$0x3] %vm1026_vm6, %v1902_v38  ;;  %8832 = vmatprep.mubr.msk.f32.mxu1 %vm9713_vm0, %v9712_v0  ;;  %8844 = vmatmul.mubr.msk.f32.vlgmr.msra.gmra.mxu0 %vm228_vm5, %v2010_v18 }
 0xdd7   :  { %8833 = vmatmul.mubr.msk.f32.vlgmr.msra.gmra.mxu1 %vm228_vm5, %v1902_v38  ;;  %8846 = vmatprep.subr.mxu1 %v9712_v0 }
 0xdd8   :  { %8847 = vmatpush3.msra.mxu1 %v10222_v40  ;;  %8857 = vmatprep.subr.mxu0 %v9712_v0 }
 0xdd9   :  { %8848 = vmatprep.subr.mxu1 %v9712_v0  ;;  %8858 = vmatpush3.msra.mxu0 %v10227_v41 }
 0xdda   :  { %8849 = vmatpush3.msra.mxu1 %v10230_v42  ;;  %8854 = vmatprep.mubr.msk.f32.mxu1 %vm9713_vm0, %v9712_v0 }
 0xddb   :  { %8850 = vmatprep.subr.mxu1 %v9712_v0  ;;  %8859 = vmatprep.subr.mxu0 %v9712_v0 }
 0xddc   :  { %8851 = vmatpush3.msra.mxu1 %v10237_v28  ;;  %8860 = vmatpush3.msra.mxu0 %v10240_v30 }
 0xddd   :  { %8852 = vmatprep.subr.mxu1 %v9712_v0  ;;  %8861 = vmatprep.subr.mxu0 %v9712_v0 }
 0xdde   :  { %8853 = vmatpush3.msra.mxu1 %v10245_v32  ;;  %8862 = vmatpush3.msra.mxu0 %v10248_v36 }
 0xddf   :  { %8868 = vmatprep.subr.mxu1 %v9712_v0  ;;  %8863 = vmatprep.subr.mxu0 %v9712_v0 }
 0xde0   :  { %8864 = vmatpush3.msra.mxu0 %v10253_v60  ;;  %8865 = vmatprep.mubr.msk.f32.mxu0 %vm9713_vm0, %v9712_v0 }
 0xde1   :  { %8879 = vmatprep.subr.mxu0 %v9712_v0 }
 0xe85   :  { %v1976_v35 = vpop.f32.mrf.mxu0 }
 0xe86   :  { %v1981_v61 = vrot.slane %v1976_v35, 6 }
 0xe87   :  { %v8801_v62 = vpop.f32.mrf.mxu0 }
 0xe88   :  { %v1983_v63 = vadd.f32 %v1981_v61, %v9792_v13 }
 0xe8a   :  { %v1984_v1 = vmul.f32 %v1983_v63, %v9797_v17 }
 0xe8c   :  { %9464 = vtanh.f32 %v1984_v1 }
 0xe8d   :  { %v2079_v3 = vpop.f32.mrf.mxu1  ;;  %v2149_v5 = vpop.f32.mrf.mxu0 }
 0xe8e   :  { %v2080_v6 = vadd.f32 %v9870_v48, %v2079_v3 }
 0xe8f   :  { %v8812_v9 = vpop.f32.mrf.mxu1  ;;  %v8823_v12 = vpop.f32.mrf.mxu0 }
 0xe90   :  { %v2153_v14 = vadd.f32 %v2149_v5, %v2080_v6 }
 0xe92   :  { %v2154_v19 = vmul.f32 %v2153_v14, %v9797_v17  ;;  %v10296_v14 = vld [vmem:[#allocation6 + $0x50] sm:$0xff] }
 0xe94   :  { %9466 = vtanh.f32 %v2154_v19  ;;  %v10302_v19 = vld [vmem:[#allocation6 + $0x48] sm:$0xff] }
 0xe96   :  { %v2313_v20 = vpop.f32.mrf.mxu0 }
 0xe97   :  { %v2243_v22 = vpop.f32.mrf.mxu1 }
 0xe98   :  { %v2244_v24 = vadd.f32 %v9970_v58, %v2243_v22  ;;  %v8845_v26 = vpop.f32.mrf.mxu0 }
 0xe99   :  { %v9465_v27 = vpop.eup %9464  ;;  %v8834_v29 = vpop.f32.mrf.mxu1  ;;  %v10314_v26 = vld [vmem:[#allocation6 + $0xb8] sm:$0xff] }
 0xe9a   :  { %v2317_v50 = vadd.f32 %v2313_v20, %v2244_v24  ;;  %v1986_v46 = vmul.f32 %v9465_v27, %v9797_v17  ;;  %v10306_v20 = vld [vmem:[#allocation6 + $0x40] sm:$0xff]  ;;  %v10311_v24 = vld [vmem:[#allocation6 + $0x38] sm:$0xff]  ;;  %v10320_v27 = vld [vmem:[#allocation6 + $0xb0] sm:$0xff] }
 0xe9b   :  { %v10323_v29 = vld [vmem:[#allocation6 + $0x98] sm:$0xff] }
 0xe9c   :  { %v2318_v53 = vmul.f32 %v2317_v50, %v9797_v17  ;;  %v1987_v48 = vadd.f32 %v1986_v46, %v9802_v23  ;;  %v10328_v50 = vld [vmem:[#allocation6 + $0xa8] sm:$0xff] }
 0xe9e   :  { %9468 = vtanh.f32 %v2318_v53  ;;  %1993 = vrot.lane.b32.xlu0 %v1987_v48, %s9715_s0  ;;  %v1991_v33 = vmul.f32 %v1989_v31, %v1987_v48 }
 0xea1   :  { %v9467_v47 = vpop.eup %9466 }
 0xea2   :  { %v2156_v49 = vmul.f32 %v9467_v47, %v9797_v17 }
 0xea4   :  { %v2157_v56 = vadd.f32 %v2156_v49, %v9802_v23 }
 0xea6   :  { %2160 = vrot.lane.b32.xlu1 %v2157_v56, %s9715_s0  ;;  %v2158_v11 = vmul.f32 %v2157_v56, %v10174_v55 }
 0xeab   :  { %v9469_v51 = vpop.eup %9468 }
 0xeac   :  { %v2320_v15 = vmul.f32 %v9469_v51, %v9797_v17 }
 0xeae   :  { %v2321_v54 = vadd.f32 %v2320_v15, %v9802_v23 }
 0xeb0   :  { %2324 = vrot.lane.b32.xlu0 %v2321_v54, %s9715_s0  ;;  %v2322_v35 = vmul.f32 %v2321_v54, %v10179_v21 }
 0xf10   :  { %v1994_v57 = vpop.permute.xlu0 %1993 }
 0xf11   :  { %v1996_v2 = vmul.f32 %v1994_v57, %v1987_v48 }
 0xf13   :  { %1998 = vrot.lane.b32.xlu1 %v1996_v2, %s9716_s1 }
 0xf18   :  { %v2161_v4 = vpop.permute.xlu1 %2160 }
 0xf19   :  { %v2163_v7 = vmul.f32 %v2161_v4, %v2157_v56 }
 0xf1b   :  { %2165 = vrot.lane.b32.xlu0 %v2163_v7, %s9716_s1 }
 0xf22   :  { %v2325_v8 = vpop.permute.xlu0 %2324 }
 0xf23   :  { %v2327_v25 = vmul.f32 %v2325_v8, %v2321_v54 }
 0xf25   :  { %2329 = vrot.lane.b32.xlu1 %v2327_v25, %s9716_s1 }
 0xf85   :  { %v1999_v34 = vpop.permute.xlu1 %1998 }
 0xf86   :  { %v10278_v45 = vadd.f32 %v1999_v34, %v1991_v33 }
 0xf88   :  { %9470 = vtanh.f32 %v10278_v45 }
 0xf8d   :  { %v2166_v59 = vpop.permute.xlu0 %2165 }
 0xf8e   :  { %v10282_v18 = vadd.f32 %v2166_v59, %v2158_v11 }
 0xf90   :  { %9472 = vtanh.f32 %v10282_v18 }
 0xf95   :  { %v9471_v38 = vpop.eup %9470 }
 0xf96   :  { %2004 = vrot.lane.b32.xlu0 %v9471_v38, %s9715_s0 }
 0xf97   :  { %v2330_v61 = vpop.permute.xlu1 %2329 }
 0xf98   :  { %v10287_v52 = vadd.f32 %v2330_v61, %v2322_v35 }
 0xf9a   :  { %9474 = vtanh.f32 %v10287_v52 }
 0xf9d   :  { %v9473_v62 = vpop.eup %9472 }
 0xf9e   :  { %2171 = vrot.lane.b32.xlu1 %v9473_v62, %s9715_s0 }
 0xfa7   :  { %v9475_v63 = vpop.eup %9474 }
 0xfa8   :  { %2335 = vrot.lane.b32.xlu0 %v9475_v63, %s9715_s0 }
0x1008   :  { %v2005_v55 = vpop.permute.xlu0 %2004 }
0x1009   :  { %v2007_v1 = vmul.f32 %v2005_v55, %v1987_v48 }
0x100b   :  { %v2345_v3 = vrot.slane %v2007_v1, 2 }
0x100d   :  { %2346 = vrot.lane.b32.xlu1 %v2345_v3, %s9716_s1  ;;  %v2429_v3 = vrot.slane %v10278_v45, 6 }
0x1010   :  { %v2172_v5 = vpop.permute.xlu1 %2171 }
0x1011   :  { %v2174_v21 = vmul.f32 %v2172_v5, %v2157_v56 }
0x1013   :  { %2449 = vrot.lane.b32.xlu0 %v2174_v21, %s9716_s1 }
0x101a   :  { %v2336_v6 = vpop.permute.xlu0 %2335 }
0x101b   :  { %v2338_v9 = vmul.f32 %v2336_v6, %v2321_v54 }
0x101d   :  { %2340 = vrot.lane.b32.xlu1 %v2338_v9, %s9716_s1 }
0x107f   :  { %v2347_v12 = vpop.permute.xlu1 %2346 }
0x1080   :  { %8855 = vmatmul.mubr.msk.f32.vlgmr.msra.gmra.mxu1 %vm228_vm5, %v2347_v12 }
0x1081   :  { %8869 = vmatpush3.msra.mxu1 %v10296_v14  ;;  %8876 = vmatprep.mubr.msk.f32.mxu1 %vm9713_vm0, %v9712_v0 }
0x1082   :  { %8870 = vmatprep.subr.mxu1 %v9712_v0 }
0x1083   :  { %8871 = vmatpush3.msra.mxu1 %v10302_v19 }
0x1084   :  { %8872 = vmatprep.subr.mxu1 %v9712_v0 }
0x1085   :  { %8873 = vmatpush3.msra.mxu1 %v10306_v20  ;;  %v2450_v22 = vpop.permute.xlu0 %2449 }
0x1086   :  { %8866 = vmatmul.mubr.msk.f32.vlgmr.msra.gmra.mxu0 %vm228_vm5, %v2450_v22  ;;  %8874 = vmatprep.subr.mxu1 %v9712_v0 }
0x1087   :  { %8875 = vmatpush3.msra.mxu1 %v10311_v24  ;;  %8880 = vmatpush3.msra.mxu0 %v10314_v26 }
0x1088   :  { %8877 = vmatmul.mubr.msk.f32.vlgmr.msra.gmra.mxu1 %vm228_vm5, %v2347_v12  ;;  %8881 = vmatprep.subr.mxu0 %v9712_v0 }
0x1089   :  { %8890 = vmatprep.subr.mxu1 %v9712_v0  ;;  %8882 = vmatpush3.msra.mxu0 %v10320_v27 }
0x108a   :  { %8891 = vmatpush3.msra.mxu1 %v10323_v29  ;;  %8883 = vmatprep.subr.mxu0 %v9712_v0 }
0x108b   :  { %8892 = vmatprep.subr.mxu1 %v9712_v0  ;;  %8884 = vmatpush3.msra.mxu0 %v10328_v50 }
0x108c   :  { %8893 = vmatpush3.msra.mxu1 %v9919_v37  ;;  %8885 = vmatprep.subr.mxu0 %v9712_v0 }
0x108d   :  { %8894 = vmatprep.subr.mxu1 %v9712_v0  ;;  %8886 = vmatpush3.msra.mxu0 %v9923_v39 }
0x108e   :  { %8895 = vmatpush3.msra.mxu1 %v9927_v43  ;;  %8887 = vmatprep.mubr.msk.f32.mxu0 %vm9713_vm0, %v9712_v0 }
0x108f   :  { %v2341_v46 = vpop.permute.xlu1 %2340  ;;  %8896 = vmatprep.subr.mxu1 %v9712_v0  ;;  %8898 = vmatprep.mubr.msk.f32.mxu1 %vm9713_vm0, %v9712_v0 }
0x1090   :  { %2343 = vst.msk [vmem:[#allocation2 + $0x6] sm:$0x3] %vm1026_vm6, %v2341_v46  ;;  %8888 = vmatmul.mubr.msk.f32.vlgmr.msra.gmra.mxu0 %vm228_vm5, %v2341_v46  ;;  %8897 = vmatpush3.msra.mxu1 %v9933_v44 }
0x1091   :  { %8899 = vmatmul.mubr.msk.f32.vlgmr.msra.gmra.mxu1 %vm228_vm5, %v2450_v22  ;;  %8901 = vmatprep.subr.mxu0 %v9712_v0 }
0x1092   :  { %8902 = vmatpush3.msra.mxu0 %v10222_v40  ;;  %8912 = vmatprep.subr.mxu1 %v9712_v0 }
0x1093   :  { %8903 = vmatprep.subr.mxu0 %v9712_v0  ;;  %8913 = vmatpush3.msra.mxu1 %v10227_v41 }
0x1094   :  { %8904 = vmatpush3.msra.mxu0 %v10230_v42  ;;  %8914 = vmatprep.subr.mxu1 %v9712_v0 }
0x1095   :  { %8905 = vmatprep.subr.mxu0 %v9712_v0  ;;  %8915 = vmatpush3.msra.mxu1 %v10240_v30 }
0x1096   :  { %8906 = vmatpush3.msra.mxu0 %v10237_v28  ;;  %8909 = vmatprep.mubr.msk.f32.mxu0 %vm9713_vm0, %v9712_v0  ;;  %v10369_v28 = vld [vmem:[#allocation6 + $0x78] ss:$0 sm:$0xff] }
0x1097   :  { %8907 = vmatprep.subr.mxu0 %v9712_v0  ;;  %8916 = vmatprep.subr.mxu1 %v9712_v0 }
0x1098   :  { %8908 = vmatpush3.msra.mxu0 %v10245_v32  ;;  %8917 = vmatpush3.msra.mxu1 %v10248_v36 }
0x1099   :  { %8923 = vmatprep.subr.mxu0 %v9712_v0  ;;  %8918 = vmatprep.subr.mxu1 %v9712_v0 }
0x109a   :  { %8919 = vmatpush3.msra.mxu1 %v10253_v60  ;;  %8920 = vmatprep.mubr.msk.f32.mxu1 %vm9713_vm0, %v9712_v0 }
0x109b   :  { %8934 = vmatprep.subr.mxu1 %v9712_v0 }
0x1140   :  { %v2416_v37 = vpop.f32.mrf.mxu1 }
0x1141   :  { %v2421_v39 = vrot.slane %v2416_v37, 4 }
0x1142   :  { %v8856_v43 = vpop.f32.mrf.mxu1 }
0x1143   :  { %v2423_v44 = vadd.f32 %v2421_v39, %v9792_v13 }
0x1145   :  { %v2424_v40 = vmul.f32 %v2423_v44, %v9797_v17 }
0x1146   :  { %v2519_v42 = vpop.f32.mrf.mxu0 }
0x1147   :  { %9476 = vtanh.f32 %v2424_v40  ;;  %v2520_v32 = vadd.f32 %v10369_v28, %v2519_v42 }
0x1148   :  { %v8867_v53 = vpop.f32.mrf.mxu0  ;;  %v2589_v48 = vpop.f32.mrf.mxu1 }
0x1149   :  { %v2593_v47 = vadd.f32 %v2589_v48, %v2520_v32 }
0x114a   :  { %v8878_v49 = vpop.f32.mrf.mxu1 }
0x114b   :  { %v2594_v56 = vmul.f32 %v2593_v47, %v9797_v17 }
0x114d   :  { %9478 = vtanh.f32 %v2594_v56  ;;  %v10426_v56 = vld [vmem:[#allocation6 + $0xa0] sm:$0xff] }
0x1150   :  { %v2683_v51 = vpop.f32.mrf.mxu0 }
0x1151   :  { %v2684_v15 = vadd.f32 %v9970_v58, %v2683_v51  ;;  %v2753_v54 = vpop.f32.mrf.mxu1  ;;  %v10429_v51 = vld [vmem:[#allocation6 + $0x90] sm:$0xff] }
0x1152   :  { %v8889_v57 = vpop.f32.mrf.mxu0 }
0x1153   :  { %v2757_v2 = vadd.f32 %v2753_v54, %v2684_v15  ;;  %v8900_v4 = vpop.f32.mrf.mxu1  ;;  %v10439_v54 = vld [vmem:[#allocation6 + $0x88] sm:$0xff]  ;;  %v10444_v57 = vld [vmem:[#allocation6 + $0x80] sm:$0xff] }
0x1154   :  { %v9477_v7 = vpop.eup %9476 }
0x1155   :  { %v2758_v8 = vmul.f32 %v2757_v2, %v9797_v17  ;;  %v2426_v25 = vmul.f32 %v9477_v7, %v9797_v17 }
0x1157   :  { %9480 = vtanh.f32 %v2758_v8  ;;  %v2427_v31 = vadd.f32 %v2426_v25, %v9802_v23 }
0x1159   :  { %2433 = vrot.lane.b32.xlu0 %v2427_v31, %s9715_s0  ;;  %v2431_v5 = vmul.f32 %v2429_v3, %v2427_v31 }
0x115a   :  { %v9479_v33 = vpop.eup %9478 }
0x115b   :  { %v2596_v34 = vmul.f32 %v9479_v33, %v9797_v17 }
0x115d   :  { %v2597_v11 = vadd.f32 %v2596_v34, %v9802_v23 }
0x115f   :  { %2600 = vrot.lane.b32.xlu1 %v2597_v11, %s9715_s0  ;;  %v2598_v9 = vmul.f32 %v2597_v11, %v10282_v18 }
0x1164   :  { %v9481_v58 = vpop.eup %9480 }
0x1165   :  { %v2760_v59 = vmul.f32 %v9481_v58, %v9797_v17 }
0x1167   :  { %v2761_v38 = vadd.f32 %v2760_v59, %v9802_v23 }
0x1169   :  { %2764 = vrot.lane.b32.xlu0 %v2761_v38, %s9715_s0  ;;  %v2762_v46 = vmul.f32 %v2761_v38, %v10287_v52 }
0x11cb   :  { %v2434_v35 = vpop.permute.xlu0 %2433 }
0x11cc   :  { %v2436_v61 = vmul.f32 %v2434_v35, %v2427_v31 }
0x11ce   :  { %2438 = vrot.lane.b32.xlu1 %v2436_v61, %s9716_s1 }
0x11d1   :  { %v2601_v62 = vpop.permute.xlu1 %2600 }
0x11d2   :  { %v2603_v63 = vmul.f32 %v2601_v62, %v2597_v11 }
0x11d4   :  { %2605 = vrot.lane.b32.xlu0 %v2603_v63, %s9716_s1 }
0x11db   :  { %v2765_v55 = vpop.permute.xlu0 %2764 }
0x11dc   :  { %v2767_v1 = vmul.f32 %v2765_v55, %v2761_v38 }
0x11de   :  { %2769 = vrot.lane.b32.xlu1 %v2767_v1, %s9716_s1 }
0x1240   :  { %v2439_v21 = vpop.permute.xlu1 %2438 }
0x1241   :  { %v10388_v6 = vadd.f32 %v2439_v21, %v2431_v5 }
0x1243   :  { %9482 = vtanh.f32 %v10388_v6 }
0x1246   :  { %v2606_v12 = vpop.permute.xlu0 %2605 }
0x1247   :  { %v10392_v22 = vadd.f32 %v2606_v12, %v2598_v9 }
0x1249   :  { %9484 = vtanh.f32 %v10392_v22 }
0x1250   :  { %v9483_v37 = vpop.eup %9482  ;;  %v2770_v39 = vpop.permute.xlu1 %2769 }
0x1251   :  { %v10396_v43 = vadd.f32 %v2770_v39, %v2762_v46  ;;  %2444 = vrot.lane.b32.xlu0 %v9483_v37, %s9715_s0 }
0x1253   :  { %9486 = vtanh.f32 %v10396_v43 }
0x1256   :  { %v9485_v45 = vpop.eup %9484 }
0x1257   :  { %2611 = vrot.lane.b32.xlu1 %v9485_v45, %s9715_s0  ;;  %v2869_v45 = vrot.slane %v10388_v6, 6 }
0x1260   :  { %v9487_v44 = vpop.eup %9486 }
0x1261   :  { %2775 = vrot.lane.b32.xlu0 %v9487_v44, %s9715_s0 }
0x12c3   :  { %v2445_v18 = vpop.permute.xlu0 %2444 }
0x12c4   :  { %v2447_v40 = vmul.f32 %v2445_v18, %v2427_v31  ;;  %v10473_v31 = vld [vmem:[#allocation6 + $0xc0] ss:$0 sm:$0xff] }
0x12c6   :  { %v2785_v42 = vrot.slane %v2447_v40, 4 }
0x12c8   :  { %2786 = vrot.lane.b32.xlu1 %v2785_v42, %s9716_s1 }
0x12c9   :  { %v2612_v52 = vpop.permute.xlu1 %2611 }
0x12ca   :  { %v2614_v32 = vmul.f32 %v2612_v52, %v2597_v11 }
0x12cc   :  { %2889 = vrot.lane.b32.xlu0 %v2614_v32, %s9716_s1 }
0x12d3   :  { %v2776_v53 = vpop.permute.xlu0 %2775 }
0x12d4   :  { %v2778_v48 = vmul.f32 %v2776_v53, %v2761_v38 }
0x12d6   :  { %2780 = vrot.lane.b32.xlu1 %v2778_v48, %s9716_s1 }
0x133a   :  { %v2787_v47 = vpop.permute.xlu1 %2786 }
0x133b   :  { %8910 = vmatmul.mubr.msk.f32.vlgmr.msra.gmra.mxu0 %vm228_vm5, %v2787_v47 }
0x133c   :  { %8924 = vmatpush3.msra.mxu0 %v10296_v14  ;;  %8931 = vmatprep.mubr.msk.f32.mxu0 %vm9713_vm0, %v9712_v0 }
0x133d   :  { %8925 = vmatprep.subr.mxu0 %v9712_v0 }
0x133e   :  { %8926 = vmatpush3.msra.mxu0 %v10302_v19  ;;  %v2890_v49 = vpop.permute.xlu0 %2889 }
0x133f   :  { %8921 = vmatmul.mubr.msk.f32.vlgmr.msra.gmra.mxu1 %vm228_vm5, %v2890_v49  ;;  %8927 = vmatprep.subr.mxu0 %v9712_v0 }
0x1340   :  { %8928 = vmatpush3.msra.mxu0 %v10306_v20  ;;  %8935 = vmatpush3.msra.mxu1 %v10314_v26 }
0x1341   :  { %8929 = vmatprep.subr.mxu0 %v9712_v0  ;;  %8936 = vmatprep.subr.mxu1 %v9712_v0 }
0x1342   :  { %8930 = vmatpush3.msra.mxu0 %v10311_v24  ;;  %8937 = vmatpush3.msra.mxu1 %v10320_v27 }
0x1343   :  { %8932 = vmatmul.mubr.msk.f32.vlgmr.msra.gmra.mxu0 %vm228_vm5, %v2787_v47  ;;  %8938 = vmatprep.subr.mxu1 %v9712_v0 }
0x1344   :  { %8945 = vmatprep.subr.mxu0 %v9712_v0  ;;  %8939 = vmatpush3.msra.mxu1 %v10328_v50 }
0x1345   :  { %8946 = vmatpush3.msra.mxu0 %v10323_v29  ;;  %8940 = vmatprep.subr.mxu1 %v9712_v0 }
0x1346   :  { %8947 = vmatprep.subr.mxu0 %v9712_v0  ;;  %8941 = vmatpush3.msra.mxu1 %v10426_v56 }
0x1347   :  { %8948 = vmatpush3.msra.mxu0 %v10429_v51  ;;  %8942 = vmatprep.mubr.msk.f32.mxu1 %vm9713_vm0, %v9712_v0 }
0x1348   :  { %v2781_v15 = vpop.permute.xlu1 %2780  ;;  %8949 = vmatprep.subr.mxu0 %v9712_v0  ;;  %8953 = vmatprep.mubr.msk.f32.mxu0 %vm9713_vm0, %v9712_v0 }
0x1349   :  { %2783 = vst.msk [vmem:[#allocation2 + $0x8] sm:$0x3] %vm1026_vm6, %v2781_v15  ;;  %8943 = vmatmul.mubr.msk.f32.vlgmr.msra.gmra.mxu1 %vm228_vm5, %v2781_v15  ;;  %8950 = vmatpush3.msra.mxu0 %v10439_v54 }
0x134a   :  { %8951 = vmatprep.subr.mxu0 %v9712_v0  ;;  %8956 = vmatprep.subr.mxu1 %v9712_v0 }
0x134b   :  { %8952 = vmatpush3.msra.mxu0 %v10444_v57  ;;  %8957 = vmatpush3.msra.mxu1 %v10227_v41 }
0x134c   :  { %8954 = vmatmul.mubr.msk.f32.vlgmr.msra.gmra.mxu0 %vm228_vm5, %v2890_v49  ;;  %8967 = vmatprep.subr.mxu0 %v9712_v0 }
0x134d   :  { %8968 = vmatpush3.msra.mxu0 %v10296_v14  ;;  %8958 = vmatprep.subr.mxu1 %v9712_v0 }
0x134e   :  { %8969 = vmatprep.subr.mxu0 %v9712_v0  ;;  %8959 = vmatpush3.msra.mxu1 %v10240_v30 }
0x134f   :  { %8970 = vmatpush3.msra.mxu0 %v10302_v19  ;;  %8960 = vmatprep.subr.mxu1 %v9712_v0 }
0x1350   :  { %8971 = vmatprep.subr.mxu0 %v9712_v0  ;;  %8975 = vmatprep.mubr.msk.f32.mxu0 %vm9713_vm0, %v9712_v0 }
0x1351   :  { %8972 = vmatpush3.msra.mxu0 %v10306_v20  ;;  %8961 = vmatpush3.msra.mxu1 %v10248_v36 }
0x1352   :  { %8973 = vmatprep.subr.mxu0 %v9712_v0  ;;  %8962 = vmatprep.subr.mxu1 %v9712_v0 }
0x1353   :  { %8974 = vmatpush3.msra.mxu0 %v10311_v24  ;;  %8963 = vmatpush3.msra.mxu1 %v10253_v60 }
0x1354   :  { %8989 = vmatprep.subr.mxu0 %v9712_v0  ;;  %8964 = vmatprep.mubr.msk.f32.mxu1 %vm9713_vm0, %v9712_v0 }
0x1355   :  { %8978 = vmatprep.subr.mxu1 %v9712_v0 }
0x13fb   :  { %v2856_v41 = vpop.f32.mrf.mxu0 }
0x13fc   :  { %v2861_v30 = vrot.slane %v2856_v41, 2 }
0x13fd   :  { %v8911_v14 = vpop.f32.mrf.mxu0 }
0x13fe   :  { %v2863_v36 = vadd.f32 %v2861_v30, %v9792_v13 }
0x13ff   :  { %v2959_v19 = vpop.f32.mrf.mxu1 }
0x1400   :  { %v2864_v20 = vmul.f32 %v2863_v36, %v9797_v17  ;;  %v2960_v24 = vadd.f32 %v10369_v28, %v2959_v19 }
0x1401   :  { %v8922_v2 = vpop.f32.mrf.mxu1 }
0x1402   :  { %9488 = vtanh.f32 %v2864_v20 }
0x1403   :  { %v3029_v60 = vpop.f32.mrf.mxu0 }
0x1404   :  { %v3033_v4 = vadd.f32 %v3029_v60, %v2960_v24 }
0x1405   :  { %v8933_v7 = vpop.f32.mrf.mxu0 }
0x1406   :  { %v3034_v8 = vmul.f32 %v3033_v4, %v9797_v17 }
0x1408   :  { %9490 = vtanh.f32 %v3034_v8 }
0x1409   :  { %v3123_v25 = vpop.f32.mrf.mxu1 }
0x140a   :  { %v3124_v33 = vadd.f32 %v10473_v31, %v3123_v25 }
0x140b   :  { %v8944_v34 = vpop.f32.mrf.mxu1 }
0x140c   :  { %v3193_v13 = vpop.f32.mrf.mxu0 }
0x140d   :  { %v3197_v11 = vadd.f32 %v3193_v13, %v3124_v33 }
0x140e   :  { %v8955_v58 = vpop.f32.mrf.mxu0 }
0x140f   :  { %v9489_v59 = vpop.eup %9488  ;;  %v3198_v38 = vmul.f32 %v3197_v11, %v9797_v17 }
0x1410   :  { %v2866_v35 = vmul.f32 %v9489_v59, %v9797_v17 }
0x1411   :  { %9492 = vtanh.f32 %v3198_v38 }
0x1412   :  { %v2867_v61 = vadd.f32 %v2866_v35, %v9802_v23 }
0x1414   :  { %2873 = vrot.lane.b32.xlu0 %v2867_v61, %s9715_s0  ;;  %v2871_v44 = vmul.f32 %v2869_v45, %v2867_v61 }
0x1415   :  { %v9491_v62 = vpop.eup %9490 }
0x1416   :  { %v3036_v63 = vmul.f32 %v9491_v62, %v9797_v17 }
0x1418   :  { %v3037_v55 = vadd.f32 %v3036_v63, %v9802_v23 }
0x141a   :  { %3040 = vrot.lane.b32.xlu1 %v3037_v55, %s9715_s0  ;;  %v3038_v42 = vmul.f32 %v3037_v55, %v10392_v22 }
0x141e   :  { %v9493_v1 = vpop.eup %9492 }
0x141f   :  { %v3200_v3 = vmul.f32 %v9493_v1, %v9797_v17 }
0x1421   :  { %v3201_v5 = vadd.f32 %v3200_v3, %v9802_v23 }
0x1423   :  { %3204 = vrot.lane.b32.xlu0 %v3201_v5, %s9715_s0  ;;  %v3202_v53 = vmul.f32 %v3201_v5, %v10396_v43 }
0x1486   :  { %v2874_v21 = vpop.permute.xlu0 %2873 }
0x1487   :  { %v2876_v9 = vmul.f32 %v2874_v21, %v2867_v61 }
0x1489   :  { %2878 = vrot.lane.b32.xlu1 %v2876_v9, %s9716_s1 }
0x148c   :  { %v3041_v12 = vpop.permute.xlu1 %3040 }
0x148d   :  { %v3043_v46 = vmul.f32 %v3041_v12, %v3037_v55 }
0x148f   :  { %3045 = vrot.lane.b32.xlu0 %v3043_v46, %s9716_s1 }
0x1495   :  { %v3205_v37 = vpop.permute.xlu0 %3204 }
0x1496   :  { %v3207_v39 = vmul.f32 %v3205_v37, %v3201_v5 }
0x1498   :  { %3209 = vrot.lane.b32.xlu1 %v3207_v39, %s9716_s1 }
0x14fb   :  { %v2879_v18 = vpop.permute.xlu1 %2878 }
0x14fc   :  { %v2881_v40 = vadd.f32 %v2879_v18, %v2871_v44 }
0x14fe   :  { %9494 = vtanh.f32 %v2881_v40  ;;  %v3740_v40 = vld [vmem:[#allocation2] sm:$0xff] }
0x1501   :  { %v3046_v52 = vpop.permute.xlu0 %3045 }
0x1502   :  { %v10491_v32 = vadd.f32 %v3046_v52, %v3038_v42 }
0x1504   :  { %9496 = vtanh.f32 %v10491_v32 }
0x150a   :  { %v3210_v48 = vpop.permute.xlu1 %3209 }
0x150b   :  { %v9495_v47 = vpop.eup %9494  ;;  %v10495_v49 = vadd.f32 %v3210_v48, %v3202_v53 }
0x150c   :  { %2884 = vrot.lane.b32.xlu0 %v9495_v47, %s9715_s0 }
0x150d   :  { %9498 = vtanh.f32 %v10495_v49 }
0x1511   :  { %v9497_v6 = vpop.eup %9496 }
0x1512   :  { %3051 = vrot.lane.b32.xlu1 %v9497_v6, %s9715_s0 }
0x151a   :  { %v9499_v15 = vpop.eup %9498 }
0x151b   :  { %3215 = vrot.lane.b32.xlu0 %v9499_v15, %s9715_s0 }
0x157e   :  { %v2885_v22 = vpop.permute.xlu0 %2884 }
0x157f   :  { %v2887_v41 = vmul.f32 %v2885_v22, %v2867_v61 }
0x1581   :  { %v3300_v30 = vrot.slane %v2887_v41, 6 }
0x1583   :  { %3301 = vrot.lane.b32.xlu0 %v3300_v30, %s9716_s1 }
0x1584   :  { %v3052_v43 = vpop.permute.xlu1 %3051 }
0x1585   :  { %v3054_v14 = vmul.f32 %v3052_v43, %v3037_v55 }
0x1587   :  { %3225 = vrot.lane.b32.xlu1 %v3054_v14, %s9716_s1 }
0x158d   :  { %v3216_v36 = vpop.permute.xlu0 %3215 }
0x158e   :  { %v3218_v19 = vmul.f32 %v3216_v36, %v3201_v5 }
0x1590   :  { %3220 = vrot.lane.b32.xlu1 %v3218_v19, %s9716_s1  ;;  %v87_v19 = vld [vmem:[#allocation6 + $0x168] sm:$0xff] }
0x15f5   :  { %v3302_v20 = vpop.permute.xlu0 %3301 }
0x15f6   :  { %8976 = vmatmul.mubr.msk.f32.vlgmr.msra.gmra.mxu0 %vm228_vm5, %v3302_v20  ;;  %v86_v20 = vld [vmem:[#allocation6 + $0x160] sm:$0xff] }
0x15f7   :  { %8990 = vmatpush3.msra.mxu0 %v10323_v29  ;;  %8997 = vmatprep.mubr.msk.f32.mxu0 %vm9713_vm0, %v9712_v0 }
0x15f8   :  { %8991 = vmatprep.subr.mxu0 %v9712_v0 }
0x15f9   :  { %v3226_v2 = vpop.permute.xlu1 %3225  ;;  %8992 = vmatpush3.msra.mxu0 %v10429_v51 }
0x15fa   :  { %8965 = vmatmul.mubr.msk.f32.vlgmr.msra.gmra.mxu1 %vm228_vm5, %v3226_v2  ;;  %8993 = vmatprep.subr.mxu0 %v9712_v0 }
0x15fb   :  { %8979 = vmatpush3.msra.mxu1 %v10314_v26  ;;  %8994 = vmatpush3.msra.mxu0 %v10439_v54 }
0x15fc   :  { %8980 = vmatprep.subr.mxu1 %v9712_v0  ;;  %8995 = vmatprep.subr.mxu0 %v9712_v0 }
0x15fd   :  { %8981 = vmatpush3.msra.mxu1 %v10320_v27  ;;  %8996 = vmatpush3.msra.mxu0 %v10444_v57 }
0x15fe   :  { %8982 = vmatprep.subr.mxu1 %v9712_v0  ;;  %8998 = vmatmul.mubr.msk.f32.vlgmr.msra.gmra.mxu0 %vm228_vm5, %v3226_v2  ;;  %v96_v2 = vld [vmem:[#allocation6 + $0x1b0] sm:$0xff] }
0x15ff   :  { %8983 = vmatpush3.msra.mxu1 %v10328_v50  ;;  %8986 = vmatprep.mubr.msk.f32.mxu1 %vm9713_vm0, %v9712_v0 }
0x1600   :  { %8984 = vmatprep.subr.mxu1 %v9712_v0  ;;  %9011 = vmatprep.subr.mxu0 %v9712_v0 }
0x1601   :  { %8985 = vmatpush3.msra.mxu1 %v10426_v56  ;;  %9012 = vmatpush3.msra.mxu0 %v10323_v29 }
0x1602   :  { %v3221_v24 = vpop.permute.xlu1 %3220  ;;  %9013 = vmatprep.subr.mxu0 %v9712_v0  ;;  %9019 = vmatprep.mubr.msk.f32.mxu0 %vm9713_vm0, %v9712_v0 }
0x1603   :  { %3223 = vst.msk [vmem:[#allocation2 + $0xa] sm:$0x3] %vm1026_vm6, %v3221_v24  ;;  %8987 = vmatmul.mubr.msk.f32.vlgmr.msra.gmra.mxu1 %vm228_vm5, %v3221_v24  ;;  %9014 = vmatpush3.msra.mxu0 %v10429_v51  ;;  %v95_v24 = vld [vmem:[#allocation6 + $0x1a8] sm:$0xff] }
0x1604   :  { %9015 = vmatprep.subr.mxu0 %v9712_v0  ;;  %9000 = vmatprep.subr.mxu1 %v9712_v0 }
0x1605   :  { %9016 = vmatpush3.msra.mxu0 %v10439_v54  ;;  %9001 = vmatpush3.msra.mxu1 %v10314_v26 }
0x1606   :  { %9017 = vmatprep.subr.mxu0 %v9712_v0  ;;  %9002 = vmatprep.subr.mxu1 %v9712_v0 }
0x1607   :  { %9018 = vmatpush3.msra.mxu0 %v10444_v57  ;;  %9003 = vmatpush3.msra.mxu1 %v10320_v27 }
0x1608   :  { %9004 = vmatprep.subr.mxu1 %v9712_v0  ;;  %9008 = vmatprep.mubr.msk.f32.mxu1 %vm9713_vm0, %v9712_v0 }
0x1609   :  { %9005 = vmatpush3.msra.mxu1 %v10328_v50  ;;  %9033 = vmatprep.subr.mxu0 %v96_v2 }
0x160a   :  { %9006 = vmatprep.subr.mxu1 %v9712_v0 }
0x160b   :  { %9007 = vmatpush3.msra.mxu1 %v10426_v56 }
0x160c   :  { %9022 = vmatprep.subr.mxu1 %v87_v19 }
0x16b6   :  { %v3371_v26 = vpop.f32.mrf.mxu0 }
0x16b8   :  { %v8977_v29 = vpop.f32.mrf.mxu0 }
0x16b9   :  { %v94_v29 = vld [vmem:[#allocation6 + $0x1a0] sm:$0xff] }
0x16ba   :  { %v3295_v51 = vpop.f32.mrf.mxu1 }
0x16bb   :  { %v3296_v54 = vadd.f32 %v10369_v28, %v3295_v51 }
0x16bc   :  { %v8966_v60 = vpop.f32.mrf.mxu1 }
0x16bd   :  { %v3375_v57 = vadd.f32 %v3371_v26, %v3296_v54 }
0x16be   :  { %v3535_v4 = vpop.f32.mrf.mxu0 }
0x16bf   :  { %v3376_v27 = vmul.f32 %v3375_v57, %v9797_v17  ;;  %v93_v57 = vld [vmem:[#allocation6 + $0x198] sm:$0xff] }
0x16c0   :  { %v8999_v7 = vpop.f32.mrf.mxu0 }
0x16c1   :  { %9500 = vtanh.f32 %v3376_v27  ;;  %v91_v27 = vld [vmem:[#allocation6 + $0x188] sm:$0xff]  ;;  %v90_v7 = vld [vmem:[#allocation6 + $0x180] sm:$0xff] }
0x16c3   :  { %v3465_v8 = vpop.f32.mrf.mxu1 }
0x16c4   :  { %v3466_v25 = vadd.f32 %v10473_v31, %v3465_v8  ;;  %v89_v8 = vld [vmem:[#allocation6 + $0x178] sm:$0xff] }
0x16c5   :  { %v8988_v50 = vpop.f32.mrf.mxu1 }
0x16c6   :  { %v3539_v33 = vadd.f32 %v3535_v4, %v3466_v25  ;;  %v92_v4 = vld [vmem:[#allocation6 + $0x190] sm:$0xff] }
0x16c7   :  { %v8130_v25 = vld [vmem:[#allocation6 + $0x170] ss:$0 sm:$0xff] }
0x16c8   :  { %v3540_v34 = vmul.f32 %v3539_v33, %v9797_v17 }
0x16ca   :  { %9502 = vtanh.f32 %v3540_v34 }
0x16ce   :  { %v9501_v56 = vpop.eup %9500 }
0x16cf   :  { %v3378_v13 = vmul.f32 %v9501_v56, %v9797_v17 }
0x16d1   :  { %v3379_v28 = vadd.f32 %v3378_v13, %v9802_v23 }
0x16d3   :  { %3382 = vrot.lane.b32.xlu1 %v3379_v28, %s9715_s0  ;;  %v3380_v63 = vmul.f32 %v3379_v28, %v10491_v32 }
0x16d7   :  { %v9503_v11 = vpop.eup %9502 }
0x16d8   :  { %v3542_v58 = vmul.f32 %v9503_v11, %v9797_v17 }
0x16da   :  { %v3543_v59 = vadd.f32 %v3542_v58, %v9802_v23 }
0x16dc   :  { %3546 = vrot.lane.b32.xlu0 %v3543_v59, %s9715_s0  ;;  %v3544_v3 = vmul.f32 %v3543_v59, %v10495_v49 }
0x1745   :  { %v3383_v38 = vpop.permute.xlu1 %3382 }
0x1746   :  { %v3385_v35 = vmul.f32 %v3383_v38, %v3379_v28  ;;  %v100_v38 = vld [vmem:[#allocation6 + $0x1d0] sm:$0xff] }
0x1748   :  { %3387 = vrot.lane.b32.xlu1 %v3385_v35, %s9716_s1  ;;  %v99_v35 = vld [vmem:[#allocation6 + $0x1c8] sm:$0xff] }
0x174e   :  { %v3547_v61 = vpop.permute.xlu0 %3546 }
0x174f   :  { %v3549_v62 = vmul.f32 %v3547_v61, %v3543_v59  ;;  %v98_v61 = vld [vmem:[#allocation6 + $0x1c0] sm:$0xff] }
0x1751   :  { %3551 = vrot.lane.b32.xlu0 %v3549_v62, %s9716_s1  ;;  %v8133_v62 = vld [vmem:[#allocation6 + $0x1b8] ss:$0 sm:$0xff] }
0x17ba   :  { %v3388_v55 = vpop.permute.xlu1 %3387 }
0x17bb   :  { %v3390_v1 = vadd.f32 %v3388_v55, %v3380_v63 }
0x17bd   :  { %9504 = vtanh.f32 %v3390_v1 }
0x17c3   :  { %v3552_v5 = vpop.permute.xlu0 %3551 }
0x17c4   :  { %v3554_v21 = vadd.f32 %v3552_v5, %v3544_v3 }
0x17c6   :  { %9506 = vtanh.f32 %v3554_v21 }
0x17ca   :  { %v9505_v9 = vpop.eup %9504 }
0x17cb   :  { %3393 = vrot.lane.b32.xlu1 %v9505_v9, %s9715_s0 }
0x17d3   :  { %v9507_v12 = vpop.eup %9506 }
0x17d4   :  { %3557 = vrot.lane.b32.xlu0 %v9507_v12, %s9715_s0 }
0x183d   :  { %v3394_v46 = vpop.permute.xlu1 %3393 }
0x183e   :  { %v3396_v37 = vmul.f32 %v3394_v46, %v3379_v28  ;;  %v104_v46 = vld [vmem:[#allocation6 + $0x1f0] sm:$0xff] }
0x1840   :  { %3639 = vrot.lane.b32.xlu1 %v3396_v37, %s9716_s1  ;;  %v103_v37 = vld [vmem:[#allocation6 + $0x1e8] sm:$0xff] }
0x1846   :  { %v3558_v39 = vpop.permute.xlu0 %3557 }
0x1847   :  { %v3560_v45 = vmul.f32 %v3558_v39, %v3543_v59  ;;  %v101_v59 = vld [vmem:[#allocation6 + $0x1d8] sm:$0xff]  ;;  %v8136_v39 = vld [vmem:[#allocation6 + $0x1e0] ss:$0 sm:$0xff] }
0x1849   :  { %3562 = vrot.lane.b32.xlu0 %v3560_v45, %s9716_s1 }
0x18b2   :  { %v3640_v44 = vpop.permute.xlu1 %3639 }
0x18b3   :  { %9020 = vmatmul.mubr.msk.f32.vlgmr.msra.gmra.mxu0 %vm228_vm5, %v3640_v44 }
0x18b4   :  { %9034 = vmatpush3.msra.mxu0 %v96_v2 }
0x18b5   :  { %9035 = vmatprep.subr.mxu0 %v95_v24 }
0x18b6   :  { %9036 = vmatpush3.msra.mxu0 %v95_v24 }
0x18b7   :  { %9037 = vmatprep.subr.mxu0 %v94_v29 }
0x18b8   :  { %9038 = vmatpush3.msra.mxu0 %v94_v29 }
0x18b9   :  { %9039 = vmatprep.subr.mxu0 %v93_v57 }
0x18ba   :  { %9040 = vmatpush3.msra.mxu0 %v93_v57  ;;  %v112_v57 = vld [vmem:[#allocation6 + $0x230] sm:$0xff] }
0x18bb   :  { %v3563_v18 = vpop.permute.xlu0 %3562  ;;  %9041 = vmatprep.subr.mxu0 %v92_v4 }
0x18bc   :  { %3565 = vst.msk [vmem:[#allocation2 + $0xc] sm:$0x3] %vm1026_vm6, %v3563_v18  ;;  %9009 = vmatmul.mubr.msk.f32.vlgmr.msra.gmra.mxu1 %vm228_vm5, %v3563_v18  ;;  %9042 = vmatpush3.msra.mxu0 %v92_v4  ;;  %v111_v4 = vld [vmem:[#allocation6 + $0x228] sm:$0xff] }
0x18bd   :  { %9030 = vmatprep.mubr.msk.f32.mxu1 %vm228_vm5, %v3740_v40  ;;  %9023 = vmatpush3.msra.mxu1 %v87_v19  ;;  %v8142_v19 = vld [vmem:[#allocation6 + $0x208] ss:$0 sm:$0xff] }
0x18be   :  { %9024 = vmatprep.subr.mxu1 %v86_v20  ;;  %9043 = vmatprep.subr.mxu0 %v91_v27 }
0x18bf   :  { %9025 = vmatpush3.msra.mxu1 %v86_v20  ;;  %9044 = vmatpush3.msra.mxu0 %v91_v27  ;;  %v123_v27 = vld [vmem:[#allocation6 + $0x288] sm:$0xff] }
0x18c0   :  { %9045 = vmatprep.subr.mxu0 %v90_v7 }
0x18c1   :  { %9046 = vmatpush3.msra.mxu0 %v90_v7  ;;  %v122_v7 = vld [vmem:[#allocation6 + $0x280] sm:$0xff] }
0x18c2   :  { %9047 = vmatprep.subr.mxu0 %v89_v8 }
0x18c3   :  { %9048 = vmatpush3.msra.mxu0 %v89_v8  ;;  %v121_v8 = vld [vmem:[#allocation6 + $0x278] sm:$0xff] }
0x1973   :  { %v3709_v42 = vpop.f32.mrf.mxu0 }
0x1975   :  { %v9021_v52 = vpop.f32.mrf.mxu0 }
0x197c   :  { %v3634_v32 = vpop.f32.mrf.mxu1 }
0x197d   :  { %v3635_v53 = vadd.f32 %v10473_v31, %v3634_v32 }
0x197e   :  { %v9010_v48 = vpop.f32.mrf.mxu1 }
0x197f   :  { %v3713_v47 = vadd.f32 %v3709_v42, %v3635_v53  ;;  %v106_v48 = vld [vmem:[#allocation6 + $0x200] sm:$0xff] }
0x1980   :  { %9070 = vmatprep.subr.mxu0 %v106_v48 }
0x1981   :  { %v3714_v49 = vmul.f32 %v3713_v47, %v9797_v17  ;;  %v8139_v47 = vld [vmem:[#allocation6 + $0x1f8] ss:$0 sm:$0xff] }
0x1983   :  { %9508 = vtanh.f32 %v3714_v49 }
0x1990   :  { %v9509_v6 = vpop.eup %9508 }
0x1991   :  { %v3716_v15 = vmul.f32 %v9509_v6, %v9797_v17  ;;  %v85_v17 = vld [vmem:[#allocation6 + $0x158] sm:$0xff] }
0x1992   :  { %9026 = vmatprep.subr.mxu1 %v85_v17 }
0x1993   :  { %v3717_v22 = vadd.f32 %v3716_v15, %v9802_v23  ;;  %v84_v23 = vld [vmem:[#allocation6 + $0x150] sm:$0xff]  ;;  %9027 = vmatpush3.msra.mxu1 %v85_v17 }
0x1994   :  { %9028 = vmatprep.subr.mxu1 %v84_v23 }
0x1995   :  { %3720 = vrot.lane.b32.xlu0 %v3717_v22, %s9715_s0  ;;  %v3718_v43 = vmul.f32 %v3717_v22, %v3554_v21  ;;  %9029 = vmatpush3.msra.mxu1 %v84_v23 }
0x1996   :  { %9052 = vmatprep.subr.mxu1 %v101_v59 }
0x1a07   :  { %v3721_v41 = vpop.permute.xlu0 %3720 }
0x1a08   :  { %v3723_v30 = vmul.f32 %v3721_v41, %v3717_v22 }
0x1a0a   :  { %3725 = vrot.lane.b32.xlu1 %v3723_v30, %s9716_s1 }
0x1a7c   :  { %v3726_v14 = vpop.permute.xlu1 %3725 }
0x1a7d   :  { %v3728_v36 = vadd.f32 %v3726_v14, %v3718_v43 }
0x1a7f   :  { %9510 = vtanh.f32 %v3728_v36  ;;  %v109_v36 = vld [vmem:[#allocation6 + $0x218] sm:$0xff] }
0x1a8c   :  { %v9511_v31 = vpop.eup %9510 }
0x1a8d   :  { %3731 = vrot.lane.b32.xlu0 %v9511_v31, %s9715_s0  ;;  %v108_v31 = vld [vmem:[#allocation6 + $0x210] sm:$0xff] }
0x1aff   :  { %v3732_v26 = vpop.permute.xlu0 %3731 }
0x1b00   :  { %v3734_v51 = vmul.f32 %v3732_v26, %v3717_v22 }
0x1b02   :  { %3736 = vrot.lane.b32.xlu1 %v3734_v51, %s9716_s1 }
0x1b74   :  { %v3737_v54 = vpop.permute.xlu1 %3736 }
0x1b75   :  { %3739 = vst.msk [vmem:[#allocation2 + $0xe] sm:$0x3] %vm1026_vm6, %v3737_v54  ;;  %v114_v54 = vld [vmem:[#allocation6 + $0x240] sm:$0xff] }
0x1b7c   :  { %v3741_v60 = vld [vmem:[#allocation2 + $0x8] sm:$0xff] }
0x1b7d   :  { %9031 = vmatmul.mubr.msk.f32.vlgmr.msra.gmra.mxu1 %vm228_vm5, %v3741_v60  ;;  %v113_v60 = vld [vmem:[#allocation6 + $0x238] sm:$0xff] }
0x1b7e   :  { %9053 = vmatpush3.msra.mxu1 %v101_v59  ;;  %v120_v59 = vld [vmem:[#allocation6 + $0x270] sm:$0xff] }
0x1b7f   :  { %9054 = vmatprep.subr.mxu1 %v100_v38 }
0x1b80   :  { %9055 = vmatpush3.msra.mxu1 %v100_v38  ;;  %v119_v38 = vld [vmem:[#allocation6 + $0x268] sm:$0xff] }
0x1b81   :  { %9056 = vmatprep.subr.mxu1 %v99_v35 }
0x1b82   :  { %9057 = vmatpush3.msra.mxu1 %v99_v35  ;;  %v118_v35 = vld [vmem:[#allocation6 + $0x260] sm:$0xff] }
0x1b83   :  { %9058 = vmatprep.subr.mxu1 %v98_v61 }
0x1b84   :  { %9059 = vmatpush3.msra.mxu1 %v98_v61  ;;  %v117_v61 = vld [vmem:[#allocation6 + $0x258] sm:$0xff] }
0x1b85   :  { %9063 = vmatprep.subr.mxu1 %v104_v46 }
0x1c3d   :  { %v9032_v50 = vpop.f32.mrf.mxu1 }
0x1c3e   :  { %v3824_v33 = vadd.f32 %v9032_v50, %v8130_v25 }
0x1c3f   :  { %v3818_v34 = vpop.f32.mrf.mxu1 }
0x1c40   :  { %v3819_v56 = vadd.f32 %v8130_v25, %v3818_v34  ;;  %v3828_v13 = vmul.f32 0.01, %v3824_v33  ;;  %v8145_v25 = vld [vmem:[#allocation6 + $0x220] ss:$0 sm:$0xff] }
0x1c42   :  { %v3827_v28 = vmul.f32 0.01, %v3819_v56  ;;  %v3830_v58 = vmax.f32 %v3824_v33, %v3828_v13 }
0x1c44   :  { %v3829_v11 = vmax.f32 %v3819_v56, %v3827_v28 }
0x1c46   :  { %9049 = vmatprep.mubr.msk.f32.mxu0 %vm3835_vm7, %v3829_v11 }
0x1c47   :  { %9050 = vmatmul.mubr.msk.f32.vlgmr.msra.gmra.mxu0 %vm3835_vm7, %v3830_v58 }
0x1c48   :  { %9071 = vmatpush3.msra.mxu0 %v106_v48 }
0x1c49   :  { %9082 = vmatprep.subr.mxu0 %v114_v54 }
0x1d07   :  { %v9051_v63 = vpop.f32.mrf.mxu0 }
0x1d08   :  { %v3914_v55 = vadd.f32 %v9051_v63, %v8133_v62  ;;  %v8148_v63 = vld [vmem:[#allocation6 + $0x248] ss:$0 sm:$0xff] }
0x1d09   :  { %v3908_v1 = vpop.f32.mrf.mxu0 }
0x1d0a   :  { %v3909_v3 = vadd.f32 %v8133_v62, %v3908_v1  ;;  %v3918_v5 = vmul.f32 0.01, %v3914_v55  ;;  %v116_v62 = vld [vmem:[#allocation6 + $0x250] sm:$0xff] }
0x1d0c   :  { %v3917_v21 = vmul.f32 0.01, %v3909_v3  ;;  %v3920_v12 = vmax.f32 %v3914_v55, %v3918_v5 }
0x1d0e   :  { %v3919_v9 = vmax.f32 %v3909_v3, %v3917_v21 }
0x1d10   :  { %9060 = vmatprep.mubr.msk.f32.mxu1 %vm228_vm5, %v3919_v9 }
0x1d11   :  { %9061 = vmatmul.mubr.msk.f32.vlgmr.msra.gmra.mxu1 %vm228_vm5, %v3920_v12 }
0x1d12   :  { %9064 = vmatpush3.msra.mxu1 %v104_v46 }
0x1d13   :  { %9065 = vmatprep.subr.mxu1 %v103_v37 }
0x1d14   :  { %9066 = vmatpush3.msra.mxu1 %v103_v37  ;;  %v70_v37 = vld [vmem:[#allocation6 + $0xe0] sm:$0xff] }
0x1d15   :  { %9075 = vmatprep.subr.mxu1 %v109_v36 }
0x1dd1   :  { %v9062_v45 = vpop.f32.mrf.mxu1 }
0x1dd2   :  { %v4003_v44 = vadd.f32 %v9062_v45, %v8136_v39  ;;  %v68_v45 = vld [vmem:[#allocation6 + $0xd0] sm:$0xff] }
0x1dd3   :  { %v3997_v18 = vpop.f32.mrf.mxu1 }
0x1dd4   :  { %v3998_v40 = vadd.f32 %v8136_v39, %v3997_v18  ;;  %v4007_v42 = vmul.f32 0.01, %v4003_v44  ;;  %v69_v39 = vld [vmem:[#allocation6 + $0xd8] sm:$0xff]  ;;  %v10600_v18 = vld [vmem:[#allocation6 + $0xf0] sm:$0xff] }
0x1dd6   :  { %v4006_v52 = vmul.f32 0.01, %v3998_v40  ;;  %v4009_v53 = vmax.f32 %v4003_v44, %v4007_v42  ;;  %v67_v44 = vld [vmem:[#allocation6 + $0xc8] sm:$0xff]  ;;  %v8151_v42 = vld [vmem:[#allocation6 + $0x290] ss:$0 sm:$0xff] }
0x1dd8   :  { %v4008_v32 = vmax.f32 %v3998_v40, %v4006_v52  ;;  %v10604_v40 = vld [vmem:[#allocation6 + $0xe8] sm:$0xff] }
0x1dda   :  { %9067 = vmatprep.mubr.msk.f32.mxu1 %vm138_vm1, %v4008_v32 }
0x1ddb   :  { %9068 = vmatmul.mubr.msk.f32.vlgmr.msra.gmra.mxu1 %vm138_vm1, %v4009_v53 }
0x1ddc   :  { %9076 = vmatpush3.msra.mxu1 %v109_v36  ;;  %v10627_v36 = vsel %vm4460_vm11, 1.0, %v9714_v16  ;;  %v10641_v16 = vld [vmem:[#allocation6 + $0x118] sm:$0xff] }
0x1ddd   :  { %9077 = vmatprep.subr.mxu1 %v108_v31 }
0x1dde   :  { %9078 = vmatpush3.msra.mxu1 %v108_v31 }
0x1ddf   :  { %9093 = vmatprep.subr.mxu1 %v123_v27 }
0x1e9b   :  { %v9069_v49 = vpop.f32.mrf.mxu1 }
0x1e9c   :  { %v4092_v6 = vadd.f32 %v9069_v49, %v8139_v47 }
0x1e9d   :  { %v4086_v15 = vpop.f32.mrf.mxu1 }
0x1e9e   :  { %v4096_v22 = vmul.f32 0.01, %v4092_v6  ;;  %v4087_v41 = vadd.f32 %v8139_v47, %v4086_v15 }
0x1ea0   :  { %v4098_v30 = vmax.f32 %v4092_v6, %v4096_v22  ;;  %v4095_v43 = vmul.f32 0.01, %v4087_v41  ;;  %v8154_v22 = vld [vmem:[#allocation6 + $0xf8] ss:$0 sm:$0xff] }
0x1ea2   :  { %v4097_v14 = vmax.f32 %v4087_v41, %v4095_v43  ;;  %4101 = vst.msk [vmem:[%s11214_s3 + $0x8] sm:$0xff] %vm4099_vm8, %v4098_v30 }
0x1ea4   :  { %4100 = vst.msk [vmem:[%s11214_s3] sm:$0xff] %vm4099_vm8, %v4097_v14  ;;  %9072 = vmatprep.mubr.msk.f32.mxu0 %vm4099_vm8, %v4097_v14  ;;  %s9717_s3 = smov 96  }
0x1ea5   :  { %9073 = vmatmul.mubr.msk.f32.vlgmr.msra.gmra.mxu0 %vm4099_vm8, %v4098_v30 }
0x1ea6   :  { %9083 = vmatpush3.msra.mxu0 %v114_v54 }
0x1ea7   :  { %9084 = vmatprep.subr.mxu0 %v113_v60 }
0x1ea8   :  { %9085 = vmatpush3.msra.mxu0 %v113_v60 }
0x1ea9   :  { %9086 = vmatprep.subr.mxu0 %v112_v57 }
0x1eaa   :  { %9087 = vmatpush3.msra.mxu0 %v112_v57 }
0x1eab   :  { %9088 = vmatprep.subr.mxu0 %v111_v4 }
0x1eac   :  { %9089 = vmatpush3.msra.mxu0 %v111_v4  ;;  %v10646_v4 = vld [vmem:[#allocation6 + $0x110] sm:$0xff] }
0x1ead   :  { %9112 = vmatprep.subr.mxu0 %v70_v37 }
0x1f65   :  { %v9074_v20 = vpop.f32.mrf.mxu0 }
0x1f66   :  { %v4184_v17 = vadd.f32 %v9074_v20, %v8142_v19 }
0x1f67   :  { %v4178_v23 = vpop.f32.mrf.mxu0 }
0x1f68   :  { %v4179_v2 = vadd.f32 %v8142_v19, %v4178_v23  ;;  %v4188_v24 = vmul.f32 0.01, %v4184_v17 }
0x1f6a   :  { %v4187_v26 = vmul.f32 0.01, %v4179_v2  ;;  %v4190_v51 = vmax.f32 %v4184_v17, %v4188_v24 }
0x1f6c   :  { %v4189_v29 = vmax.f32 %v4179_v2, %v4187_v26 }
0x1f6e   :  { %9079 = vmatprep.mubr.msk.f32.mxu1 %vm138_vm1, %v4189_v29 }
0x1f6f   :  { %9080 = vmatmul.mubr.msk.f32.vlgmr.msra.gmra.mxu1 %vm138_vm1, %v4190_v51 }
0x1f70   :  { %9094 = vmatpush3.msra.mxu1 %v123_v27 }
0x1f71   :  { %9095 = vmatprep.subr.mxu1 %v122_v7 }
0x1f72   :  { %9096 = vmatpush3.msra.mxu1 %v122_v7 }
0x1f73   :  { %9097 = vmatprep.subr.mxu1 %v121_v8 }
0x1f74   :  { %9098 = vmatpush3.msra.mxu1 %v121_v8  ;;  %v10658_v8 = vld [vmem:[#allocation6 + $0x108] sm:$0xff] }
0x1f75   :  { %9099 = vmatprep.subr.mxu1 %v120_v59 }
0x1f76   :  { %9100 = vmatpush3.msra.mxu1 %v120_v59 }
0x1f77   :  { %9101 = vmatprep.subr.mxu1 %v119_v38 }
0x1f78   :  { %9102 = vmatpush3.msra.mxu1 %v119_v38 }
0x1f79   :  { %9103 = vmatprep.subr.mxu1 %v118_v35 }
0x1f7a   :  { %9104 = vmatpush3.msra.mxu1 %v118_v35 }
0x1f7b   :  { %9105 = vmatprep.subr.mxu1 %v117_v61 }
0x1f7c   :  { %9106 = vmatpush3.msra.mxu1 %v117_v61 }
0x1f7d   :  { %9107 = vmatprep.subr.mxu1 %v116_v62 }
0x1f7e   :  { %9108 = vmatpush3.msra.mxu1 %v116_v62 }
0x1f7f   :  { %9130 = vmatprep.subr.mxu1 %v9712_v0 }
0x202f   :  { %v9081_v50 = vpop.f32.mrf.mxu1 }
0x2030   :  { %v4273_v33 = vadd.f32 %v9081_v50, %v8145_v25  ;;  %v10661_v50 = vld [vmem:[#allocation6 + $0x100] sm:$0xff] }
0x2031   :  { %v4267_v34 = vpop.f32.mrf.mxu1 }
0x2032   :  { %v4268_v56 = vadd.f32 %v8145_v25, %v4267_v34  ;;  %v4277_v13 = vmul.f32 0.01, %v4273_v33 }
0x2034   :  { %v4276_v28 = vmul.f32 0.01, %v4268_v56  ;;  %v4279_v58 = vmax.f32 %v4273_v33, %v4277_v13 }
0x2036   :  { %v4278_v11 = vmax.f32 %v4268_v56, %v4276_v28  ;;  %v10676_v56 = vld [vmem:[#allocation6 + $0x120] ss:$0 sm:$0xff] }
0x2038   :  { %9090 = vmatprep.mubr.msk.f32.mxu0 %vm228_vm5, %v4278_v11 }
0x2039   :  { %9091 = vmatmul.mubr.msk.f32.vlgmr.msra.gmra.mxu0 %vm228_vm5, %v4279_v58 }
0x203a   :  { %9113 = vmatpush3.msra.mxu0 %v70_v37 }
0x203b   :  { %9114 = vmatprep.subr.mxu0 %v69_v39 }
0x203c   :  { %9115 = vmatpush3.msra.mxu0 %v69_v39 }
0x203d   :  { %9116 = vmatprep.subr.mxu0 %v68_v45 }
0x203e   :  { %9117 = vmatpush3.msra.mxu0 %v68_v45 }
0x203f   :  { %9118 = vmatprep.subr.mxu0 %v67_v44 }
0x2040   :  { %9119 = vmatpush3.msra.mxu0 %v67_v44 }
0x2041   :  { %9123 = vmatprep.subr.mxu0 %v9712_v0 }
0x20f9   :  { %v9092_v55 = vpop.f32.mrf.mxu0 }
0x20fa   :  { %v4362_v1 = vadd.f32 %v9092_v55, %v8148_v63 }
0x20fb   :  { %v4356_v3 = vpop.f32.mrf.mxu0 }
0x20fc   :  { %v4357_v5 = vadd.f32 %v8148_v63, %v4356_v3  ;;  %v4366_v21 = vmul.f32 0.01, %v4362_v1 }
0x20fe   :  { %v4365_v9 = vmul.f32 0.01, %v4357_v5  ;;  %v4368_v46 = vmax.f32 %v4362_v1, %v4366_v21 }
0x2100   :  { %v4367_v12 = vmax.f32 %v4357_v5, %v4365_v9 }
0x2102   :  { %9109 = vmatprep.mubr.msk.f32.mxu1 %vm3835_vm7, %v4367_v12 }
0x2103   :  { %9110 = vmatmul.mubr.msk.f32.vlgmr.msra.gmra.mxu1 %vm3835_vm7, %v4368_v46 }
0x2104   :  { %9134 = vmatprep.mubr.msk.f32.mxu1 %vm9713_vm0, %v9712_v0  ;;  %9131 = vmatpush3.msra.mxu1 %v10600_v18 }
0x2105   :  { %9132 = vmatprep.subr.mxu1 %v9712_v0 }
0x2106   :  { %9133 = vmatpush3.msra.mxu1 %v10604_v40 }
0x2107   :  { %9144 = vmatprep.subr.mxu1 %v9712_v0 }
0x21c3   :  { %v9111_v52 = vpop.f32.mrf.mxu1 }
0x21c4   :  { %v4451_v32 = vadd.f32 %v9111_v52, %v8151_v42 }
0x21c5   :  { %v4445_v53 = vpop.f32.mrf.mxu1 }
0x21c6   :  { %v4446_v48 = vadd.f32 %v8151_v42, %v4445_v53  ;;  %v4455_v47 = vmul.f32 0.01, %v4451_v32 }
0x21c8   :  { %v4454_v49 = vmul.f32 0.01, %v4446_v48  ;;  %v4457_v15 = vmax.f32 %v4451_v32, %v4455_v47 }
0x21ca   :  { %v4456_v6 = vmax.f32 %v4446_v48, %v4454_v49 }
0x21cc   :  { %9120 = vmatprep.mubr.msk.f32.mxu0 %vm228_vm5, %v4456_v6 }
0x21cd   :  { %9121 = vmatmul.mubr.msk.f32.vlgmr.msra.gmra.mxu0 %vm228_vm5, %v4457_v15 }
0x21ce   :  { %9124 = vmatpush3.msra.mxu0 %v10600_v18  ;;  %9127 = vmatprep.mubr.msk.f32.mxu0 %vm9713_vm0, %v9712_v0 }
0x21cf   :  { %9125 = vmatprep.subr.mxu0 %v9712_v0 }
0x21d0   :  { %9126 = vmatpush3.msra.mxu0 %v10604_v40 }
0x21d1   :  { %9128 = vmatmul.mubr.f32.vlgmr.msra.gmra.mxu0 %v9712_v0  ;;  %9137 = vmatprep.subr.mxu0 %v9712_v0 }
0x21d2   :  { %9141 = vmatprep.mubr.msk.f32.mxu0 %vm9713_vm0, %v9712_v0  ;;  %9138 = vmatpush3.msra.mxu0 %v10641_v16 }
0x21d3   :  { %9139 = vmatprep.subr.mxu0 %v9712_v0 }
0x21d4   :  { %9140 = vmatpush3.msra.mxu0 %v10646_v4 }
0x21d5   :  { %9142 = vmatmul.mubr.f32.vlgmr.msra.gmra.mxu0 %v9712_v0  ;;  %9151 = vmatprep.subr.mxu0 %v9712_v0 }
0x21d6   :  { %9152 = vmatpush3.msra.mxu0 %v10600_v18  ;;  %9155 = vmatprep.mubr.msk.f32.mxu0 %vm9713_vm0, %v9712_v0 }
0x21d7   :  { %9153 = vmatprep.subr.mxu0 %v9712_v0 }
0x21d8   :  { %9154 = vmatpush3.msra.mxu0 %v10604_v40 }
0x21d9   :  { %9165 = vmatprep.subr.mxu0 %v9712_v0 }
0x228d   :  { %v9122_v41 = vpop.f32.mrf.mxu0 }
0x228e   :  { %v10622_v30 = vadd.f32 %v9122_v41, %v8154_v22 }
0x228f   :  { %v4539_v43 = vpop.f32.mrf.mxu0 }
0x2290   :  { %v10624_v14 = vadd.f32 %v8154_v22, %v4539_v43 }
0x2291   :  { %v4624_v31 = vpop.f32.mrf.mxu0 }
0x2292   :  { %v4628_v19 = vadd.f32 %v4624_v31, %v10624_v14 }
0x2293   :  { %v9129_v20 = vpop.f32.mrf.mxu0 }
0x2294   :  { %v4629_v17 = vmul.f32 %v4628_v19, %v10627_v36  ;;  %v10701_v20 = vld [vmem:[#allocation6 + $0x140] sm:$0xff] }
0x2295   :  { %v4819_v33 = vpop.f32.mrf.mxu0 }
0x2296   :  { %9512 = vtanh.f32 %v4629_v17  ;;  %v4820_v11 = vadd.f32 %v10676_v56, %v4819_v33  ;;  %v10710_v17 = vld [vmem:[#allocation6 + $0x138] sm:$0xff] }
0x2297   :  { %v9143_v34 = vpop.f32.mrf.mxu0 }
0x22a3   :  { %v9513_v23 = vpop.eup %9512 }
0x22a4   :  { %v4631_v2 = vmul.f32 %v9513_v23, %v10627_v36  ;;  %v10714_v23 = vld [vmem:[#allocation6 + $0x130] sm:$0xff] }
0x22a6   :  { %v4632_v24 = vadd.f32 %v4631_v2, %v10632_v10  ;;  %v10721_v2 = vld [vmem:[#allocation6 + $0x128] sm:$0xff] }
0x22a8   :  { %4635 = vrot.lane.b32.xlu0 %v4632_v24, %s9717_s3  ;;  %v4633_v51 = vmul.f32 0.0, %v4632_v24 }
0x231a   :  { %v4636_v26 = vpop.permute.xlu0 %4635 }
0x231b   :  { %v4638_v29 = vmul.f32 %v4636_v26, %v4632_v24 }
0x231d   :  { %4640 = vrot.lane.b32.xlu1 %v4638_v29, %s9718_s28 }
0x238f   :  { %v4641_v54 = vpop.permute.xlu1 %4640 }
0x2390   :  { %v10638_v60 = vadd.f32 %v4641_v54, %v4633_v51 }
0x2392   :  { %9514 = vtanh.f32 %v10638_v60  ;;  %v4734_v45 = vrot.slane %v10638_v60, 6 }
0x239f   :  { %v9515_v57 = vpop.eup %9514 }
0x23a0   :  { %4646 = vrot.lane.b32.xlu0 %v9515_v57, %s9716_s1 }
0x2412   :  { %v4647_v27 = vpop.permute.xlu0 %4646 }
0x2413   :  { %v4649_v7 = vmul.f32 %v4647_v27, %v4632_v24 }
0x2415   :  { %4651 = vrot.lane.b32.xlu1 %v4649_v7, %s9719_s29  ;;  %v10746_v7 = vld [vmem:[#allocation6 + $0x148] ss:$0 sm:$0xff] }
0x2487   :  { %v4652_v25 = vpop.permute.xlu1 %4651 }
0x2488   :  { %9135 = vmatmul.mubr.msk.f32.vlgmr.msra.gmra.mxu1 %vm138_vm1, %v4652_v25 }
0x2489   :  { %9145 = vmatpush3.msra.mxu1 %v10658_v8  ;;  %9148 = vmatprep.mubr.msk.f32.mxu1 %vm9713_vm0, %v9712_v0 }
0x248a   :  { %9146 = vmatprep.subr.mxu1 %v9712_v0 }
0x248b   :  { %9147 = vmatpush3.msra.mxu1 %v10661_v50 }
0x248c   :  { %9149 = vmatmul.mubr.msk.f32.vlgmr.msra.gmra.mxu1 %vm138_vm1, %v4652_v25  ;;  %9158 = vmatprep.subr.mxu1 %v9712_v0 }
0x248d   :  { %9159 = vmatpush3.msra.mxu1 %v10641_v16  ;;  %9162 = vmatprep.mubr.msk.f32.mxu1 %vm9713_vm0, %v9712_v0 }
0x248e   :  { %9160 = vmatprep.subr.mxu1 %v9712_v0 }
0x248f   :  { %9161 = vmatpush3.msra.mxu1 %v10646_v4 }
0x2490   :  { %9172 = vmatprep.subr.mxu1 %v9712_v0 }
0x2548   :  { %v4721_v13 = vpop.f32.mrf.mxu1 }
0x2549   :  { %v4726_v28 = vrot.slane %v4721_v13, 6 }
0x254a   :  { %v9136_v58 = vpop.f32.mrf.mxu1 }
0x254b   :  { %v4728_v59 = vadd.f32 %v4726_v28, %v10624_v14 }
0x254c   :  { %v4889_v38 = vpop.f32.mrf.mxu1 }
0x254d   :  { %v4729_v35 = vmul.f32 %v4728_v59, %v10627_v36  ;;  %v4893_v61 = vadd.f32 %v4889_v38, %v4820_v11 }
0x254e   :  { %v9150_v62 = vpop.f32.mrf.mxu1 }
0x254f   :  { %9516 = vtanh.f32 %v4729_v35  ;;  %v4894_v63 = vmul.f32 %v4893_v61, %v10627_v36 }
0x2551   :  { %9518 = vtanh.f32 %v4894_v63 }
0x255c   :  { %v9517_v55 = vpop.eup %9516 }
0x255d   :  { %v4731_v1 = vmul.f32 %v9517_v55, %v10627_v36 }
0x255e   :  { %v9519_v3 = vpop.eup %9518 }
0x255f   :  { %v4732_v5 = vadd.f32 %v4731_v1, %v10632_v10  ;;  %v4896_v21 = vmul.f32 %v9519_v3, %v10627_v36 }
0x2561   :  { %4738 = vrot.lane.b32.xlu0 %v4732_v5, %s9717_s3  ;;  %v4897_v9 = vadd.f32 %v4896_v21, %v10632_v10  ;;  %v4736_v44 = vmul.f32 %v4734_v45, %v4732_v5 }
0x2563   :  { %4900 = vrot.lane.b32.xlu1 %v4897_v9, %s9717_s3  ;;  %v4898_v32 = vmul.f32 0.0, %v4897_v9 }
0x25d3   :  { %v4739_v12 = vpop.permute.xlu0 %4738 }
0x25d4   :  { %v4741_v46 = vmul.f32 %v4739_v12, %v4732_v5 }
0x25d5   :  { %v4901_v37 = vpop.permute.xlu1 %4900 }
0x25d6   :  { %v4903_v39 = vmul.f32 %v4901_v37, %v4897_v9  ;;  %4743 = vrot.lane.b32.xlu0 %v4741_v46, %s9718_s28 }
0x25d8   :  { %4905 = vrot.lane.b32.xlu1 %v4903_v39, %s9718_s28 }
0x2648   :  { %v4744_v42 = vpop.permute.xlu0 %4743 }
0x2649   :  { %v10691_v52 = vadd.f32 %v4744_v42, %v4736_v44 }
0x264a   :  { %v4906_v53 = vpop.permute.xlu1 %4905 }
0x264b   :  { %9520 = vtanh.f32 %v10691_v52  ;;  %v10694_v48 = vadd.f32 %v4906_v53, %v4898_v32  ;;  %v5000_v32 = vrot.slane %v10691_v52, 6 }
0x264d   :  { %9522 = vtanh.f32 %v10694_v48 }
0x2658   :  { %v9521_v47 = vpop.eup %9520 }
0x2659   :  { %4749 = vrot.lane.b32.xlu0 %v9521_v47, %s9716_s1 }
0x265a   :  { %v9523_v49 = vpop.eup %9522 }
0x265b   :  { %4911 = vrot.lane.b32.xlu1 %v9523_v49, %s9716_s1 }
0x26cb   :  { %v4750_v6 = vpop.permute.xlu0 %4749 }
0x26cc   :  { %v4752_v15 = vmul.f32 %v4750_v6, %v4732_v5 }
0x26cd   :  { %v4912_v22 = vpop.permute.xlu1 %4911 }
0x26ce   :  { %v4916_v41 = vrot.slane %v4752_v15, 2  ;;  %v4914_v43 = vmul.f32 %v4912_v22, %v4897_v9 }
0x26d0   :  { %4917 = vrot.lane.b32.xlu0 %v4916_v41, %s9719_s29  ;;  %5020 = vrot.lane.b32.xlu1 %v4914_v43, %s9719_s29 }
0x2742   :  { %v4918_v31 = vpop.permute.xlu0 %4917  ;;  %v5021_v19 = vpop.permute.xlu1 %5020 }
0x2743   :  { %9156 = vmatmul.mubr.msk.f32.vlgmr.msra.gmra.mxu0 %vm138_vm1, %v4918_v31  ;;  %9163 = vmatmul.mubr.msk.f32.vlgmr.msra.gmra.mxu1 %vm138_vm1, %v5021_v19 }
0x2744   :  { %9166 = vmatpush3.msra.mxu0 %v10658_v8  ;;  %9169 = vmatprep.mubr.msk.f32.mxu0 %vm9713_vm0, %v9712_v0 }
0x2745   :  { %9167 = vmatprep.subr.mxu0 %v9712_v0  ;;  %9173 = vmatpush3.msra.mxu1 %v10701_v20 }
0x2746   :  { %9168 = vmatpush3.msra.mxu0 %v10661_v50  ;;  %9174 = vmatprep.subr.mxu1 %v9712_v0 }
0x2747   :  { %9170 = vmatmul.mubr.msk.f32.vlgmr.msra.gmra.mxu0 %vm138_vm1, %v4918_v31  ;;  %9179 = vmatprep.subr.mxu0 %v9712_v0 }
0x2748   :  { %9175 = vmatpush3.msra.mxu1 %v10710_v17  ;;  %9176 = vmatprep.mubr.msk.f32.mxu1 %vm9713_vm0, %v9712_v0 }
0x2749   :  { %9180 = vmatpush3.msra.mxu0 %v10714_v23  ;;  %9177 = vmatmul.mubr.f32.vlgmr.msra.gmra.mxu1 %v9712_v0 }
0x274a   :  { %9181 = vmatprep.subr.mxu0 %v9712_v0  ;;  %9183 = vmatprep.mubr.msk.f32.mxu0 %vm9713_vm0, %v9712_v0 }
0x274b   :  { %9182 = vmatpush3.msra.mxu0 %v10721_v2  ;;  %9186 = vmatprep.subr.mxu1 %v9712_v0 }
0x274c   :  { %9184 = vmatmul.mubr.msk.f32.vlgmr.msra.gmra.mxu0 %vm138_vm1, %v5021_v19  ;;  %9187 = vmatpush3.msra.mxu1 %v10600_v18 }
0x274d   :  { %9193 = vmatprep.subr.mxu0 %v9712_v0  ;;  %9188 = vmatprep.subr.mxu1 %v9712_v0 }
0x274e   :  { %9194 = vmatpush3.msra.mxu0 %v10641_v16  ;;  %9189 = vmatpush3.msra.mxu1 %v10604_v40 }
0x274f   :  { %9195 = vmatprep.subr.mxu0 %v9712_v0  ;;  %9190 = vmatprep.mubr.msk.f32.mxu1 %vm9713_vm0, %v9712_v0 }
0x2750   :  { %9196 = vmatpush3.msra.mxu0 %v10646_v4  ;;  %9197 = vmatprep.mubr.msk.f32.mxu0 %vm9713_vm0, %v9712_v0 }
0x2751   :  { %9200 = vmatprep.subr.mxu1 %v9712_v0  ;;  %9207 = vmatprep.subr.mxu0 %v9712_v0 }
0x2803   :  { %v4987_v24 = vpop.f32.mrf.mxu0  ;;  %v5090_v26 = vpop.f32.mrf.mxu1 }
0x2804   :  { %v4992_v29 = vrot.slane %v4987_v24, 4  ;;  %v5091_v57 = vadd.f32 %v10676_v56, %v5090_v26 }
0x2805   :  { %v9157_v51 = vpop.f32.mrf.mxu0  ;;  %v9164_v54 = vpop.f32.mrf.mxu1 }
0x2806   :  { %v4994_v60 = vadd.f32 %v4992_v29, %v10624_v14 }
0x2807   :  { %v5160_v27 = vpop.f32.mrf.mxu0 }
0x2808   :  { %v4995_v25 = vmul.f32 %v4994_v60, %v10627_v36  ;;  %v5164_v33 = vadd.f32 %v5160_v27, %v5091_v57 }
0x2809   :  { %v9171_v34 = vpop.f32.mrf.mxu0  ;;  %v5252_v13 = vpop.f32.mrf.mxu1 }
0x280a   :  { %9524 = vtanh.f32 %v4995_v25  ;;  %v5165_v28 = vmul.f32 %v5164_v33, %v10627_v36  ;;  %v5253_v11 = vadd.f32 %v10746_v7, %v5252_v13 }
0x280b   :  { %v9178_v58 = vpop.f32.mrf.mxu1 }
0x280c   :  { %9526 = vtanh.f32 %v5165_v28  ;;  %v5322_v59 = vpop.f32.mrf.mxu0 }
0x280d   :  { %v5326_v38 = vadd.f32 %v5322_v59, %v5253_v11 }
0x280e   :  { %v9185_v35 = vpop.f32.mrf.mxu0 }
0x280f   :  { %v5327_v61 = vmul.f32 %v5326_v38, %v10627_v36 }
0x2811   :  { %9528 = vtanh.f32 %v5327_v61 }
0x2817   :  { %v9525_v62 = vpop.eup %9524 }
0x2818   :  { %v4997_v63 = vmul.f32 %v9525_v62, %v10627_v36 }
0x2819   :  { %v9527_v55 = vpop.eup %9526 }
0x281a   :  { %v4998_v1 = vadd.f32 %v4997_v63, %v10632_v10  ;;  %v5167_v3 = vmul.f32 %v9527_v55, %v10627_v36 }
0x281c   :  { %5004 = vrot.lane.b32.xlu0 %v4998_v1, %s9717_s3  ;;  %v5168_v5 = vadd.f32 %v5167_v3, %v10632_v10  ;;  %v5002_v53 = vmul.f32 %v5000_v32, %v4998_v1 }
0x281e   :  { %v9529_v21 = vpop.eup %9528  ;;  %5171 = vrot.lane.b32.xlu1 %v5168_v5, %s9717_s3  ;;  %v5169_v6 = vmul.f32 %v5168_v5, %v10694_v48 }
0x281f   :  { %v5329_v9 = vmul.f32 %v9529_v21, %v10627_v36 }
0x2821   :  { %v5330_v12 = vadd.f32 %v5329_v9, %v10632_v10 }
0x2823   :  { %5333 = vrot.lane.b32.xlu0 %v5330_v12, %s9717_s3  ;;  %v5331_v41 = vmul.f32 0.0, %v5330_v12 }
0x288e   :  { %v5005_v46 = vpop.permute.xlu0 %5004 }
0x288f   :  { %v5007_v37 = vmul.f32 %v5005_v46, %v4998_v1 }
0x2890   :  { %v5172_v39 = vpop.permute.xlu1 %5171 }
0x2891   :  { %v5174_v45 = vmul.f32 %v5172_v39, %v5168_v5  ;;  %5009 = vrot.lane.b32.xlu1 %v5007_v37, %s9718_s28 }
0x2893   :  { %5176 = vrot.lane.b32.xlu0 %v5174_v45, %s9718_s28 }
0x2895   :  { %v5334_v44 = vpop.permute.xlu0 %5333 }
0x2896   :  { %v5336_v42 = vmul.f32 %v5334_v44, %v5330_v12 }
0x2898   :  { %5338 = vrot.lane.b32.xlu1 %v5336_v42, %s9718_s28 }
0x2903   :  { %v5010_v47 = vpop.permute.xlu1 %5009 }
0x2904   :  { %v10765_v49 = vadd.f32 %v5010_v47, %v5002_v53 }
0x2905   :  { %v5177_v15 = vpop.permute.xlu0 %5176 }
0x2906   :  { %9530 = vtanh.f32 %v10765_v49  ;;  %v10769_v22 = vadd.f32 %v5177_v15, %v5169_v6 }
0x2908   :  { %9532 = vtanh.f32 %v10769_v22 }
0x290a   :  { %v5339_v43 = vpop.permute.xlu1 %5338 }
0x290b   :  { %v10772_v31 = vadd.f32 %v5339_v43, %v5331_v41 }
0x290d   :  { %9534 = vtanh.f32 %v10772_v31 }
0x2913   :  { %v9531_v52 = vpop.eup %9530 }
0x2914   :  { %5015 = vrot.lane.b32.xlu0 %v9531_v52, %s9716_s1 }
0x2915   :  { %v9533_v19 = vpop.eup %9532 }
0x2916   :  { %5182 = vrot.lane.b32.xlu1 %v9533_v19, %s9716_s1 }
0x291a   :  { %v9535_v48 = vpop.eup %9534 }
0x291b   :  { %5344 = vrot.lane.b32.xlu0 %v9535_v48, %s9716_s1  ;;  %v5439_v48 = vrot.slane %v10765_v49, 6 }
0x2986   :  { %v5016_v24 = vpop.permute.xlu0 %5015 }
0x2987   :  { %v5018_v26 = vmul.f32 %v5016_v24, %v4998_v1 }
0x2988   :  { %v5183_v29 = vpop.permute.xlu1 %5182 }
0x2989   :  { %v5355_v51 = vrot.slane %v5018_v26, 4  ;;  %v5185_v54 = vmul.f32 %v5183_v29, %v5168_v5 }
0x298b   :  { %5356 = vrot.lane.b32.xlu1 %v5355_v51, %s9719_s29  ;;  %5459 = vrot.lane.b32.xlu0 %v5185_v54, %s9719_s29 }
0x298d   :  { %v5345_v60 = vpop.permute.xlu0 %5344 }
0x298e   :  { %v5347_v57 = vmul.f32 %v5345_v60, %v5330_v12 }
0x2990   :  { %5349 = vrot.lane.b32.xlu1 %v5347_v57, %s9719_s29 }
0x29fd   :  { %v5357_v27 = vpop.permute.xlu1 %5356  ;;  %v5460_v25 = vpop.permute.xlu0 %5459 }
0x29fe   :  { %9191 = vmatmul.mubr.msk.f32.vlgmr.msra.gmra.mxu1 %vm138_vm1, %v5357_v27  ;;  %9198 = vmatmul.mubr.msk.f32.vlgmr.msra.gmra.mxu0 %vm138_vm1, %v5460_v25 }
0x29ff   :  { %9201 = vmatpush3.msra.mxu1 %v10658_v8  ;;  %9208 = vmatpush3.msra.mxu0 %v10701_v20 }
0x2a00   :  { %9202 = vmatprep.subr.mxu1 %v9712_v0  ;;  %9209 = vmatprep.subr.mxu0 %v9712_v0 }
0x2a01   :  { %9203 = vmatpush3.msra.mxu1 %v10661_v50  ;;  %9204 = vmatprep.mubr.msk.f32.mxu1 %vm9713_vm0, %v9712_v0 }
0x2a02   :  { %v5350_v33 = vpop.permute.xlu1 %5349  ;;  %9210 = vmatpush3.msra.mxu0 %v10710_v17  ;;  %9211 = vmatprep.mubr.msk.f32.mxu0 %vm9713_vm0, %v9712_v0 }
0x2a03   :  { %5353 = vst.msk [vmem:[#allocation8] sm:$0x3] %vm5352_vm12, %v5350_v33  ;;  %9205 = vmatmul.mubr.msk.f32.vlgmr.msra.gmra.mxu1 %vm138_vm1, %v5357_v27  ;;  %9212 = vmatmul.mubr.msk.f32.vlgmr.msra.gmra.mxu0 %vm138_vm1, %v5350_v33 }
0x2a04   :  { %9214 = vmatprep.subr.mxu1 %v9712_v0  ;;  %9218 = vmatprep.mubr.msk.f32.mxu1 %vm9713_vm0, %v9712_v0 }
0x2a05   :  { %9215 = vmatpush3.msra.mxu1 %v10714_v23  ;;  %9221 = vmatprep.subr.mxu0 %v9712_v0 }
0x2a06   :  { %9216 = vmatprep.subr.mxu1 %v9712_v0  ;;  %9222 = vmatpush3.msra.mxu0 %v10600_v18 }
0x2a07   :  { %9217 = vmatpush3.msra.mxu1 %v10721_v2  ;;  %9223 = vmatprep.subr.mxu0 %v9712_v0 }
0x2a08   :  { %9219 = vmatmul.mubr.msk.f32.vlgmr.msra.gmra.mxu1 %vm138_vm1, %v5460_v25  ;;  %9228 = vmatprep.subr.mxu1 %v9712_v0 }
0x2a09   :  { %9229 = vmatpush3.msra.mxu1 %v10641_v16  ;;  %9224 = vmatpush3.msra.mxu0 %v10604_v40 }
0x2a0a   :  { %9230 = vmatprep.subr.mxu1 %v9712_v0  ;;  %9225 = vmatprep.mubr.msk.f32.mxu0 %vm9713_vm0, %v9712_v0 }
0x2a0b   :  { %9231 = vmatpush3.msra.mxu1 %v10646_v4  ;;  %9232 = vmatprep.mubr.msk.f32.mxu1 %vm9713_vm0, %v9712_v0 }
0x2a0c   :  { %9235 = vmatprep.subr.mxu0 %v9712_v0  ;;  %9242 = vmatprep.subr.mxu1 %v9712_v0 }
0x2abe   :  { %v5426_v34 = vpop.f32.mrf.mxu1  ;;  %v5529_v13 = vpop.f32.mrf.mxu0 }
0x2abf   :  { %v5431_v28 = vrot.slane %v5426_v34, 2  ;;  %v5530_v38 = vadd.f32 %v10676_v56, %v5529_v13 }
0x2ac0   :  { %v9192_v11 = vpop.f32.mrf.mxu1  ;;  %v9199_v58 = vpop.f32.mrf.mxu0 }
0x2ac1   :  { %v5433_v59 = vadd.f32 %v5431_v28, %v10624_v14 }
0x2ac3   :  { %v5434_v35 = vmul.f32 %v5433_v59, %v10627_v36  ;;  %v5599_v61 = vpop.f32.mrf.mxu1  ;;  %v5693_v62 = vpop.f32.mrf.mxu0 }
0x2ac4   :  { %v5603_v63 = vadd.f32 %v5599_v61, %v5530_v38  ;;  %v5694_v5 = vadd.f32 %v10746_v7, %v5693_v62 }
0x2ac5   :  { %9536 = vtanh.f32 %v5434_v35  ;;  %v9206_v55 = vpop.f32.mrf.mxu1  ;;  %v9213_v1 = vpop.f32.mrf.mxu0 }
0x2ac6   :  { %v5604_v3 = vmul.f32 %v5603_v63, %v10627_v36 }
0x2ac8   :  { %9538 = vtanh.f32 %v5604_v3  ;;  %v5763_v21 = vpop.f32.mrf.mxu1 }
0x2ac9   :  { %v5767_v9 = vadd.f32 %v5763_v21, %v5694_v5 }
0x2aca   :  { %v9220_v12 = vpop.f32.mrf.mxu1 }
0x2acb   :  { %v5768_v14 = vmul.f32 %v5767_v9, %v10627_v36 }
0x2acd   :  { %9540 = vtanh.f32 %v5768_v14 }
0x2ad2   :  { %v9537_v46 = vpop.eup %9536 }
0x2ad3   :  { %v5436_v37 = vmul.f32 %v9537_v46, %v10627_v36 }
0x2ad5   :  { %v9539_v39 = vpop.eup %9538  ;;  %v5437_v45 = vadd.f32 %v5436_v37, %v10632_v10 }
0x2ad6   :  { %v5606_v44 = vmul.f32 %v9539_v39, %v10627_v36 }
0x2ad7   :  { %5443 = vrot.lane.b32.xlu0 %v5437_v45, %s9717_s3  ;;  %v5441_v24 = vmul.f32 %v5439_v48, %v5437_v45 }
0x2ad8   :  { %v5607_v42 = vadd.f32 %v5606_v44, %v10632_v10 }
0x2ada   :  { %v9541_v32 = vpop.eup %9540  ;;  %5610 = vrot.lane.b32.xlu1 %v5607_v42, %s9717_s3  ;;  %v5608_v51 = vmul.f32 %v5607_v42, %v10769_v22 }
0x2adb   :  { %v5770_v53 = vmul.f32 %v9541_v32, %v10627_v36 }
0x2add   :  { %v5771_v47 = vadd.f32 %v5770_v53, %v10632_v10 }
0x2adf   :  { %5774 = vrot.lane.b32.xlu0 %v5771_v47, %s9717_s3  ;;  %v5772_v57 = vmul.f32 %v5771_v47, %v10772_v31 }
0x2b49   :  { %v5444_v6 = vpop.permute.xlu0 %5443 }
0x2b4a   :  { %v5446_v15 = vmul.f32 %v5444_v6, %v5437_v45 }
0x2b4c   :  { %v5611_v41 = vpop.permute.xlu1 %5610  ;;  %5448 = vrot.lane.b32.xlu1 %v5446_v15, %s9718_s28 }
0x2b4d   :  { %v5613_v43 = vmul.f32 %v5611_v41, %v5607_v42 }
0x2b4f   :  { %5615 = vrot.lane.b32.xlu0 %v5613_v43, %s9718_s28 }
0x2b51   :  { %v5775_v52 = vpop.permute.xlu0 %5774 }
0x2b52   :  { %v5777_v19 = vmul.f32 %v5775_v52, %v5771_v47 }
0x2b54   :  { %5779 = vrot.lane.b32.xlu1 %v5777_v19, %s9718_s28 }
0x2bbe   :  { %v5449_v26 = vpop.permute.xlu1 %5448 }
0x2bbf   :  { %v10836_v29 = vadd.f32 %v5449_v26, %v5441_v24 }
0x2bc1   :  { %9542 = vtanh.f32 %v10836_v29  ;;  %v5616_v54 = vpop.permute.xlu0 %5615 }
0x2bc2   :  { %v10840_v60 = vadd.f32 %v5616_v54, %v5608_v51 }
0x2bc4   :  { %9544 = vtanh.f32 %v10840_v60 }
0x2bc6   :  { %v5780_v27 = vpop.permute.xlu1 %5779 }
0x2bc7   :  { %v10844_v25 = vadd.f32 %v5780_v27, %v5772_v57 }
0x2bc9   :  { %9546 = vtanh.f32 %v10844_v25 }
0x2bce   :  { %v9543_v49 = vpop.eup %9542 }
0x2bcf   :  { %5454 = vrot.lane.b32.xlu0 %v9543_v49, %s9716_s1 }
0x2bd1   :  { %v9545_v33 = vpop.eup %9544 }
0x2bd2   :  { %5621 = vrot.lane.b32.xlu1 %v9545_v33, %s9716_s1  ;;  %v5876_v33 = vrot.slane %v10836_v29, 6 }
0x2bd6   :  { %v9547_v22 = vpop.eup %9546 }
0x2bd7   :  { %5785 = vrot.lane.b32.xlu0 %v9547_v22, %s9716_s1 }
0x2c41   :  { %v5455_v34 = vpop.permute.xlu0 %5454 }
0x2c42   :  { %v5457_v13 = vmul.f32 %v5455_v34, %v5437_v45 }
0x2c44   :  { %v5795_v28 = vrot.slane %v5457_v13, 6  ;;  %v5622_v11 = vpop.permute.xlu1 %5621 }
0x2c45   :  { %v5624_v58 = vmul.f32 %v5622_v11, %v5607_v42 }
0x2c46   :  { %5796 = vrot.lane.b32.xlu1 %v5795_v28, %s9719_s29 }
0x2c47   :  { %5896 = vrot.lane.b32.xlu0 %v5624_v58, %s9719_s29 }
0x2c49   :  { %v5786_v31 = vpop.permute.xlu0 %5785 }
0x2c4a   :  { %v5788_v59 = vmul.f32 %v5786_v31, %v5771_v47 }
0x2c4c   :  { %5790 = vrot.lane.b32.xlu1 %v5788_v59, %s9719_s29 }
0x2cb8   :  { %v5797_v38 = vpop.permute.xlu1 %5796 }
0x2cb9   :  { %v5897_v35 = vpop.permute.xlu0 %5896  ;;  %9226 = vmatmul.mubr.msk.f32.vlgmr.msra.gmra.mxu0 %vm138_vm1, %v5797_v38 }
0x2cba   :  { %9233 = vmatmul.mubr.msk.f32.vlgmr.msra.gmra.mxu1 %vm138_vm1, %v5897_v35  ;;  %9236 = vmatpush3.msra.mxu0 %v10658_v8 }
0x2cbb   :  { %9243 = vmatpush3.msra.mxu1 %v10701_v20  ;;  %9237 = vmatprep.subr.mxu0 %v9712_v0 }
0x2cbc   :  { %9244 = vmatprep.subr.mxu1 %v9712_v0  ;;  %9238 = vmatpush3.msra.mxu0 %v10661_v50 }
0x2cbd   :  { %9239 = vmatprep.mubr.msk.f32.mxu0 %vm9713_vm0, %v9712_v0  ;;  %9245 = vmatpush3.msra.mxu1 %v10710_v17 }
0x2cbe   :  { %v5791_v61 = vpop.permute.xlu1 %5790  ;;  %9246 = vmatprep.mubr.msk.f32.mxu1 %vm9713_vm0, %v9712_v0  ;;  %9240 = vmatmul.mubr.msk.f32.vlgmr.msra.gmra.mxu0 %vm138_vm1, %v5797_v38 }
0x2cbf   :  { %5793 = vst.msk [vmem:[#allocation8 + $0x2] sm:$0x3] %vm5352_vm12, %v5791_v61  ;;  %9247 = vmatmul.mubr.msk.f32.vlgmr.msra.gmra.mxu1 %vm138_vm1, %v5791_v61  ;;  %9249 = vmatprep.subr.mxu0 %v9712_v0 }
0x2cc0   :  { %9250 = vmatpush3.msra.mxu0 %v10714_v23  ;;  %9253 = vmatprep.mubr.msk.f32.mxu0 %vm9713_vm0, %v9712_v0 }
0x2cc1   :  { %9251 = vmatprep.subr.mxu0 %v9712_v0  ;;  %9256 = vmatprep.subr.mxu1 %v9712_v0 }
0x2cc2   :  { %9252 = vmatpush3.msra.mxu0 %v10721_v2  ;;  %9257 = vmatpush3.msra.mxu1 %v10600_v18 }
0x2cc3   :  { %9254 = vmatmul.mubr.msk.f32.vlgmr.msra.gmra.mxu0 %vm138_vm1, %v5897_v35  ;;  %9258 = vmatprep.subr.mxu1 %v9712_v0 }
0x2cc4   :  { %9259 = vmatpush3.msra.mxu1 %v10604_v40  ;;  %9260 = vmatprep.mubr.msk.f32.mxu1 %vm9713_vm0, %v9712_v0 }
0x2cc5   :  { %9263 = vmatprep.subr.mxu0 %v9712_v0  ;;  %9270 = vmatprep.subr.mxu1 %v9712_v0 }
0x2cc6   :  { %9264 = vmatpush3.msra.mxu0 %v10641_v16  ;;  %9267 = vmatprep.mubr.msk.f32.mxu0 %vm9713_vm0, %v9712_v0 }
0x2cc7   :  { %9265 = vmatprep.subr.mxu0 %v9712_v0 }
0x2cc8   :  { %9266 = vmatpush3.msra.mxu0 %v10646_v4 }
0x2cc9   :  { %9277 = vmatprep.subr.mxu0 %v9712_v0 }
0x2d79   :  { %v5866_v62 = vpop.f32.mrf.mxu0 }
0x2d7a   :  { %v5870_v63 = vadd.f32 %v5866_v62, %v10622_v30  ;;  %v5966_v55 = vpop.f32.mrf.mxu1 }
0x2d7b   :  { %v9227_v1 = vpop.f32.mrf.mxu0  ;;  %v5967_v21 = vadd.f32 %v10676_v56, %v5966_v55 }
0x2d7c   :  { %v5871_v3 = vmul.f32 %v5870_v63, %v10627_v36  ;;  %v9234_v5 = vpop.f32.mrf.mxu1 }
0x2d7e   :  { %9548 = vtanh.f32 %v5871_v3  ;;  %v6036_v9 = vpop.f32.mrf.mxu0 }
0x2d7f   :  { %v6040_v12 = vadd.f32 %v6036_v9, %v5967_v21  ;;  %v6130_v14 = vpop.f32.mrf.mxu1 }
0x2d80   :  { %v9241_v46 = vpop.f32.mrf.mxu0  ;;  %v6131_v45 = vadd.f32 %v10746_v7, %v6130_v14 }
0x2d81   :  { %v6041_v37 = vmul.f32 %v6040_v12, %v10627_v36  ;;  %v9248_v39 = vpop.f32.mrf.mxu1 }
0x2d83   :  { %9550 = vtanh.f32 %v6041_v37  ;;  %v6200_v44 = vpop.f32.mrf.mxu0 }
0x2d84   :  { %v6204_v42 = vadd.f32 %v6200_v44, %v6131_v45 }
0x2d85   :  { %v9255_v32 = vpop.f32.mrf.mxu0 }
0x2d86   :  { %v6205_v53 = vmul.f32 %v6204_v42, %v10627_v36 }
0x2d88   :  { %9552 = vtanh.f32 %v6205_v53 }
0x2d8b   :  { %v9549_v47 = vpop.eup %9548 }
0x2d8c   :  { %v5873_v6 = vmul.f32 %v9549_v47, %v10627_v36 }
0x2d8e   :  { %v5874_v15 = vadd.f32 %v5873_v6, %v10632_v10 }
0x2d90   :  { %v9551_v41 = vpop.eup %9550  ;;  %5880 = vrot.lane.b32.xlu0 %v5874_v15, %s9717_s3  ;;  %v5878_v22 = vmul.f32 %v5876_v33, %v5874_v15 }
0x2d91   :  { %v6043_v43 = vmul.f32 %v9551_v41, %v10627_v36 }
0x2d93   :  { %v6044_v52 = vadd.f32 %v6043_v43, %v10632_v10 }
0x2d95   :  { %v9553_v19 = vpop.eup %9552  ;;  %6047 = vrot.lane.b32.xlu1 %v6044_v52, %s9717_s3  ;;  %v6045_v28 = vmul.f32 %v6044_v52, %v10840_v60 }
0x2d96   :  { %v6207_v48 = vmul.f32 %v9553_v19, %v10627_v36 }
0x2d98   :  { %v6208_v24 = vadd.f32 %v6207_v48, %v10632_v10 }
0x2d9a   :  { %6211 = vrot.lane.b32.xlu0 %v6208_v24, %s9717_s3  ;;  %v6209_v31 = vmul.f32 %v6208_v24, %v10844_v25 }
0x2e02   :  { %v5881_v26 = vpop.permute.xlu0 %5880 }
0x2e03   :  { %v5883_v51 = vmul.f32 %v5881_v26, %v5874_v15 }
0x2e05   :  { %5885 = vrot.lane.b32.xlu1 %v5883_v51, %s9718_s28 }
0x2e07   :  { %v6048_v54 = vpop.permute.xlu1 %6047 }
0x2e08   :  { %v6050_v57 = vmul.f32 %v6048_v54, %v6044_v52 }
0x2e0a   :  { %6052 = vrot.lane.b32.xlu0 %v6050_v57, %s9718_s28 }
0x2e0c   :  { %v6212_v27 = vpop.permute.xlu0 %6211 }
0x2e0d   :  { %v6214_v49 = vmul.f32 %v6212_v27, %v6208_v24 }
0x2e0f   :  { %6216 = vrot.lane.b32.xlu1 %v6214_v49, %s9718_s28 }
0x2e77   :  { %v5886_v34 = vpop.permute.xlu1 %5885 }
0x2e78   :  { %v10908_v13 = vadd.f32 %v5886_v34, %v5878_v22 }
0x2e7a   :  { %9554 = vtanh.f32 %v10908_v13 }
0x2e7c   :  { %v6053_v11 = vpop.permute.xlu0 %6052 }
0x2e7d   :  { %v10912_v58 = vadd.f32 %v6053_v11, %v6045_v28  ;;  %v6315_v28 = vrot.slane %v10908_v13, 6 }
0x2e7f   :  { %9556 = vtanh.f32 %v10912_v58 }
0x2e81   :  { %v6217_v59 = vpop.permute.xlu1 %6216 }
0x2e82   :  { %v10916_v38 = vadd.f32 %v6217_v59, %v6209_v31 }
0x2e84   :  { %9558 = vtanh.f32 %v10916_v38 }
0x2e87   :  { %v9555_v29 = vpop.eup %9554 }
0x2e88   :  { %5891 = vrot.lane.b32.xlu0 %v9555_v29, %s9716_s1 }
0x2e8c   :  { %v9557_v35 = vpop.eup %9556 }
0x2e8d   :  { %6058 = vrot.lane.b32.xlu1 %v9557_v35, %s9716_s1 }
0x2e91   :  { %v9559_v61 = vpop.eup %9558 }
0x2e92   :  { %6222 = vrot.lane.b32.xlu0 %v9559_v61, %s9716_s1 }
0x2efa   :  { %v5892_v60 = vpop.permute.xlu0 %5891 }
0x2efb   :  { %v5894_v62 = vmul.f32 %v5892_v60, %v5874_v15 }
0x2efd   :  { %6232 = vrot.lane.b32.xlu1 %v5894_v62, %s9719_s29 }
0x2eff   :  { %v6059_v63 = vpop.permute.xlu1 %6058 }
0x2f00   :  { %v6061_v25 = vmul.f32 %v6059_v63, %v6044_v52 }
0x2f02   :  { %6335 = vrot.lane.b32.xlu0 %v6061_v25, %s9719_s29 }
0x2f04   :  { %v6223_v55 = vpop.permute.xlu0 %6222 }
0x2f05   :  { %v6225_v1 = vmul.f32 %v6223_v55, %v6208_v24 }
0x2f07   :  { %6227 = vrot.lane.b32.xlu1 %v6225_v1, %s9719_s29 }
0x2f6f   :  { %v6233_v3 = vpop.permute.xlu1 %6232 }
0x2f70   :  { %9261 = vmatmul.mubr.msk.f32.vlgmr.msra.gmra.mxu1 %vm138_vm1, %v6233_v3 }
0x2f71   :  { %9271 = vmatpush3.msra.mxu1 %v10658_v8  ;;  %9274 = vmatprep.mubr.msk.f32.mxu1 %vm9713_vm0, %v9712_v0 }
0x2f72   :  { %9272 = vmatprep.subr.mxu1 %v9712_v0 }
0x2f73   :  { %9273 = vmatpush3.msra.mxu1 %v10661_v50 }
0x2f74   :  { %v6336_v5 = vpop.permute.xlu0 %6335  ;;  %9275 = vmatmul.mubr.msk.f32.vlgmr.msra.gmra.mxu1 %vm138_vm1, %v6233_v3  ;;  %9284 = vmatprep.subr.mxu1 %v9712_v0 }
0x2f75   :  { %9268 = vmatmul.mubr.msk.f32.vlgmr.msra.gmra.mxu0 %vm138_vm1, %v6336_v5  ;;  %9285 = vmatpush3.msra.mxu1 %v10714_v23 }
0x2f76   :  { %9278 = vmatpush3.msra.mxu0 %v10701_v20  ;;  %9286 = vmatprep.subr.mxu1 %v9712_v0 }
0x2f77   :  { %9279 = vmatprep.subr.mxu0 %v9712_v0  ;;  %9287 = vmatpush3.msra.mxu1 %v10721_v2 }
0x2f78   :  { %9288 = vmatprep.mubr.msk.f32.mxu1 %vm9713_vm0, %v9712_v0  ;;  %9280 = vmatpush3.msra.mxu0 %v10710_v17 }
0x2f79   :  { %v6228_v21 = vpop.permute.xlu1 %6227  ;;  %9281 = vmatprep.mubr.msk.f32.mxu0 %vm9713_vm0, %v9712_v0  ;;  %9289 = vmatmul.mubr.msk.f32.vlgmr.msra.gmra.mxu1 %vm138_vm1, %v6336_v5 }
0x2f7a   :  { %6230 = vst.msk [vmem:[#allocation8 + $0x4] sm:$0x3] %vm5352_vm12, %v6228_v21  ;;  %9282 = vmatmul.mubr.msk.f32.vlgmr.msra.gmra.mxu0 %vm138_vm1, %v6228_v21  ;;  %9291 = vmatprep.subr.mxu0 %v9712_v0 }
0x2f7b   :  { %9292 = vmatpush3.msra.mxu0 %v10600_v18  ;;  %9298 = vmatprep.subr.mxu1 %v9712_v0 }
0x2f7c   :  { %9293 = vmatprep.subr.mxu0 %v9712_v0  ;;  %9295 = vmatprep.mubr.msk.f32.mxu0 %vm9713_vm0, %v9712_v0 }
0x2f7d   :  { %9294 = vmatpush3.msra.mxu0 %v10604_v40  ;;  %9299 = vmatpush3.msra.mxu1 %v10641_v16 }
0x2f7e   :  { %9300 = vmatprep.subr.mxu1 %v9712_v0  ;;  %9305 = vmatprep.subr.mxu0 %v9712_v0 }
0x2f7f   :  { %9301 = vmatpush3.msra.mxu1 %v10646_v4  ;;  %9302 = vmatprep.mubr.msk.f32.mxu1 %vm9713_vm0, %v9712_v0 }
0x2f80   :  { %9312 = vmatprep.subr.mxu1 %v9712_v0 }
0x3030   :  { %v6302_v18 = vpop.f32.mrf.mxu1 }
0x3031   :  { %v6307_v9 = vrot.slane %v6302_v18, 6 }
0x3032   :  { %v9262_v12 = vpop.f32.mrf.mxu1 }
0x3033   :  { %v6309_v14 = vadd.f32 %v6307_v9, %v10622_v30 }
0x3034   :  { %v6475_v46 = vpop.f32.mrf.mxu1 }
0x3035   :  { %v6310_v40 = vmul.f32 %v6309_v14, %v10627_v36  ;;  %v6405_v16 = vpop.f32.mrf.mxu0 }
0x3036   :  { %v6406_v37 = vadd.f32 %v10676_v56, %v6405_v16  ;;  %v9276_v39 = vpop.f32.mrf.mxu1 }
0x3037   :  { %9560 = vtanh.f32 %v6310_v40  ;;  %v9269_v45 = vpop.f32.mrf.mxu0 }
0x3038   :  { %v6479_v4 = vadd.f32 %v6475_v46, %v6406_v37  ;;  %v11036_v37 = vld [vmem:[#allocation6 + $0x120] ss:$0 sm:$0xff] }
0x3039   :  { %v6639_v44 = vpop.f32.mrf.mxu1 }
0x303a   :  { %v6480_v42 = vmul.f32 %v6479_v4, %v10627_v36  ;;  %v6569_v32 = vpop.f32.mrf.mxu0 }
0x303b   :  { %v6570_v53 = vadd.f32 %v10746_v7, %v6569_v32  ;;  %v9290_v47 = vpop.f32.mrf.mxu1 }
0x303c   :  { %9562 = vtanh.f32 %v6480_v42  ;;  %v9283_v6 = vpop.f32.mrf.mxu0 }
0x303d   :  { %v6643_v15 = vadd.f32 %v6639_v44, %v6570_v53 }
0x303f   :  { %v6644_v41 = vmul.f32 %v6643_v15, %v10627_v36 }
0x3041   :  { %9564 = vtanh.f32 %v6644_v41 }
0x3044   :  { %v9561_v43 = vpop.eup %9560 }
0x3045   :  { %v6312_v56 = vmul.f32 %v9561_v43, %v10627_v36 }
0x3047   :  { %v6313_v52 = vadd.f32 %v6312_v56, %v10632_v10 }
0x3049   :  { %v9563_v19 = vpop.eup %9562  ;;  %6319 = vrot.lane.b32.xlu0 %v6313_v52, %s9717_s3  ;;  %v6317_v11 = vmul.f32 %v6315_v28, %v6313_v52 }
0x304a   :  { %v6482_v48 = vmul.f32 %v9563_v19, %v10627_v36 }
0x304c   :  { %v6483_v24 = vadd.f32 %v6482_v48, %v10632_v10 }
0x304e   :  { %v9565_v26 = vpop.eup %9564  ;;  %6486 = vrot.lane.b32.xlu1 %v6483_v24, %s9717_s3  ;;  %v6484_v29 = vmul.f32 %v6483_v24, %v10912_v58 }
0x304f   :  { %v6646_v51 = vmul.f32 %v9565_v26, %v10627_v36 }
0x3051   :  { %v6647_v54 = vadd.f32 %v6646_v51, %v10632_v10 }
0x3053   :  { %6650 = vrot.lane.b32.xlu0 %v6647_v54, %s9717_s3  ;;  %v6648_v60 = vmul.f32 %v6647_v54, %v10916_v38 }
0x30bb   :  { %v6320_v57 = vpop.permute.xlu0 %6319 }
0x30bc   :  { %v6322_v27 = vmul.f32 %v6320_v57, %v6313_v52 }
0x30be   :  { %6324 = vrot.lane.b32.xlu1 %v6322_v27, %s9718_s28 }
0x30c0   :  { %v6487_v49 = vpop.permute.xlu1 %6486 }
0x30c1   :  { %v6489_v33 = vmul.f32 %v6487_v49, %v6483_v24 }
0x30c3   :  { %6491 = vrot.lane.b32.xlu0 %v6489_v33, %s9718_s28 }
0x30c5   :  { %v6651_v22 = vpop.permute.xlu0 %6650 }
0x30c6   :  { %v6653_v34 = vmul.f32 %v6651_v22, %v6647_v54 }
0x30c8   :  { %6655 = vrot.lane.b32.xlu1 %v6653_v34, %s9718_s28 }
0x3130   :  { %v6325_v31 = vpop.permute.xlu1 %6324 }
0x3131   :  { %v10980_v59 = vadd.f32 %v6325_v31, %v6317_v11 }
0x3133   :  { %9566 = vtanh.f32 %v10980_v59  ;;  %v6755_v31 = vrot.slane %v10980_v59, 6 }
0x3135   :  { %v6492_v35 = vpop.permute.xlu0 %6491 }
0x3136   :  { %v10984_v61 = vadd.f32 %v6492_v35, %v6484_v29 }
0x3138   :  { %9568 = vtanh.f32 %v10984_v61 }
0x313a   :  { %v6656_v62 = vpop.permute.xlu1 %6655 }
0x313b   :  { %v10988_v63 = vadd.f32 %v6656_v62, %v6648_v60 }
0x313d   :  { %9570 = vtanh.f32 %v10988_v63 }
0x3140   :  { %v9567_v13 = vpop.eup %9566 }
0x3141   :  { %6330 = vrot.lane.b32.xlu0 %v9567_v13, %s9716_s1 }
0x3145   :  { %v9569_v25 = vpop.eup %9568 }
0x3146   :  { %6497 = vrot.lane.b32.xlu1 %v9569_v25, %s9716_s1 }
0x314a   :  { %v9571_v55 = vpop.eup %9570 }
0x314b   :  { %6661 = vrot.lane.b32.xlu0 %v9571_v55, %s9716_s1 }
0x31b3   :  { %v6331_v58 = vpop.permute.xlu0 %6330 }
0x31b4   :  { %v6333_v1 = vmul.f32 %v6331_v58, %v6313_v52 }
0x31b6   :  { %v6671_v3 = vrot.slane %v6333_v1, 2 }
0x31b8   :  { %v6498_v5 = vpop.permute.xlu1 %6497  ;;  %6672 = vrot.lane.b32.xlu1 %v6671_v3, %s9719_s29 }
0x31b9   :  { %v6500_v38 = vmul.f32 %v6498_v5, %v6483_v24 }
0x31bb   :  { %6775 = vrot.lane.b32.xlu0 %v6500_v38, %s9719_s29 }
0x31bd   :  { %v6662_v21 = vpop.permute.xlu0 %6661 }
0x31be   :  { %v6664_v18 = vmul.f32 %v6662_v21, %v6647_v54 }
0x31c0   :  { %6666 = vrot.lane.b32.xlu1 %v6664_v18, %s9719_s29 }
0x322a   :  { %v6673_v9 = vpop.permute.xlu1 %6672 }
0x322b   :  { %9296 = vmatmul.mubr.msk.f32.vlgmr.msra.gmra.mxu0 %vm138_vm1, %v6673_v9 }
0x322c   :  { %9306 = vmatpush3.msra.mxu0 %v10658_v8  ;;  %9309 = vmatprep.mubr.msk.f32.mxu0 %vm9713_vm0, %v9712_v0 }
0x322d   :  { %v6776_v12 = vpop.permute.xlu0 %6775  ;;  %9307 = vmatprep.subr.mxu0 %v9712_v0 }
0x322e   :  { %9303 = vmatmul.mubr.msk.f32.vlgmr.msra.gmra.mxu1 %vm138_vm1, %v6776_v12  ;;  %9308 = vmatpush3.msra.mxu0 %v10661_v50  ;;  %v9630_v50 = vld [vmem:[#allocation6 + $0xf0] sm:$0xff] }
0x322f   :  { %9313 = vmatpush3.msra.mxu1 %v10701_v20  ;;  %9310 = vmatmul.mubr.msk.f32.vlgmr.msra.gmra.mxu0 %vm138_vm1, %v6673_v9  ;;  %v11022_v20 = vld [vmem:[#allocation6 + $0x118] sm:$0xff] }
0x3230   :  { %9314 = vmatprep.subr.mxu1 %v9712_v0  ;;  %9319 = vmatprep.subr.mxu0 %v9712_v0 }
0x3231   :  { %9320 = vmatpush3.msra.mxu0 %v10714_v23  ;;  %9315 = vmatpush3.msra.mxu1 %v10710_v17  ;;  %v9632_v17 = vld [vmem:[#allocation6 + $0xe8] sm:$0xff]  ;;  %v11028_v23 = vld [vmem:[#allocation6 + $0x110] sm:$0xff] }
0x3232   :  { %v6667_v8 = vpop.permute.xlu1 %6666  ;;  %9316 = vmatprep.mubr.msk.f32.mxu1 %vm9713_vm0, %v9712_v0  ;;  %9321 = vmatprep.subr.mxu0 %v9712_v0 }
0x3233   :  { %6669 = vst.msk [vmem:[#allocation8 + $0x6] sm:$0x3] %vm5352_vm12, %v6667_v8  ;;  %9317 = vmatmul.mubr.msk.f32.vlgmr.msra.gmra.mxu1 %vm138_vm1, %v6667_v8  ;;  %9322 = vmatpush3.msra.mxu0 %v10721_v2 }
0x3234   :  { %9323 = vmatprep.mubr.msk.f32.mxu0 %vm9713_vm0, %v9712_v0  ;;  %9326 = vmatprep.subr.mxu1 %v9712_v0 }
0x3235   :  { %9324 = vmatmul.mubr.msk.f32.vlgmr.msra.gmra.mxu0 %vm138_vm1, %v6776_v12  ;;  %9327 = vmatpush3.msra.mxu1 %v9630_v50 }
0x3236   :  { %9333 = vmatprep.subr.mxu0 %v9712_v0  ;;  %9328 = vmatprep.subr.mxu1 %v9712_v0 }
0x3237   :  { %9334 = vmatpush3.msra.mxu0 %v11022_v20  ;;  %9329 = vmatpush3.msra.mxu1 %v9632_v17  ;;  %v9635_v17 = vld [vmem:[#allocation6 + $0x108] sm:$0xff] }
0x3238   :  { %9335 = vmatprep.subr.mxu0 %v9712_v0  ;;  %9330 = vmatprep.mubr.msk.f32.mxu1 %vm9713_vm0, %v9712_v0 }
0x3239   :  { %9336 = vmatpush3.msra.mxu0 %v11028_v23  ;;  %9337 = vmatprep.mubr.msk.f32.mxu0 %vm9713_vm0, %v9712_v0 }
0x323a   :  { %9340 = vmatprep.subr.mxu1 %v9712_v0  ;;  %9347 = vmatprep.subr.mxu0 %v9712_v0 }
0x32eb   :  { %v6742_v2 = vpop.f32.mrf.mxu0 }
0x32ec   :  { %v6747_v14 = vrot.slane %v6742_v2, 4  ;;  %v11076_v2 = vld [vmem:[#allocation6 + $0x140] sm:$0xff] }
0x32ed   :  { %v9297_v46 = vpop.f32.mrf.mxu0 }
0x32ee   :  { %v6749_v40 = vadd.f32 %v6747_v14, %v10622_v30  ;;  %v6845_v16 = vpop.f32.mrf.mxu1  ;;  %v9637_v14 = vld [vmem:[#allocation6 + $0x100] sm:$0xff] }
0x32ef   :  { %v6846_v39 = vadd.f32 %v11036_v37, %v6845_v16  ;;  %v6915_v45 = vpop.f32.mrf.mxu0  ;;  %v11091_v16 = vld [vmem:[#allocation6 + $0x130] sm:$0xff] }
0x32f0   :  { %v6750_v4 = vmul.f32 %v6749_v40, %v10627_v36  ;;  %v9304_v44 = vpop.f32.mrf.mxu1  ;;  %v11083_v40 = vld [vmem:[#allocation6 + $0x138] sm:$0xff] }
0x32f1   :  { %v6919_v42 = vadd.f32 %v6915_v45, %v6846_v39  ;;  %v9311_v32 = vpop.f32.mrf.mxu0  ;;  %v11098_v39 = vld [vmem:[#allocation6 + $0x128] sm:$0xff] }
0x32f2   :  { %9572 = vtanh.f32 %v6750_v4 }
0x32f3   :  { %v6920_v53 = vmul.f32 %v6919_v42, %v10627_v36  ;;  %v7009_v47 = vpop.f32.mrf.mxu1 }
0x32f4   :  { %v7010_v6 = vadd.f32 %v10746_v7, %v7009_v47 }
0x32f5   :  { %9574 = vtanh.f32 %v6920_v53  ;;  %v9318_v15 = vpop.f32.mrf.mxu1  ;;  %v7079_v41 = vpop.f32.mrf.mxu0 }
0x32f6   :  { %v7083_v43 = vadd.f32 %v7079_v41, %v7010_v6 }
0x32f7   :  { %v9325_v56 = vpop.f32.mrf.mxu0 }
0x32f8   :  { %v7084_v52 = vmul.f32 %v7083_v43, %v10627_v36 }
0x32fa   :  { %9576 = vtanh.f32 %v7084_v52  ;;  %v11117_v52 = vld [vmem:[#allocation6 + $0x148] ss:$0 sm:$0xff] }
0x32ff   :  { %v9573_v19 = vpop.eup %9572 }
0x3300   :  { %v6752_v48 = vmul.f32 %v9573_v19, %v10627_v36 }
0x3302   :  { %v9575_v24 = vpop.eup %9574  ;;  %v6753_v26 = vadd.f32 %v6752_v48, %v10632_v10 }
0x3303   :  { %v6922_v51 = vmul.f32 %v9575_v24, %v10627_v36 }
0x3304   :  { %6759 = vrot.lane.b32.xlu0 %v6753_v26, %s9717_s3  ;;  %v6757_v29 = vmul.f32 %v6755_v31, %v6753_v26 }
0x3305   :  { %v6923_v7 = vadd.f32 %v6922_v51, %v10632_v10 }
0x3307   :  { %v9577_v54 = vpop.eup %9576  ;;  %6926 = vrot.lane.b32.xlu1 %v6923_v7, %s9717_s3  ;;  %v6924_v62 = vmul.f32 %v6923_v7, %v10984_v61 }
0x3308   :  { %v7086_v57 = vmul.f32 %v9577_v54, %v10627_v36 }
0x330a   :  { %v7087_v27 = vadd.f32 %v7086_v57, %v10632_v10 }
0x330c   :  { %7090 = vrot.lane.b32.xlu0 %v7087_v27, %s9717_s3  ;;  %v7088_v55 = vmul.f32 %v7087_v27, %v10988_v63 }
0x3376   :  { %v6760_v49 = vpop.permute.xlu0 %6759 }
0x3377   :  { %v6762_v33 = vmul.f32 %v6760_v49, %v6753_v26 }
0x3379   :  { %v6927_v22 = vpop.permute.xlu1 %6926  ;;  %6764 = vrot.lane.b32.xlu1 %v6762_v33, %s9718_s28 }
0x337a   :  { %v6929_v34 = vmul.f32 %v6927_v22, %v6923_v7 }
0x337c   :  { %6931 = vrot.lane.b32.xlu0 %v6929_v34, %s9718_s28 }
0x337e   :  { %v7091_v28 = vpop.permute.xlu0 %7090 }
0x337f   :  { %v7093_v11 = vmul.f32 %v7091_v28, %v7087_v27 }
0x3381   :  { %7095 = vrot.lane.b32.xlu1 %v7093_v11, %s9718_s28 }
0x33eb   :  { %v6765_v35 = vpop.permute.xlu1 %6764 }
0x33ec   :  { %v11056_v60 = vadd.f32 %v6765_v35, %v6757_v29 }
0x33ee   :  { %9578 = vtanh.f32 %v11056_v60  ;;  %v6932_v13 = vpop.permute.xlu0 %6931 }
0x33ef   :  { %v11060_v25 = vadd.f32 %v6932_v13, %v6924_v62  ;;  %v7195_v13 = vrot.slane %v11056_v60, 6 }
0x33f1   :  { %9580 = vtanh.f32 %v11060_v25 }
0x33f3   :  { %v7096_v58 = vpop.permute.xlu1 %7095 }
0x33f4   :  { %v11064_v1 = vadd.f32 %v7096_v58, %v7088_v55 }
0x33f6   :  { %9582 = vtanh.f32 %v11064_v1 }
0x33fb   :  { %v9579_v59 = vpop.eup %9578 }
0x33fc   :  { %6770 = vrot.lane.b32.xlu0 %v9579_v59, %s9716_s1 }
0x33fe   :  { %v9581_v3 = vpop.eup %9580 }
0x33ff   :  { %6937 = vrot.lane.b32.xlu1 %v9581_v3, %s9716_s1 }
0x3403   :  { %v9583_v61 = vpop.eup %9582 }
0x3404   :  { %7101 = vrot.lane.b32.xlu0 %v9583_v61, %s9716_s1 }
0x346e   :  { %v6771_v5 = vpop.permute.xlu0 %6770 }
0x346f   :  { %v6773_v38 = vmul.f32 %v6771_v5, %v6753_v26 }
0x3471   :  { %v7111_v21 = vrot.slane %v6773_v38, 4  ;;  %v6938_v18 = vpop.permute.xlu1 %6937 }
0x3472   :  { %v6940_v9 = vmul.f32 %v6938_v18, %v6923_v7 }
0x3473   :  { %7112 = vrot.lane.b32.xlu1 %v7111_v21, %s9719_s29 }
0x3474   :  { %7215 = vrot.lane.b32.xlu0 %v6940_v9, %s9719_s29 }
0x3476   :  { %v7102_v63 = vpop.permute.xlu0 %7101 }
0x3477   :  { %v7104_v12 = vmul.f32 %v7102_v63, %v7087_v27 }
0x3479   :  { %7106 = vrot.lane.b32.xlu1 %v7104_v12, %s9719_s29 }
0x34e5   :  { %v7113_v8 = vpop.permute.xlu1 %7112 }
0x34e6   :  { %v7216_v50 = vpop.permute.xlu0 %7215  ;;  %9331 = vmatmul.mubr.msk.f32.vlgmr.msra.gmra.mxu1 %vm138_vm1, %v7113_v8 }
0x34e7   :  { %9338 = vmatmul.mubr.msk.f32.vlgmr.msra.gmra.mxu0 %vm138_vm1, %v7216_v50  ;;  %9341 = vmatpush3.msra.mxu1 %v9635_v17 }
0x34e8   :  { %9342 = vmatprep.subr.mxu1 %v9712_v0  ;;  %9348 = vmatpush3.msra.mxu0 %v11076_v2 }
0x34e9   :  { %9343 = vmatpush3.msra.mxu1 %v9637_v14  ;;  %9349 = vmatprep.subr.mxu0 %v9712_v0 }
0x34ea   :  { %9344 = vmatprep.mubr.msk.f32.mxu1 %vm9713_vm0, %v9712_v0  ;;  %9354 = vmatprep.subr.mxu1 %v9712_v0 }
0x34eb   :  { %v7107_v46 = vpop.permute.xlu1 %7106  ;;  %9350 = vmatpush3.msra.mxu0 %v11083_v40  ;;  %9351 = vmatprep.mubr.msk.f32.mxu0 %vm9713_vm0, %v9712_v0 }
0x34ec   :  { %7109 = vst.msk [vmem:[#allocation8 + $0x8] sm:$0x3] %vm5352_vm12, %v7107_v46  ;;  %9345 = vmatmul.mubr.msk.f32.vlgmr.msra.gmra.mxu1 %vm138_vm1, %v7113_v8  ;;  %9352 = vmatmul.mubr.msk.f32.vlgmr.msra.gmra.mxu0 %vm138_vm1, %v7107_v46 }
0x34ed   :  { %9355 = vmatpush3.msra.mxu1 %v11091_v16  ;;  %9358 = vmatprep.mubr.msk.f32.mxu1 %vm9713_vm0, %v9712_v0 }
0x34ee   :  { %9356 = vmatprep.subr.mxu1 %v9712_v0  ;;  %9361 = vmatprep.subr.mxu0 %v9712_v0 }
0x34ef   :  { %9357 = vmatpush3.msra.mxu1 %v11098_v39  ;;  %9362 = vmatpush3.msra.mxu0 %v11022_v20 }
0x34f0   :  { %9359 = vmatmul.mubr.msk.f32.vlgmr.msra.gmra.mxu1 %vm138_vm1, %v7216_v50  ;;  %9368 = vmatprep.subr.mxu1 %v9712_v0 }
0x34f1   :  { %9363 = vmatprep.subr.mxu0 %v9712_v0  ;;  %9369 = vmatpush3.msra.mxu1 %v9635_v17 }
0x34f2   :  { %9364 = vmatpush3.msra.mxu0 %v11028_v23  ;;  %9370 = vmatprep.subr.mxu1 %v9712_v0 }
0x34f3   :  { %9365 = vmatprep.mubr.msk.f32.mxu0 %vm9713_vm0, %v9712_v0  ;;  %9371 = vmatpush3.msra.mxu1 %v9637_v14 }
0x34f4   :  { %9372 = vmatprep.mubr.msk.f32.mxu1 %vm9713_vm0, %v9712_v0  ;;  %9375 = vmatprep.subr.mxu0 %v9712_v0 }
0x34f5   :  { %9382 = vmatprep.subr.mxu1 %v9712_v0 }
0x35a6   :  { %v7182_v20 = vpop.f32.mrf.mxu1 }
0x35a7   :  { %v7187_v45 = vrot.slane %v7182_v20, 2  ;;  %v7285_v4 = vpop.f32.mrf.mxu0 }
0x35a8   :  { %v9332_v44 = vpop.f32.mrf.mxu1  ;;  %v7286_v53 = vadd.f32 %v11036_v37, %v7285_v4 }
0x35a9   :  { %v7189_v42 = vadd.f32 %v7187_v45, %v10622_v30  ;;  %v9339_v23 = vpop.f32.mrf.mxu0 }
0x35ab   :  { %v7190_v32 = vmul.f32 %v7189_v42, %v10627_v36 }
0x35ac   :  { %v7355_v47 = vpop.f32.mrf.mxu1  ;;  %v7449_v6 = vpop.f32.mrf.mxu0 }
0x35ad   :  { %9584 = vtanh.f32 %v7190_v32  ;;  %v7359_v15 = vadd.f32 %v7355_v47, %v7286_v53  ;;  %v7450_v19 = vadd.f32 %v11117_v52, %v7449_v6 }
0x35ae   :  { %v9346_v41 = vpop.f32.mrf.mxu1  ;;  %v9353_v43 = vpop.f32.mrf.mxu0 }
0x35af   :  { %v7360_v56 = vmul.f32 %v7359_v15, %v10627_v36 }
0x35b0   :  { %v7519_v48 = vpop.f32.mrf.mxu1 }
0x35b1   :  { %9586 = vtanh.f32 %v7360_v56  ;;  %v7523_v30 = vadd.f32 %v7519_v48, %v7450_v19 }
0x35b2   :  { %v9360_v24 = vpop.f32.mrf.mxu1 }
0x35b3   :  { %v7524_v26 = vmul.f32 %v7523_v30, %v10627_v36 }
0x35b5   :  { %9588 = vtanh.f32 %v7524_v26 }
0x35ba   :  { %v9585_v51 = vpop.eup %9584 }
0x35bb   :  { %v7192_v7 = vmul.f32 %v9585_v51, %v10627_v36 }
0x35bd   :  { %v7193_v54 = vadd.f32 %v7192_v7, %v10632_v10 }
0x35be   :  { %v9587_v57 = vpop.eup %9586 }
0x35bf   :  { %7199 = vrot.lane.b32.xlu0 %v7193_v54, %s9717_s3  ;;  %v7362_v27 = vmul.f32 %v9587_v57, %v10627_v36  ;;  %v7197_v55 = vmul.f32 %v7195_v13, %v7193_v54 }
0x35c1   :  { %v7363_v49 = vadd.f32 %v7362_v27, %v10632_v10 }
0x35c2   :  { %v9589_v33 = vpop.eup %9588 }
0x35c3   :  { %7366 = vrot.lane.b32.xlu1 %v7363_v49, %s9717_s3  ;;  %v7526_v22 = vmul.f32 %v9589_v33, %v10627_v36  ;;  %v7364_v3 = vmul.f32 %v7363_v49, %v11060_v25 }
0x35c5   :  { %v7527_v34 = vadd.f32 %v7526_v22, %v10632_v10 }
0x35c7   :  { %7530 = vrot.lane.b32.xlu0 %v7527_v34, %s9717_s3  ;;  %v7528_v38 = vmul.f32 %v7527_v34, %v11064_v1 }
0x3631   :  { %v7200_v28 = vpop.permute.xlu0 %7199 }
0x3632   :  { %v7202_v11 = vmul.f32 %v7200_v28, %v7193_v54 }
0x3634   :  { %7204 = vrot.lane.b32.xlu1 %v7202_v11, %s9718_s28 }
0x3635   :  { %v7367_v31 = vpop.permute.xlu1 %7366 }
0x3636   :  { %v7369_v29 = vmul.f32 %v7367_v31, %v7363_v49 }
0x3638   :  { %7371 = vrot.lane.b32.xlu0 %v7369_v29, %s9718_s28 }
0x3639   :  { %v7531_v35 = vpop.permute.xlu0 %7530 }
0x363a   :  { %v7533_v62 = vmul.f32 %v7531_v35, %v7527_v34 }
0x363c   :  { %7535 = vrot.lane.b32.xlu1 %v7533_v62, %s9718_s28 }
0x36a6   :  { %v7205_v58 = vpop.permute.xlu1 %7204 }
0x36a7   :  { %v7207_v59 = vadd.f32 %v7205_v58, %v7197_v55 }
0x36a9   :  { %9590 = vtanh.f32 %v7207_v59 }
0x36aa   :  { %v7372_v61 = vpop.permute.xlu0 %7371 }
0x36ab   :  { %v11135_v5 = vadd.f32 %v7372_v61, %v7364_v3 }
0x36ad   :  { %9592 = vtanh.f32 %v11135_v5 }
0x36ae   :  { %v7536_v21 = vpop.permute.xlu1 %7535 }
0x36af   :  { %v11139_v18 = vadd.f32 %v7536_v21, %v7528_v38 }
0x36b1   :  { %9594 = vtanh.f32 %v11139_v18 }
0x36b6   :  { %v9591_v9 = vpop.eup %9590 }
0x36b7   :  { %7210 = vrot.lane.b32.xlu0 %v9591_v9, %s9716_s1 }
0x36ba   :  { %v9593_v60 = vpop.eup %9592 }
0x36bb   :  { %7377 = vrot.lane.b32.xlu1 %v9593_v60, %s9716_s1 }
0x36be   :  { %v9595_v63 = vpop.eup %9594 }
0x36bf   :  { %7541 = vrot.lane.b32.xlu0 %v9595_v63, %s9716_s1 }
0x3729   :  { %v7211_v25 = vpop.permute.xlu0 %7210 }
0x372a   :  { %v7213_v12 = vmul.f32 %v7211_v25, %v7193_v54 }
0x372c   :  { %v7626_v8 = vrot.slane %v7213_v12, 6 }
0x372d   :  { %v7378_v50 = vpop.permute.xlu1 %7377 }
0x372e   :  { %v7380_v17 = vmul.f32 %v7378_v50, %v7363_v49  ;;  %7627 = vrot.lane.b32.xlu0 %v7626_v8, %s9719_s29 }
0x3730   :  { %7551 = vrot.lane.b32.xlu1 %v7380_v17, %s9719_s29 }
0x3731   :  { %v7542_v1 = vpop.permute.xlu0 %7541 }
0x3732   :  { %v7544_v14 = vmul.f32 %v7542_v1, %v7527_v34 }
0x3734   :  { %7546 = vrot.lane.b32.xlu1 %v7544_v14, %s9719_s29 }
0x37a0   :  { %v7628_v46 = vpop.permute.xlu0 %7627 }
0x37a1   :  { %9373 = vmatmul.mubr.msk.f32.vlgmr.msra.gmra.mxu1 %vm138_vm1, %v7628_v46 }
0x37a2   :  { %v7552_v20 = vpop.permute.xlu1 %7551  ;;  %9383 = vmatpush3.msra.mxu1 %v11091_v16  ;;  %9386 = vmatprep.mubr.msk.f32.mxu1 %vm9713_vm0, %v9712_v0 }
0x37a3   :  { %9366 = vmatmul.mubr.msk.f32.vlgmr.msra.gmra.mxu0 %vm138_vm1, %v7552_v20  ;;  %9384 = vmatprep.subr.mxu1 %v9712_v0 }
0x37a4   :  { %9376 = vmatpush3.msra.mxu0 %v11076_v2  ;;  %9379 = vmatprep.mubr.msk.f32.mxu0 %vm9713_vm0, %v9712_v0 }
0x37a5   :  { %9377 = vmatprep.subr.mxu0 %v9712_v0  ;;  %9385 = vmatpush3.msra.mxu1 %v11098_v39 }
0x37a6   :  { %9378 = vmatpush3.msra.mxu0 %v11083_v40  ;;  %v7547_v45 = vpop.permute.xlu1 %7546  ;;  %9387 = vmatmul.mubr.msk.f32.vlgmr.msra.gmra.mxu1 %vm138_vm1, %v7552_v20 }
0x37a7   :  { %7549 = vst.msk [vmem:[#allocation8 + $0xa] sm:$0x3] %vm5352_vm12, %v7547_v45  ;;  %9380 = vmatmul.mubr.msk.f32.vlgmr.msra.gmra.mxu0 %vm138_vm1, %v7547_v45  ;;  %9396 = vmatprep.subr.mxu1 %v9712_v0 }
0x37a8   :  { %9397 = vmatpush3.msra.mxu1 %v11091_v16  ;;  %9389 = vmatprep.subr.mxu0 %v9712_v0 }
0x37a9   :  { %9398 = vmatprep.subr.mxu1 %v9712_v0  ;;  %9400 = vmatprep.mubr.msk.f32.mxu1 %vm9713_vm0, %v9712_v0 }
0x37aa   :  { %9399 = vmatpush3.msra.mxu1 %v11098_v39  ;;  %9390 = vmatpush3.msra.mxu0 %v11076_v2 }
0x37ab   :  { %9391 = vmatprep.subr.mxu0 %v9712_v0  ;;  %9393 = vmatprep.mubr.msk.f32.mxu0 %vm9713_vm0, %v9712_v0 }
0x37ac   :  { %9392 = vmatpush3.msra.mxu0 %v11083_v40 }
0x3861   :  { %v7697_v4 = vpop.f32.mrf.mxu1 }
0x3863   :  { %v7621_v16 = vpop.f32.mrf.mxu0  ;;  %v9374_v44 = vpop.f32.mrf.mxu1 }
0x3864   :  { %v7622_v42 = vadd.f32 %v11036_v37, %v7621_v16 }
0x3865   :  { %v9367_v23 = vpop.f32.mrf.mxu0 }
0x3866   :  { %v7701_v32 = vadd.f32 %v7697_v4, %v7622_v42  ;;  %v7861_v53 = vpop.f32.mrf.mxu1 }
0x3867   :  { %v7791_v47 = vpop.f32.mrf.mxu0 }
0x3868   :  { %v7702_v39 = vmul.f32 %v7701_v32, %v10627_v36  ;;  %v7792_v2 = vadd.f32 %v11117_v52, %v7791_v47  ;;  %v9388_v6 = vpop.f32.mrf.mxu1 }
0x3869   :  { %v9381_v15 = vpop.f32.mrf.mxu0 }
0x386a   :  { %9596 = vtanh.f32 %v7702_v39  ;;  %v7865_v41 = vadd.f32 %v7861_v53, %v7792_v2 }
0x386c   :  { %v7866_v0 = vmul.f32 %v7865_v41, %v10627_v36 }
0x386e   :  { %9598 = vtanh.f32 %v7866_v0 }
0x3877   :  { %v9597_v40 = vpop.eup %9596 }
0x3878   :  { %v7704_v43 = vmul.f32 %v9597_v40, %v10627_v36 }
0x387a   :  { %v7705_v37 = vadd.f32 %v7704_v43, %v10632_v10 }
0x387b   :  { %v9599_v56 = vpop.eup %9598 }
0x387c   :  { %7708 = vrot.lane.b32.xlu1 %v7705_v37, %s9717_s3  ;;  %v7868_v19 = vmul.f32 %v9599_v56, %v10627_v36  ;;  %v7706_v7 = vmul.f32 %v7705_v37, %v11135_v5 }
0x387e   :  { %v7869_v48 = vadd.f32 %v7868_v19, %v10632_v10 }
0x3880   :  { %7872 = vrot.lane.b32.xlu0 %v7869_v48, %s9717_s3  ;;  %v7870_v27 = vmul.f32 %v7869_v48, %v11139_v18 }
0x38ee   :  { %v7709_v30 = vpop.permute.xlu1 %7708 }
0x38ef   :  { %v7711_v24 = vmul.f32 %v7709_v30, %v7705_v37 }
0x38f1   :  { %7713 = vrot.lane.b32.xlu1 %v7711_v24, %s9718_s28 }
0x38f2   :  { %v7873_v26 = vpop.permute.xlu0 %7872 }
0x38f3   :  { %v7875_v51 = vmul.f32 %v7873_v26, %v7869_v48 }
0x38f5   :  { %7877 = vrot.lane.b32.xlu0 %v7875_v51, %s9718_s28 }
0x3963   :  { %v7714_v54 = vpop.permute.xlu1 %7713 }
0x3964   :  { %v7716_v57 = vadd.f32 %v7714_v54, %v7706_v7 }
0x3966   :  { %9600 = vtanh.f32 %v7716_v57 }
0x3967   :  { %v7878_v49 = vpop.permute.xlu0 %7877 }
0x3968   :  { %v7880_v33 = vadd.f32 %v7878_v49, %v7870_v27 }
0x396a   :  { %9602 = vtanh.f32 %v7880_v33 }
0x3973   :  { %v9601_v22 = vpop.eup %9600 }
0x3974   :  { %7719 = vrot.lane.b32.xlu1 %v9601_v22, %s9716_s1 }
0x3977   :  { %v9603_v34 = vpop.eup %9602 }
0x3978   :  { %7883 = vrot.lane.b32.xlu0 %v9603_v34, %s9716_s1 }
0x39e6   :  { %v7720_v28 = vpop.permute.xlu1 %7719 }
0x39e7   :  { %v7722_v11 = vmul.f32 %v7720_v28, %v7705_v37 }
0x39e9   :  { %7965 = vrot.lane.b32.xlu1 %v7722_v11, %s9719_s29 }
0x39ea   :  { %v7884_v31 = vpop.permute.xlu0 %7883 }
0x39eb   :  { %v7886_v29 = vmul.f32 %v7884_v31, %v7869_v48 }
0x39ed   :  { %7888 = vrot.lane.b32.xlu0 %v7886_v29, %s9719_s29 }
0x3a5b   :  { %v7966_v35 = vpop.permute.xlu1 %7965 }
0x3a5c   :  { %9401 = vmatmul.mubr.msk.f32.vlgmr.msra.gmra.mxu1 %vm138_vm1, %v7966_v35 }
0x3a5f   :  { %v7889_v62 = vpop.permute.xlu0 %7888 }
0x3a60   :  { %7891 = vst.msk [vmem:[#allocation8 + $0xc] sm:$0x3] %vm5352_vm12, %v7889_v62  ;;  %9394 = vmatmul.mubr.msk.f32.vlgmr.msra.gmra.mxu0 %vm138_vm1, %v7889_v62 }
0x3b1c   :  { %v8035_v13 = vpop.f32.mrf.mxu1 }
0x3b1e   :  { %v9402_v55 = vpop.f32.mrf.mxu1 }
0x3b20   :  { %v7960_v58 = vpop.f32.mrf.mxu0 }
0x3b21   :  { %v7961_v59 = vadd.f32 %v11117_v52, %v7960_v58 }
0x3b22   :  { %v9395_v3 = vpop.f32.mrf.mxu0 }
0x3b23   :  { %v8039_v61 = vadd.f32 %v8035_v13, %v7961_v59 }
0x3b25   :  { %v8040_v5 = vmul.f32 %v8039_v61, %v10627_v36 }
0x3b27   :  { %9604 = vtanh.f32 %v8040_v5 }
0x3b34   :  { %v9605_v38 = vpop.eup %9604 }
0x3b35   :  { %v8042_v21 = vmul.f32 %v9605_v38, %v10627_v36 }
0x3b37   :  { %v8043_v18 = vadd.f32 %v8042_v21, %v10632_v10 }
0x3b39   :  { %8046 = vrot.lane.b32.xlu0 %v8043_v18, %s9717_s3  ;;  %v8044_v63 = vmul.f32 %v8043_v18, %v7880_v33 }
0x3bab   :  { %v8047_v9 = vpop.permute.xlu0 %8046 }
0x3bac   :  { %v8049_v60 = vmul.f32 %v8047_v9, %v8043_v18 }
0x3bae   :  { %8051 = vrot.lane.b32.xlu1 %v8049_v60, %s9718_s28 }
0x3c20   :  { %v8052_v25 = vpop.permute.xlu1 %8051 }
0x3c21   :  { %v8054_v12 = vadd.f32 %v8052_v25, %v8044_v63 }
0x3c23   :  { %9606 = vtanh.f32 %v8054_v12 }
0x3c30   :  { %v9607_v52 = vpop.eup %9606 }
0x3c31   :  { %8057 = vrot.lane.b32.xlu0 %v9607_v52, %s9716_s1 }
0x3ca3   :  { %v8058_v8 = vpop.permute.xlu0 %8057 }
0x3ca4   :  { %v8060_v50 = vmul.f32 %v8058_v8, %v8043_v18 }
0x3ca6   :  { %8062 = vrot.lane.b32.xlu1 %v8060_v50, %s9719_s29 }
0x3d18   :  { %v8063_v36 = vpop.permute.xlu1 %8062 }
0x3d19   :  { %8065 = vst.msk [vmem:[#allocation8 + $0xe] sm:$0x3] %vm5352_vm12, %v8063_v36 }
0x3d1a   :  { %9693 = shalt.err (!%p9690_p0)
}
0x3d1b   :  { %8077 = dma.vmem_to_hbm [thread:$0]  %s8072_s4, 256, %s11213_s2, [#allocation5], %s9709_s15, %s9709_s15, %s9710_s16  }
0x3d1c   :  { %9706 = dma.done.wait [#allocation5], 256  }
0x3d1d   :  { %9707 = vsyncadd [#allocation5], 4294967040 }
0x3d1e   :  { %8085 = vsyncpa [#allocation4], 1 }
0x3d1f   :  { %8086 = vsyncpa [#allocation7], 1 }
0x3d20   :  { %8087 = vsyncpa [#allocation5], 1 }

</bundles_post_ra>
